<compile_context>
chip_gen: v6e
topology: v6e:2x2x1
jax: 0.10.0
libtpu: 0.0.40
codegen_flags: <defaults>
</compile_context>

<pallas_src>
import functools

import numpy as np

import jax
import jax.numpy as jnp
from jax import lax
from jax.experimental import pallas as pl
from jax.experimental.pallas import tpu as pltpu


def _largest_divisor(n, cap):
    for t in range(min(n, cap), 0, -1):
        if n % t == 0:
            return t
    return 1


def _pick_row_tile(mf):
    # Conservative cap (v7x has only 64 MiB VMEM / 32 MiB scoped default);
    # per-tile buffers stay in the tens of KB at these channel counts, so 512
    # folded rows is plenty while leaving the default vmem limit untouched.
    if mf >= 512:
        return 512
    if mf % 8 == 0 or mf < 8:
        return mf
    return (mf // 8) * 8


# ----------------------------------------------------------------------------
# Kernel 1: GRU recurrence, T-chunked, input projection fused into the kernel.
# ----------------------------------------------------------------------------
def _gru_kernel(x_ref, wi_ref, wh_ref, bi_ref, bh_ref, y_ref,
                h_ref, gir_ref, giz_ref, gin_ref):
    t_chunk = pl.program_id(1)

    @pl.when(t_chunk == 0)
    def _init_h():
        # rnn_state=None -> zero initial hidden state.
        h_ref[...] = jnp.zeros_like(h_ref)

    tc_sz, nt_sz, _ = x_ref.shape

    # Per-chunk batched input projection (off the serial critical path):
    # three bf16 MXU dots, one per gate, into f32 VMEM scratch.
    x2 = x_ref[...].reshape(tc_sz * nt_sz, x_ref.shape[-1])
    gir_ref[...] = (jnp.dot(x2, wi_ref[0], preferred_element_type=jnp.float32)
                    + bi_ref[0])
    giz_ref[...] = (jnp.dot(x2, wi_ref[1], preferred_element_type=jnp.float32)
                    + bi_ref[1])
    gin_ref[...] = (jnp.dot(x2, wi_ref[2], preferred_element_type=jnp.float32)
                    + bi_ref[2])

    wh_r, wh_z, wh_n = wh_ref[0], wh_ref[1], wh_ref[2]
    bh_r, bh_z, bh_n = bh_ref[0], bh_ref[1], bh_ref[2]

    def step(t, h):
        hb = h.astype(jnp.bfloat16)
        # Per-gate recurrent dots: no lane-unaligned gate slicing on the
        # serial path (gate math stays in f32).
        gh_r = jnp.dot(hb, wh_r, preferred_element_type=jnp.float32) + bh_r
        gh_z = jnp.dot(hb, wh_z, preferred_element_type=jnp.float32) + bh_z
        gh_n = jnp.dot(hb, wh_n, preferred_element_type=jnp.float32) + bh_n
        row0 = pl.multiple_of(t * nt_sz, nt_sz)
        gi_r = gir_ref[pl.ds(row0, nt_sz), :]
        gi_z = giz_ref[pl.ds(row0, nt_sz), :]
        gi_n = gin_ref[pl.ds(row0, nt_sz), :]
        r = jax.nn.sigmoid(gi_r + gh_r)
        z = jax.nn.sigmoid(gi_z + gh_z)
        n = jnp.tanh(gi_n + r * gh_n)
        h_new = (1.0 - z) * n + z * h
        y_ref[t] = h_new.astype(y_ref.dtype)        # bf16 hidden-sequence output
        return h_new

    h_last = lax.fori_loop(0, tc_sz, step, h_ref[...], unroll=min(8, tc_sz))
    h_ref[...] = h_last                              # carry h across T-chunks


def gru_forward(x_tm, wi, wh, bi, bh, *, hh, nt, tc):
    """x_tm: (T, N, 2C) bf16  ->  y: (T, N, 2H) bf16 hidden sequence."""
    t_total, n_total, i_sz = x_tm.shape
    grid = (n_total // nt, t_total // tc)
    return pl.pallas_call(
        _gru_kernel,
        out_shape=jax.ShapeDtypeStruct((t_total, n_total, hh), jnp.bfloat16),
        grid=grid,
        in_specs=[
            pl.BlockSpec((tc, nt, i_sz), lambda nb, tk: (tk, nb, 0)),
            pl.BlockSpec((3, i_sz, hh), lambda nb, tk: (0, 0, 0)),
            pl.BlockSpec((3, hh, hh), lambda nb, tk: (0, 0, 0)),
            pl.BlockSpec((3, 1, hh), lambda nb, tk: (0, 0, 0)),
            pl.BlockSpec((3, 1, hh), lambda nb, tk: (0, 0, 0)),
        ],
        out_specs=pl.BlockSpec((tc, nt, hh), lambda nb, tk: (tk, nb, 0)),
        scratch_shapes=[
            pltpu.VMEM((nt, hh), jnp.float32),        # persistent h carry
            pltpu.VMEM((tc * nt, hh), jnp.float32),   # gi_r
            pltpu.VMEM((tc * nt, hh), jnp.float32),   # gi_z
            pltpu.VMEM((tc * nt, hh), jnp.float32),   # gi_n
        ],
        compiler_params=pltpu.CompilerParams(
            # Leading N-axis "parallel": uses v7x's 2nd TensorCore; a plain
            # sequential loop on v5e/v6e.  T-axis carries h -> "arbitrary".
            dimension_semantics=("parallel", "arbitrary")),
    )(x_tm, wi, wh, bi, bh)


# ----------------------------------------------------------------------------
# Kernel 2: fused complex 1x1 conv + ComplexBatchNorm2d (batch stats) + ReLU.
#   grid = (phase, M-tiles): phase 0 accumulates stats, phase 1 recomputes the
#   tiny conv dot and applies whitening + affine + ReLU.  All work happens in
#   the "folded" lane-dense layout (fold consecutive rows packed into lanes).
# ----------------------------------------------------------------------------
def _conv_bn_relu_kernel(y_ref, w_ref, b_ref, ga_ref, gb_ref, beta_ref,
                         perm_ref, gsum_ref, out_ref,
                         s1_ref, s2_ref, sx_ref, *, n_valid_rows, eps):
    p = pl.program_id(0)
    i = pl.program_id(1)

    @pl.when(jnp.logical_and(p == 0, i == 0))
    def _init_stats():
        s1_ref[...] = jnp.zeros_like(s1_ref)
        s2_ref[...] = jnp.zeros_like(s2_ref)
        sx_ref[...] = jnp.zeros_like(sx_ref)

    # Folded complex 1x1 conv: one lane-dense bf16 MXU dot (K=fold*2H, N=128).
    c = jnp.dot(y_ref[...], w_ref[...],
                preferred_element_type=jnp.float32) + b_ref[...]
    perm = perm_ref[...]                       # real<->imag partner permutation

    @pl.when(p == 0)
    def _accumulate():
        tmf = y_ref.shape[0]
        row = i * tmf + lax.broadcasted_iota(jnp.int32, (tmf, 1), 0)
        cm = jnp.where(row < n_valid_rows, c, 0.0)        # cdiv-grid tail mask
        cp = jnp.dot(cm, perm, preferred_element_type=jnp.float32)
        s1_ref[...] += jnp.sum(cm, axis=0, keepdims=True)
        s2_ref[...] += jnp.sum(cm * cm, axis=0, keepdims=True)
        sx_ref[...] += jnp.sum(cm * cp, axis=0, keepdims=True)

    @pl.when(p == 1)
    def _apply():
        gsum = gsum_ref[...]       # same-channel column sum, pre-scaled by 1/M
        m1 = jnp.dot(s1_ref[...], gsum, preferred_element_type=jnp.float32)
        q1 = jnp.dot(s2_ref[...], gsum, preferred_element_type=jnp.float32)
        x1 = jnp.dot(sx_ref[...], gsum, preferred_element_type=jnp.float32)
        m2 = jnp.dot(m1, perm, preferred_element_type=jnp.float32)
        q2 = jnp.dot(q1, perm, preferred_element_type=jnp.float32)
        var_s = q1 - m1 * m1 + eps             # self variance (Vrr / Vii)
        var_p = q2 - m2 * m2 + eps             # partner variance
        cov = x1 - m1 * m2                     # Vri
        det = jnp.sqrt(var_s * var_p - cov * cov)
        trc = jnp.sqrt(var_s + var_p + 2.0 * det)
        inv_st = 1.0 / (det * trc)
        r_s = (var_p + det) * inv_st           # inverse-sqrt 2x2 whitening coeffs
        r_p = (var_s + det) * inv_st
        r_c = -cov * inv_st
        # Uniform per-column affine:  out = A*(self - mu_self) + B*(part - mu_part) + beta
        a_coef = ga_ref[...] * r_s + gb_ref[...] * r_c
        b_coef = ga_ref[...] * r_c + gb_ref[...] * r_p
        cpart = jnp.dot(c, perm, preferred_element_type=jnp.float32)
        o = a_coef * (c - m1) + b_coef * (cpart - m2) + beta_ref[...]
        out_ref[...] = jnp.maximum(o, 0.0)     # ReLU; full 128-lane dense store


def conv_bn_relu(y_folded, wp, bias_col, ga_col, gb_col, beta_col, perm, gsum,
                 *, tmf):
    mf, kf = y_folded.shape
    nf = wp.shape[1]
    grid_m = pl.cdiv(mf, tmf)
    kernel = functools.partial(_conv_bn_relu_kernel,
                               n_valid_rows=mf, eps=1e-5)
    return pl.pallas_call(
        kernel,
        out_shape=jax.ShapeDtypeStruct((mf, nf), jnp.float32),
        grid=(2, grid_m),
        in_specs=[
            pl.BlockSpec((tmf, kf), lambda p, i: (i, 0)),
            pl.BlockSpec((kf, nf), lambda p, i: (0, 0)),
            pl.BlockSpec((1, nf), lambda p, i: (0, 0)),
            pl.BlockSpec((1, nf), lambda p, i: (0, 0)),
            pl.BlockSpec((1, nf), lambda p, i: (0, 0)),
            pl.BlockSpec((1, nf), lambda p, i: (0, 0)),
            pl.BlockSpec((nf, nf), lambda p, i: (0, 0)),
            pl.BlockSpec((nf, nf), lambda p, i: (0, 0)),
        ],
        # Phase 0 pins the out index to block 0 (writeback deferred); phase 1
        # streams valid blocks.  Output blocks are lane-dense (minor dim = nf).
        out_specs=pl.BlockSpec((tmf, nf), lambda p, i: (i * p, 0)),
        scratch_shapes=[
            pltpu.VMEM((1, nf), jnp.float32),
            pltpu.VMEM((1, nf), jnp.float32),
            pltpu.VMEM((1, nf), jnp.float32),
        ],
        compiler_params=pltpu.CompilerParams(
            dimension_semantics=("arbitrary", "arbitrary")),
    )(y_folded, wp, bias_col, ga_col, gb_col, beta_col, perm, gsum)


# ----------------------------------------------------------------------------
# TGRUBlock forward (JAX glue around the Pallas kernels)
# ----------------------------------------------------------------------------
def tgru_block(x, params):
    B, C, F_, T, _ = x.shape
    N = B * F_
    M = N * T
    I = 2 * C
    Hh = params["gru_wh"].shape[1]            # 2 * hidden_size
    O = params["conv_wr"].shape[1]
    two_o = 2 * O

    # x.permute(0,2,3,1,4).reshape(B*F, T, 2C), laid out time-major (T, N, 2C).
    x_tm = jnp.transpose(x, (3, 0, 2, 1, 4)).reshape(T, N, I).astype(jnp.bfloat16)

    # GRU grid: split N for the v7x second TensorCore when cleanly divisible.
    n_nb = 2 if (N % 32 == 0) else 1
    nt = N // n_nb
    tc = _largest_divisor(T, 32)

    # Kernel 1: GRU recurrence (zero initial state == rnn_state=None).
    # TODO(synk): non-None rnn_state input is not plumbed through.
    y = gru_forward(x_tm, params["gru_wi"], params["gru_wh"],
                    params["gru_bi"], params["gru_bh"],
                    hh=Hh, nt=nt, tc=tc)                    # (T, N, 2H) bf16

    # Lane-dense folding: pack `fold` consecutive rows into the lane dim so that
    # the conv/BN kernel's loads, matmul and stores are all >=128-lane dense.
    fold = 128 // two_o if (128 % two_o == 0) else 1
    if M % fold != 0:
        fold = 1
    mf = M // fold
    nf = fold * two_o
    y_folded = y.reshape(mf, fold * Hh)                     # free row-major reshape

    # Fused ComplexConv2d(k=1) weight, rows permuted to the GRU's interleaved
    # [r0,i0,r1,i1,...] hidden layout (de-interleave folded into the weight),
    # then block-diag expanded (kron) so the MXU emits folded rows directly.
    wr = params["conv_wr"].astype(jnp.float32)              # (H, O)
    wi = params["conv_wi"].astype(jnp.float32)
    w_top = jnp.concatenate([wr, wi], axis=1)               # rows hit by Re(y)
    w_bot = jnp.concatenate([-wi, wr], axis=1)              # rows hit by Im(y)
    w_fused = jnp.stack([w_top, w_bot], axis=1).reshape(Hh, two_o)
    wp = jnp.kron(jnp.eye(fold, dtype=jnp.float32), w_fused).astype(jnp.bfloat16)

    br = params["conv_br"].astype(jnp.float32)
    bi_c = params["conv_bi"].astype(jnp.float32)
    b_seg = jnp.concatenate([br - bi_c, br + bi_c], axis=1)  # (1, 2O)
    bias_col = jnp.tile(b_seg, (1, fold))                    # (1, nf)

    g = params["bn_gamma"]                                   # (3, O): rr, ri, ii
    bt = params["bn_beta"]                                   # (2, O): beta_r, beta_i
    ga_col = jnp.tile(jnp.concatenate([g[0], g[2]])[None, :], (1, fold))
    gb_col = jnp.tile(jnp.concatenate([g[1], g[1]])[None, :], (1, fold))
    beta_col = jnp.tile(jnp.concatenate([bt[0], bt[1]])[None, :], (1, fold))

    # Trace-time constants: real<->imag partner permutation and the 1/M-scaled
    # same-channel column-sum matrix used for per-channel batch statistics.
    col = np.arange(nf)
    cmod = col % two_o
    partner = col - cmod + (cmod + O) % two_o
    perm_np = np.zeros((nf, nf), np.float32)
    perm_np[col, partner] = 1.0
    gsum_np = ((col[:, None] % two_o) == (col[None, :] % two_o)).astype(np.float32)
    gsum_np /= float(M)
    perm = jnp.asarray(perm_np)
    gsum = jnp.asarray(gsum_np)

    tmf = _pick_row_tile(mf)
    # Kernel 2: fused conv + batch-stat ComplexBN + ReLU.
    # TODO(synk): ComplexBatchNorm2d eval-mode running-mean/cov path not implemented.
    out_folded = conv_bn_relu(y_folded, wp, bias_col, ga_col, gb_col, beta_col,
                              perm, gsum, tmf=tmf)           # (mf, nf) f32

    # Back to (B, O, F, T, 2).  (mf, nf) row-major == (T, B, F, 2O) row-major.
    out = out_folded.reshape(T, B, F_, two_o)
    out_r = jnp.transpose(out[..., :O], (1, 3, 2, 0))
    out_i = jnp.transpose(out[..., O:], (1, 3, 2, 0))
    return jnp.stack([out_r, out_i], axis=-1)


# ----------------------------------------------------------------------------
# Deterministic parameter init (shapes per the module's __init__)
# ----------------------------------------------------------------------------
def init_params(key, C, H, O):
    I = 2 * C      # GRU input size
    Hh = 2 * H     # GRU hidden size
    ks = jax.random.split(key, 8)
    s_gru = 1.0 / (Hh ** 0.5)
    s_conv = 1.0 / (H ** 0.5)

    def u(k, shape, s):
        return jax.random.uniform(k, shape, jnp.float32, -s, s)

    return {
        # nn.GRU(2C, 2H): per-gate blocks [r, z, n].
        "gru_wi": u(ks[0], (3, I, Hh), s_gru).astype(jnp.bfloat16),
        "gru_wh": u(ks[1], (3, Hh, Hh), s_gru).astype(jnp.bfloat16),
        "gru_bi": u(ks[2], (3, 1, Hh), s_gru),
        "gru_bh": u(ks[3], (3, 1, Hh), s_gru),
        # ComplexConv2d(H, O, k=1): real_conv / imag_conv weights + biases.
        "conv_wr": u(ks[4], (H, O), s_conv),
        "conv_wi": u(ks[5], (H, O), s_conv),
        "conv_br": u(ks[6], (1, O), s_conv),
        "conv_bi": u(ks[7], (1, O), s_conv),
        # ComplexBatchNorm2d affine init: gamma_rr=gamma_ii=1/sqrt(2), gamma_ri=0.
        "bn_gamma": jnp.stack([jnp.full((O,), 0.70710678, jnp.float32),
                               jnp.zeros((O,), jnp.float32),
                               jnp.full((O,), 0.70710678, jnp.float32)], axis=0),
        "bn_beta": jnp.zeros((2, O), jnp.float32),
    }


if __name__ == "__main__":
    B, C, F_, T = 2, 4, 16, 8
    H, O = 16, 8          # hidden_size, out_channels

    key = jax.random.PRNGKey(0)
    kx, kp = jax.random.split(key)
    x = jax.random.normal(kx, (B, C, F_, T, 2), jnp.float32)
    params = init_params(kp, C, H, O)

    out = jax.jit(tgru_block)(x, params)
    out = jax.block_until_ready(out)

    assert out.shape == (B, O, F_, T, 2), out.shape
    assert bool(jnp.all(jnp.isfinite(out)))
    print("KERNEL_OK")
</pallas_src>

<mosaic_0001>
module attributes {stable_mosaic.version = 11 : i64} {
  func.func @_gru_kernel(%arg0: i32, %arg1: i32, %arg2: memref<8x16x8xbf16, #tpu.memory_space<vmem>>, %arg3: memref<3x8x32xbf16, #tpu.memory_space<vmem>>, %arg4: memref<3x32x32xbf16, #tpu.memory_space<vmem>>, %arg5: memref<3x1x32xf32, #tpu.memory_space<vmem>>, %arg6: memref<3x1x32xf32, #tpu.memory_space<vmem>>, %arg7: memref<8x16x32xbf16, #tpu.memory_space<vmem>>, %arg8: memref<16x32xf32, #tpu.memory_space<vmem>>, %arg9: memref<128x32xf32, #tpu.memory_space<vmem>>, %arg10: memref<128x32xf32, #tpu.memory_space<vmem>>, %arg11: memref<128x32xf32, #tpu.memory_space<vmem>>) attributes {dimension_semantics = [#tpu.dimension_semantics<parallel>, #tpu.dimension_semantics<arbitrary>], iteration_bounds = array<i64: 2, 1>, scalar_prefetch = 0 : i64, scratch_operands = 4 : i64, tpu.core_type = #tpu.core_type<tc>, window_params = [{transform_indices = @transform_0, window_bounds = array<i64: 8, 16, 8>}, {pipeline_mode = #tpu.pipeline_mode<synchronous>, transform_indices = @transform_1, window_bounds = array<i64: 3, 8, 32>}, {pipeline_mode = #tpu.pipeline_mode<synchronous>, transform_indices = @transform_2, window_bounds = array<i64: 3, 32, 32>}, {pipeline_mode = #tpu.pipeline_mode<synchronous>, transform_indices = @transform_3, window_bounds = array<i64: 3, 1, 32>}, {pipeline_mode = #tpu.pipeline_mode<synchronous>, transform_indices = @transform_4, window_bounds = array<i64: 3, 1, 32>}, {transform_indices = @transform_5, window_bounds = array<i64: 8, 16, 32>}]} {
    %c0_i32 = arith.constant 0 : i32
    %0 = arith.cmpi eq, %arg1, %c0_i32 : i32
    %1 = arith.extui %0 : i1 to i32
    %c0_i32_0 = arith.constant 0 : i32
    %2 = arith.cmpi ne, %1, %c0_i32_0 : i32
    scf.if %2 {
      %cst_145 = arith.constant 0.000000e+00 : f32
      %387 = vector.broadcast %cst_145 : f32 to vector<16x32xf32>
      %c0_146 = arith.constant 0 : index
      %c0_147 = arith.constant 0 : index
      %388 = vector.load %arg8[%c0_146, %c0_147] : memref<16x32xf32, #tpu.memory_space<vmem>>, vector<16x32xf32>
      tpu.vector_store %arg8[%c0_146, %c0_147], %387 {strides = array<i32>} : memref<16x32xf32, #tpu.memory_space<vmem>>, vector<16x32xf32>,
    } else {
    }
    %c0 = arith.constant 0 : index
    %c0_1 = arith.constant 0 : index
    %c0_2 = arith.constant 0 : index
    %3 = vector.load %arg2[%c0, %c0_1, %c0_2] : memref<8x16x8xbf16, #tpu.memory_space<vmem>>, vector<8x16x8xbf16>
    %4 = vector.shape_cast %3 : vector<8x16x8xbf16> to vector<128x8xbf16>
    %c0_3 = arith.constant 0 : index
    %c0_4 = arith.constant 0 : index
    %c0_5 = arith.constant 0 : index
    %5 = vector.load %arg3[%c0_3, %c0_4, %c0_5] : memref<3x8x32xbf16, #tpu.memory_space<vmem>>, vector<1x8x32xbf16>
    %6 = vector.shape_cast %5 : vector<1x8x32xbf16> to vector<8x32xbf16>
    %cst = arith.constant dense<0.000000e+00> : vector<128x32xf32>
    %7 = tpu.matmul %4, %6, %cst {dimension_numbers = #tpu.dot_dimension_numbers<[1], [0], [0], [1], [0, 0, 1, 1], [], []>} : vector<128x8xbf16>, vector<8x32xbf16>, vector<128x32xf32> -> vector<128x32xf32>
    %c0_6 = arith.constant 0 : index
    %c0_7 = arith.constant 0 : index
    %c0_8 = arith.constant 0 : index
    %8 = vector.load %arg5[%c0_6, %c0_7, %c0_8] : memref<3x1x32xf32, #tpu.memory_space<vmem>>, vector<1x1x32xf32>
    %9 = vector.shape_cast %8 : vector<1x1x32xf32> to vector<1x32xf32>
    %10 = vector.broadcast %9 : vector<1x32xf32> to vector<128x32xf32>
    %11 = arith.addf %7, %10 : vector<128x32xf32>
    %c0_9 = arith.constant 0 : index
    %c0_10 = arith.constant 0 : index
    %12 = vector.load %arg9[%c0_9, %c0_10] : memref<128x32xf32, #tpu.memory_space<vmem>>, vector<128x32xf32>
    tpu.vector_store %arg9[%c0_9, %c0_10], %11 {strides = array<i32>} : memref<128x32xf32, #tpu.memory_space<vmem>>, vector<128x32xf32>,
    %c1 = arith.constant 1 : index
    %c0_11 = arith.constant 0 : index
    %c0_12 = arith.constant 0 : index
    %13 = vector.load %arg3[%c1, %c0_11, %c0_12] : memref<3x8x32xbf16, #tpu.memory_space<vmem>>, vector<1x8x32xbf16>
    %14 = vector.shape_cast %13 : vector<1x8x32xbf16> to vector<8x32xbf16>
    %cst_13 = arith.constant dense<0.000000e+00> : vector<128x32xf32>
    %15 = tpu.matmul %4, %14, %cst_13 {dimension_numbers = #tpu.dot_dimension_numbers<[1], [0], [0], [1], [0, 0, 1, 1], [], []>} : vector<128x8xbf16>, vector<8x32xbf16>, vector<128x32xf32> -> vector<128x32xf32>
    %c1_14 = arith.constant 1 : index
    %c0_15 = arith.constant 0 : index
    %c0_16 = arith.constant 0 : index
    %16 = vector.load %arg5[%c1_14, %c0_15, %c0_16] : memref<3x1x32xf32, #tpu.memory_space<vmem>>, vector<1x1x32xf32>
    %17 = vector.shape_cast %16 : vector<1x1x32xf32> to vector<1x32xf32>
    %18 = vector.broadcast %17 : vector<1x32xf32> to vector<128x32xf32>
    %19 = arith.addf %15, %18 : vector<128x32xf32>
    %c0_17 = arith.constant 0 : index
    %c0_18 = arith.constant 0 : index
    %20 = vector.load %arg10[%c0_17, %c0_18] : memref<128x32xf32, #tpu.memory_space<vmem>>, vector<128x32xf32>
    tpu.vector_store %arg10[%c0_17, %c0_18], %19 {strides = array<i32>} : memref<128x32xf32, #tpu.memory_space<vmem>>, vector<128x32xf32>,
    %c2 = arith.constant 2 : index
    %c0_19 = arith.constant 0 : index
    %c0_20 = arith.constant 0 : index
    %21 = vector.load %arg3[%c2, %c0_19, %c0_20] : memref<3x8x32xbf16, #tpu.memory_space<vmem>>, vector<1x8x32xbf16>
    %22 = vector.shape_cast %21 : vector<1x8x32xbf16> to vector<8x32xbf16>
    %cst_21 = arith.constant dense<0.000000e+00> : vector<128x32xf32>
    %23 = tpu.matmul %4, %22, %cst_21 {dimension_numbers = #tpu.dot_dimension_numbers<[1], [0], [0], [1], [0, 0, 1, 1], [], []>} : vector<128x8xbf16>, vector<8x32xbf16>, vector<128x32xf32> -> vector<128x32xf32>
    %c2_22 = arith.constant 2 : index
    %c0_23 = arith.constant 0 : index
    %c0_24 = arith.constant 0 : index
    %24 = vector.load %arg5[%c2_22, %c0_23, %c0_24] : memref<3x1x32xf32, #tpu.memory_space<vmem>>, vector<1x1x32xf32>
    %25 = vector.shape_cast %24 : vector<1x1x32xf32> to vector<1x32xf32>
    %26 = vector.broadcast %25 : vector<1x32xf32> to vector<128x32xf32>
    %27 = arith.addf %23, %26 : vector<128x32xf32>
    %c0_25 = arith.constant 0 : index
    %c0_26 = arith.constant 0 : index
    %28 = vector.load %arg11[%c0_25, %c0_26] : memref<128x32xf32, #tpu.memory_space<vmem>>, vector<128x32xf32>
    tpu.vector_store %arg11[%c0_25, %c0_26], %27 {strides = array<i32>} : memref<128x32xf32, #tpu.memory_space<vmem>>, vector<128x32xf32>,
    %c0_27 = arith.constant 0 : index
    %c0_28 = arith.constant 0 : index
    %c0_29 = arith.constant 0 : index
    %29 = vector.load %arg4[%c0_27, %c0_28, %c0_29] : memref<3x32x32xbf16, #tpu.memory_space<vmem>>, vector<1x32x32xbf16>
    %30 = vector.shape_cast %29 : vector<1x32x32xbf16> to vector<32x32xbf16>
    %c1_30 = arith.constant 1 : index
    %c0_31 = arith.constant 0 : index
    %c0_32 = arith.constant 0 : index
    %31 = vector.load %arg4[%c1_30, %c0_31, %c0_32] : memref<3x32x32xbf16, #tpu.memory_space<vmem>>, vector<1x32x32xbf16>
    %32 = vector.shape_cast %31 : vector<1x32x32xbf16> to vector<32x32xbf16>
    %c2_33 = arith.constant 2 : index
    %c0_34 = arith.constant 0 : index
    %c0_35 = arith.constant 0 : index
    %33 = vector.load %arg4[%c2_33, %c0_34, %c0_35] : memref<3x32x32xbf16, #tpu.memory_space<vmem>>, vector<1x32x32xbf16>
    %34 = vector.shape_cast %33 : vector<1x32x32xbf16> to vector<32x32xbf16>
    %c0_36 = arith.constant 0 : index
    %c0_37 = arith.constant 0 : index
    %c0_38 = arith.constant 0 : index
    %35 = vector.load %arg6[%c0_36, %c0_37, %c0_38] : memref<3x1x32xf32, #tpu.memory_space<vmem>>, vector<1x1x32xf32>
    %36 = vector.shape_cast %35 : vector<1x1x32xf32> to vector<1x32xf32>
    %c1_39 = arith.constant 1 : index
    %c0_40 = arith.constant 0 : index
    %c0_41 = arith.constant 0 : index
    %37 = vector.load %arg6[%c1_39, %c0_40, %c0_41] : memref<3x1x32xf32, #tpu.memory_space<vmem>>, vector<1x1x32xf32>
    %38 = vector.shape_cast %37 : vector<1x1x32xf32> to vector<1x32xf32>
    %c2_42 = arith.constant 2 : index
    %c0_43 = arith.constant 0 : index
    %c0_44 = arith.constant 0 : index
    %39 = vector.load %arg6[%c2_42, %c0_43, %c0_44] : memref<3x1x32xf32, #tpu.memory_space<vmem>>, vector<1x1x32xf32>
    %40 = vector.shape_cast %39 : vector<1x1x32xf32> to vector<1x32xf32>
    %c0_45 = arith.constant 0 : index
    %c0_46 = arith.constant 0 : index
    %41 = vector.load %arg8[%c0_45, %c0_46] : memref<16x32xf32, #tpu.memory_space<vmem>>, vector<16x32xf32>
    %c0_i32_47 = arith.constant 0 : i32
    %42 = arith.truncf %41 : vector<16x32xf32> to vector<16x32xbf16>
    %cst_48 = arith.constant dense<0.000000e+00> : vector<16x32xf32>
    %43 = tpu.matmul %42, %30, %cst_48 {dimension_numbers = #tpu.dot_dimension_numbers<[1], [0], [0], [1], [0, 0, 1, 1], [], []>} : vector<16x32xbf16>, vector<32x32xbf16>, vector<16x32xf32> -> vector<16x32xf32>
    %44 = vector.broadcast %36 : vector<1x32xf32> to vector<16x32xf32>
    %45 = arith.addf %43, %44 : vector<16x32xf32>
    %cst_49 = arith.constant dense<0.000000e+00> : vector<16x32xf32>
    %46 = tpu.matmul %42, %32, %cst_49 {dimension_numbers = #tpu.dot_dimension_numbers<[1], [0], [0], [1], [0, 0, 1, 1], [], []>} : vector<16x32xbf16>, vector<32x32xbf16>, vector<16x32xf32> -> vector<16x32xf32>
    %47 = vector.broadcast %38 : vector<1x32xf32> to vector<16x32xf32>
    %48 = arith.addf %46, %47 : vector<16x32xf32>
    %cst_50 = arith.constant dense<0.000000e+00> : vector<16x32xf32>
    %49 = tpu.matmul %42, %34, %cst_50 {dimension_numbers = #tpu.dot_dimension_numbers<[1], [0], [0], [1], [0, 0, 1, 1], [], []>} : vector<16x32xbf16>, vector<32x32xbf16>, vector<16x32xf32> -> vector<16x32xf32>
    %50 = vector.broadcast %40 : vector<1x32xf32> to vector<16x32xf32>
    %51 = arith.addf %49, %50 : vector<16x32xf32>
    %c16_i32 = arith.constant 16 : i32
    %52 = arith.muli %c0_i32_47, %c16_i32 : i32
    %53 = tpu.assume_multiple %52, 16 : i32
    %54 = arith.index_cast %53 : i32 to index
    %c0_51 = arith.constant 0 : index
    %55 = vector.load %arg9[%54, %c0_51] : memref<128x32xf32, #tpu.memory_space<vmem>>, vector<16x32xf32>
    %56 = arith.index_cast %53 : i32 to index
    %c0_52 = arith.constant 0 : index
    %57 = vector.load %arg10[%56, %c0_52] : memref<128x32xf32, #tpu.memory_space<vmem>>, vector<16x32xf32>
    %58 = arith.index_cast %53 : i32 to index
    %c0_53 = arith.constant 0 : index
    %59 = vector.load %arg11[%58, %c0_53] : memref<128x32xf32, #tpu.memory_space<vmem>>, vector<16x32xf32>
    %60 = arith.addf %55, %45 : vector<16x32xf32>
    %61 = arith.negf %60 : vector<16x32xf32>
    %62 = math.exp %61 : vector<16x32xf32>
    %cst_54 = arith.constant 1.000000e+00 : f32
    %63 = vector.broadcast %cst_54 : f32 to vector<16x32xf32>
    %64 = arith.addf %63, %62 : vector<16x32xf32>
    %65 = arith.divf %63, %64 : vector<16x32xf32>
    %66 = arith.addf %57, %48 : vector<16x32xf32>
    %67 = arith.negf %66 : vector<16x32xf32>
    %68 = math.exp %67 : vector<16x32xf32>
    %cst_55 = arith.constant 1.000000e+00 : f32
    %69 = vector.broadcast %cst_55 : f32 to vector<16x32xf32>
    %70 = arith.addf %69, %68 : vector<16x32xf32>
    %71 = arith.divf %69, %70 : vector<16x32xf32>
    %72 = arith.mulf %65, %51 : vector<16x32xf32>
    %73 = arith.addf %59, %72 : vector<16x32xf32>
    %74 = math.tanh %73 : vector<16x32xf32>
    %cst_56 = arith.constant 1.000000e+00 : f32
    %75 = vector.broadcast %cst_56 : f32 to vector<16x32xf32>
    %76 = arith.subf %75, %71 : vector<16x32xf32>
    %77 = arith.mulf %76, %74 : vector<16x32xf32>
    %78 = arith.mulf %71, %41 : vector<16x32xf32>
    %79 = arith.addf %77, %78 : vector<16x32xf32>
    %80 = arith.truncf %79 : vector<16x32xf32> to vector<16x32xbf16>
    %81 = arith.index_cast %c0_i32_47 : i32 to index
    %c0_57 = arith.constant 0 : index
    %c0_58 = arith.constant 0 : index
    %82 = vector.load %arg7[%81, %c0_57, %c0_58] : memref<8x16x32xbf16, #tpu.memory_space<vmem>>, vector<1x16x32xbf16>
    %83 = vector.shape_cast %82 : vector<1x16x32xbf16> to vector<16x32xbf16>
    %84 = vector.shape_cast %80 : vector<16x32xbf16> to vector<1x16x32xbf16>
    tpu.vector_store %arg7[%81, %c0_57, %c0_58], %84 {strides = array<i32>} : memref<8x16x32xbf16, #tpu.memory_space<vmem>>, vector<1x16x32xbf16>,
    %c1_i32 = arith.constant 1 : i32
    %85 = arith.truncf %79 : vector<16x32xf32> to vector<16x32xbf16>
    %cst_59 = arith.constant dense<0.000000e+00> : vector<16x32xf32>
    %86 = tpu.matmul %85, %30, %cst_59 {dimension_numbers = #tpu.dot_dimension_numbers<[1], [0], [0], [1], [0, 0, 1, 1], [], []>} : vector<16x32xbf16>, vector<32x32xbf16>, vector<16x32xf32> -> vector<16x32xf32>
    %87 = vector.broadcast %36 : vector<1x32xf32> to vector<16x32xf32>
    %88 = arith.addf %86, %87 : vector<16x32xf32>
    %cst_60 = arith.constant dense<0.000000e+00> : vector<16x32xf32>
    %89 = tpu.matmul %85, %32, %cst_60 {dimension_numbers = #tpu.dot_dimension_numbers<[1], [0], [0], [1], [0, 0, 1, 1], [], []>} : vector<16x32xbf16>, vector<32x32xbf16>, vector<16x32xf32> -> vector<16x32xf32>
    %90 = vector.broadcast %38 : vector<1x32xf32> to vector<16x32xf32>
    %91 = arith.addf %89, %90 : vector<16x32xf32>
    %cst_61 = arith.constant dense<0.000000e+00> : vector<16x32xf32>
    %92 = tpu.matmul %85, %34, %cst_61 {dimension_numbers = #tpu.dot_dimension_numbers<[1], [0], [0], [1], [0, 0, 1, 1], [], []>} : vector<16x32xbf16>, vector<32x32xbf16>, vector<16x32xf32> -> vector<16x32xf32>
    %93 = vector.broadcast %40 : vector<1x32xf32> to vector<16x32xf32>
    %94 = arith.addf %92, %93 : vector<16x32xf32>
    %c16_i32_62 = arith.constant 16 : i32
    %95 = arith.muli %c1_i32, %c16_i32_62 : i32
    %96 = tpu.assume_multiple %95, 16 : i32
    %97 = arith.index_cast %96 : i32 to index
    %c0_63 = arith.constant 0 : index
    %98 = vector.load %arg9[%97, %c0_63] : memref<128x32xf32, #tpu.memory_space<vmem>>, vector<16x32xf32>
    %99 = arith.index_cast %96 : i32 to index
    %c0_64 = arith.constant 0 : index
    %100 = vector.load %arg10[%99, %c0_64] : memref<128x32xf32, #tpu.memory_space<vmem>>, vector<16x32xf32>
    %101 = arith.index_cast %96 : i32 to index
    %c0_65 = arith.constant 0 : index
    %102 = vector.load %arg11[%101, %c0_65] : memref<128x32xf32, #tpu.memory_space<vmem>>, vector<16x32xf32>
    %103 = arith.addf %98, %88 : vector<16x32xf32>
    %104 = arith.negf %103 : vector<16x32xf32>
    %105 = math.exp %104 : vector<16x32xf32>
    %cst_66 = arith.constant 1.000000e+00 : f32
    %106 = vector.broadcast %cst_66 : f32 to vector<16x32xf32>
    %107 = arith.addf %106, %105 : vector<16x32xf32>
    %108 = arith.divf %106, %107 : vector<16x32xf32>
    %109 = arith.addf %100, %91 : vector<16x32xf32>
    %110 = arith.negf %109 : vector<16x32xf32>
    %111 = math.exp %110 : vector<16x32xf32>
    %cst_67 = arith.constant 1.000000e+00 : f32
    %112 = vector.broadcast %cst_67 : f32 to vector<16x32xf32>
    %113 = arith.addf %112, %111 : vector<16x32xf32>
    %114 = arith.divf %112, %113 : vector<16x32xf32>
    %115 = arith.mulf %108, %94 : vector<16x32xf32>
    %116 = arith.addf %102, %115 : vector<16x32xf32>
    %117 = math.tanh %116 : vector<16x32xf32>
    %cst_68 = arith.constant 1.000000e+00 : f32
    %118 = vector.broadcast %cst_68 : f32 to vector<16x32xf32>
    %119 = arith.subf %118, %114 : vector<16x32xf32>
    %120 = arith.mulf %119, %117 : vector<16x32xf32>
    %121 = arith.mulf %114, %79 : vector<16x32xf32>
    %122 = arith.addf %120, %121 : vector<16x32xf32>
    %123 = arith.truncf %122 : vector<16x32xf32> to vector<16x32xbf16>
    %124 = arith.index_cast %c1_i32 : i32 to index
    %c0_69 = arith.constant 0 : index
    %c0_70 = arith.constant 0 : index
    %125 = vector.load %arg7[%124, %c0_69, %c0_70] : memref<8x16x32xbf16, #tpu.memory_space<vmem>>, vector<1x16x32xbf16>
    %126 = vector.shape_cast %125 : vector<1x16x32xbf16> to vector<16x32xbf16>
    %127 = vector.shape_cast %123 : vector<16x32xbf16> to vector<1x16x32xbf16>
    tpu.vector_store %arg7[%124, %c0_69, %c0_70], %127 {strides = array<i32>} : memref<8x16x32xbf16, #tpu.memory_space<vmem>>, vector<1x16x32xbf16>,
    %c2_i32 = arith.constant 2 : i32
    %128 = arith.truncf %122 : vector<16x32xf32> to vector<16x32xbf16>
    %cst_71 = arith.constant dense<0.000000e+00> : vector<16x32xf32>
    %129 = tpu.matmul %128, %30, %cst_71 {dimension_numbers = #tpu.dot_dimension_numbers<[1], [0], [0], [1], [0, 0, 1, 1], [], []>} : vector<16x32xbf16>, vector<32x32xbf16>, vector<16x32xf32> -> vector<16x32xf32>
    %130 = vector.broadcast %36 : vector<1x32xf32> to vector<16x32xf32>
    %131 = arith.addf %129, %130 : vector<16x32xf32>
    %cst_72 = arith.constant dense<0.000000e+00> : vector<16x32xf32>
    %132 = tpu.matmul %128, %32, %cst_72 {dimension_numbers = #tpu.dot_dimension_numbers<[1], [0], [0], [1], [0, 0, 1, 1], [], []>} : vector<16x32xbf16>, vector<32x32xbf16>, vector<16x32xf32> -> vector<16x32xf32>
    %133 = vector.broadcast %38 : vector<1x32xf32> to vector<16x32xf32>
    %134 = arith.addf %132, %133 : vector<16x32xf32>
    %cst_73 = arith.constant dense<0.000000e+00> : vector<16x32xf32>
    %135 = tpu.matmul %128, %34, %cst_73 {dimension_numbers = #tpu.dot_dimension_numbers<[1], [0], [0], [1], [0, 0, 1, 1], [], []>} : vector<16x32xbf16>, vector<32x32xbf16>, vector<16x32xf32> -> vector<16x32xf32>
    %136 = vector.broadcast %40 : vector<1x32xf32> to vector<16x32xf32>
    %137 = arith.addf %135, %136 : vector<16x32xf32>
    %c16_i32_74 = arith.constant 16 : i32
    %138 = arith.muli %c2_i32, %c16_i32_74 : i32
    %139 = tpu.assume_multiple %138, 16 : i32
    %140 = arith.index_cast %139 : i32 to index
    %c0_75 = arith.constant 0 : index
    %141 = vector.load %arg9[%140, %c0_75] : memref<128x32xf32, #tpu.memory_space<vmem>>, vector<16x32xf32>
    %142 = arith.index_cast %139 : i32 to index
    %c0_76 = arith.constant 0 : index
    %143 = vector.load %arg10[%142, %c0_76] : memref<128x32xf32, #tpu.memory_space<vmem>>, vector<16x32xf32>
    %144 = arith.index_cast %139 : i32 to index
    %c0_77 = arith.constant 0 : index
    %145 = vector.load %arg11[%144, %c0_77] : memref<128x32xf32, #tpu.memory_space<vmem>>, vector<16x32xf32>
    %146 = arith.addf %141, %131 : vector<16x32xf32>
    %147 = arith.negf %146 : vector<16x32xf32>
    %148 = math.exp %147 : vector<16x32xf32>
    %cst_78 = arith.constant 1.000000e+00 : f32
    %149 = vector.broadcast %cst_78 : f32 to vector<16x32xf32>
    %150 = arith.addf %149, %148 : vector<16x32xf32>
    %151 = arith.divf %149, %150 : vector<16x32xf32>
    %152 = arith.addf %143, %134 : vector<16x32xf32>
    %153 = arith.negf %152 : vector<16x32xf32>
    %154 = math.exp %153 : vector<16x32xf32>
    %cst_79 = arith.constant 1.000000e+00 : f32
    %155 = vector.broadcast %cst_79 : f32 to vector<16x32xf32>
    %156 = arith.addf %155, %154 : vector<16x32xf32>
    %157 = arith.divf %155, %156 : vector<16x32xf32>
    %158 = arith.mulf %151, %137 : vector<16x32xf32>
    %159 = arith.addf %145, %158 : vector<16x32xf32>
    %160 = math.tanh %159 : vector<16x32xf32>
    %cst_80 = arith.constant 1.000000e+00 : f32
    %161 = vector.broadcast %cst_80 : f32 to vector<16x32xf32>
    %162 = arith.subf %161, %157 : vector<16x32xf32>
    %163 = arith.mulf %162, %160 : vector<16x32xf32>
    %164 = arith.mulf %157, %122 : vector<16x32xf32>
    %165 = arith.addf %163, %164 : vector<16x32xf32>
    %166 = arith.truncf %165 : vector<16x32xf32> to vector<16x32xbf16>
    %167 = arith.index_cast %c2_i32 : i32 to index
    %c0_81 = arith.constant 0 : index
    %c0_82 = arith.constant 0 : index
    %168 = vector.load %arg7[%167, %c0_81, %c0_82] : memref<8x16x32xbf16, #tpu.memory_space<vmem>>, vector<1x16x32xbf16>
    %169 = vector.shape_cast %168 : vector<1x16x32xbf16> to vector<16x32xbf16>
    %170 = vector.shape_cast %166 : vector<16x32xbf16> to vector<1x16x32xbf16>
    tpu.vector_store %arg7[%167, %c0_81, %c0_82], %170 {strides = array<i32>} : memref<8x16x32xbf16, #tpu.memory_space<vmem>>, vector<1x16x32xbf16>,
    %c3_i32 = arith.constant 3 : i32
    %171 = arith.truncf %165 : vector<16x32xf32> to vector<16x32xbf16>
    %cst_83 = arith.constant dense<0.000000e+00> : vector<16x32xf32>
    %172 = tpu.matmul %171, %30, %cst_83 {dimension_numbers = #tpu.dot_dimension_numbers<[1], [0], [0], [1], [0, 0, 1, 1], [], []>} : vector<16x32xbf16>, vector<32x32xbf16>, vector<16x32xf32> -> vector<16x32xf32>
    %173 = vector.broadcast %36 : vector<1x32xf32> to vector<16x32xf32>
    %174 = arith.addf %172, %173 : vector<16x32xf32>
    %cst_84 = arith.constant dense<0.000000e+00> : vector<16x32xf32>
    %175 = tpu.matmul %171, %32, %cst_84 {dimension_numbers = #tpu.dot_dimension_numbers<[1], [0], [0], [1], [0, 0, 1, 1], [], []>} : vector<16x32xbf16>, vector<32x32xbf16>, vector<16x32xf32> -> vector<16x32xf32>
    %176 = vector.broadcast %38 : vector<1x32xf32> to vector<16x32xf32>
    %177 = arith.addf %175, %176 : vector<16x32xf32>
    %cst_85 = arith.constant dense<0.000000e+00> : vector<16x32xf32>
    %178 = tpu.matmul %171, %34, %cst_85 {dimension_numbers = #tpu.dot_dimension_numbers<[1], [0], [0], [1], [0, 0, 1, 1], [], []>} : vector<16x32xbf16>, vector<32x32xbf16>, vector<16x32xf32> -> vector<16x32xf32>
    %179 = vector.broadcast %40 : vector<1x32xf32> to vector<16x32xf32>
    %180 = arith.addf %178, %179 : vector<16x32xf32>
    %c16_i32_86 = arith.constant 16 : i32
    %181 = arith.muli %c3_i32, %c16_i32_86 : i32
    %182 = tpu.assume_multiple %181, 16 : i32
    %183 = arith.index_cast %182 : i32 to index
    %c0_87 = arith.constant 0 : index
    %184 = vector.load %arg9[%183, %c0_87] : memref<128x32xf32, #tpu.memory_space<vmem>>, vector<16x32xf32>
    %185 = arith.index_cast %182 : i32 to index
    %c0_88 = arith.constant 0 : index
    %186 = vector.load %arg10[%185, %c0_88] : memref<128x32xf32, #tpu.memory_space<vmem>>, vector<16x32xf32>
    %187 = arith.index_cast %182 : i32 to index
    %c0_89 = arith.constant 0 : index
    %188 = vector.load %arg11[%187, %c0_89] : memref<128x32xf32, #tpu.memory_space<vmem>>, vector<16x32xf32>
    %189 = arith.addf %184, %174 : vector<16x32xf32>
    %190 = arith.negf %189 : vector<16x32xf32>
    %191 = math.exp %190 : vector<16x32xf32>
    %cst_90 = arith.constant 1.000000e+00 : f32
    %192 = vector.broadcast %cst_90 : f32 to vector<16x32xf32>
    %193 = arith.addf %192, %191 : vector<16x32xf32>
    %194 = arith.divf %192, %193 : vector<16x32xf32>
    %195 = arith.addf %186, %177 : vector<16x32xf32>
    %196 = arith.negf %195 : vector<16x32xf32>
    %197 = math.exp %196 : vector<16x32xf32>
    %cst_91 = arith.constant 1.000000e+00 : f32
    %198 = vector.broadcast %cst_91 : f32 to vector<16x32xf32>
    %199 = arith.addf %198, %197 : vector<16x32xf32>
    %200 = arith.divf %198, %199 : vector<16x32xf32>
    %201 = arith.mulf %194, %180 : vector<16x32xf32>
    %202 = arith.addf %188, %201 : vector<16x32xf32>
    %203 = math.tanh %202 : vector<16x32xf32>
    %cst_92 = arith.constant 1.000000e+00 : f32
    %204 = vector.broadcast %cst_92 : f32 to vector<16x32xf32>
    %205 = arith.subf %204, %200 : vector<16x32xf32>
    %206 = arith.mulf %205, %203 : vector<16x32xf32>
    %207 = arith.mulf %200, %165 : vector<16x32xf32>
    %208 = arith.addf %206, %207 : vector<16x32xf32>
    %209 = arith.truncf %208 : vector<16x32xf32> to vector<16x32xbf16>
    %210 = arith.index_cast %c3_i32 : i32 to index
    %c0_93 = arith.constant 0 : index
    %c0_94 = arith.constant 0 : index
    %211 = vector.load %arg7[%210, %c0_93, %c0_94] : memref<8x16x32xbf16, #tpu.memory_space<vmem>>, vector<1x16x32xbf16>
    %212 = vector.shape_cast %211 : vector<1x16x32xbf16> to vector<16x32xbf16>
    %213 = vector.shape_cast %209 : vector<16x32xbf16> to vector<1x16x32xbf16>
    tpu.vector_store %arg7[%210, %c0_93, %c0_94], %213 {strides = array<i32>} : memref<8x16x32xbf16, #tpu.memory_space<vmem>>, vector<1x16x32xbf16>,
    %c4_i32 = arith.constant 4 : i32
    %214 = arith.truncf %208 : vector<16x32xf32> to vector<16x32xbf16>
    %cst_95 = arith.constant dense<0.000000e+00> : vector<16x32xf32>
    %215 = tpu.matmul %214, %30, %cst_95 {dimension_numbers = #tpu.dot_dimension_numbers<[1], [0], [0], [1], [0, 0, 1, 1], [], []>} : vector<16x32xbf16>, vector<32x32xbf16>, vector<16x32xf32> -> vector<16x32xf32>
    %216 = vector.broadcast %36 : vector<1x32xf32> to vector<16x32xf32>
    %217 = arith.addf %215, %216 : vector<16x32xf32>
    %cst_96 = arith.constant dense<0.000000e+00> : vector<16x32xf32>
    %218 = tpu.matmul %214, %32, %cst_96 {dimension_numbers = #tpu.dot_dimension_numbers<[1], [0], [0], [1], [0, 0, 1, 1], [], []>} : vector<16x32xbf16>, vector<32x32xbf16>, vector<16x32xf32> -> vector<16x32xf32>
    %219 = vector.broadcast %38 : vector<1x32xf32> to vector<16x32xf32>
    %220 = arith.addf %218, %219 : vector<16x32xf32>
    %cst_97 = arith.constant dense<0.000000e+00> : vector<16x32xf32>
    %221 = tpu.matmul %214, %34, %cst_97 {dimension_numbers = #tpu.dot_dimension_numbers<[1], [0], [0], [1], [0, 0, 1, 1], [], []>} : vector<16x32xbf16>, vector<32x32xbf16>, vector<16x32xf32> -> vector<16x32xf32>
    %222 = vector.broadcast %40 : vector<1x32xf32> to vector<16x32xf32>
    %223 = arith.addf %221, %222 : vector<16x32xf32>
    %c16_i32_98 = arith.constant 16 : i32
    %224 = arith.muli %c4_i32, %c16_i32_98 : i32
    %225 = tpu.assume_multiple %224, 16 : i32
    %226 = arith.index_cast %225 : i32 to index
    %c0_99 = arith.constant 0 : index
    %227 = vector.load %arg9[%226, %c0_99] : memref<128x32xf32, #tpu.memory_space<vmem>>, vector<16x32xf32>
    %228 = arith.index_cast %225 : i32 to index
    %c0_100 = arith.constant 0 : index
    %229 = vector.load %arg10[%228, %c0_100] : memref<128x32xf32, #tpu.memory_space<vmem>>, vector<16x32xf32>
    %230 = arith.index_cast %225 : i32 to index
    %c0_101 = arith.constant 0 : index
    %231 = vector.load %arg11[%230, %c0_101] : memref<128x32xf32, #tpu.memory_space<vmem>>, vector<16x32xf32>
    %232 = arith.addf %227, %217 : vector<16x32xf32>
    %233 = arith.negf %232 : vector<16x32xf32>
    %234 = math.exp %233 : vector<16x32xf32>
    %cst_102 = arith.constant 1.000000e+00 : f32
    %235 = vector.broadcast %cst_102 : f32 to vector<16x32xf32>
    %236 = arith.addf %235, %234 : vector<16x32xf32>
    %237 = arith.divf %235, %236 : vector<16x32xf32>
    %238 = arith.addf %229, %220 : vector<16x32xf32>
    %239 = arith.negf %238 : vector<16x32xf32>
    %240 = math.exp %239 : vector<16x32xf32>
    %cst_103 = arith.constant 1.000000e+00 : f32
    %241 = vector.broadcast %cst_103 : f32 to vector<16x32xf32>
    %242 = arith.addf %241, %240 : vector<16x32xf32>
    %243 = arith.divf %241, %242 : vector<16x32xf32>
    %244 = arith.mulf %237, %223 : vector<16x32xf32>
    %245 = arith.addf %231, %244 : vector<16x32xf32>
    %246 = math.tanh %245 : vector<16x32xf32>
    %cst_104 = arith.constant 1.000000e+00 : f32
    %247 = vector.broadcast %cst_104 : f32 to vector<16x32xf32>
    %248 = arith.subf %247, %243 : vector<16x32xf32>
    %249 = arith.mulf %248, %246 : vector<16x32xf32>
    %250 = arith.mulf %243, %208 : vector<16x32xf32>
    %251 = arith.addf %249, %250 : vector<16x32xf32>
    %252 = arith.truncf %251 : vector<16x32xf32> to vector<16x32xbf16>
    %253 = arith.index_cast %c4_i32 : i32 to index
    %c0_105 = arith.constant 0 : index
    %c0_106 = arith.constant 0 : index
    %254 = vector.load %arg7[%253, %c0_105, %c0_106] : memref<8x16x32xbf16, #tpu.memory_space<vmem>>, vector<1x16x32xbf16>
    %255 = vector.shape_cast %254 : vector<1x16x32xbf16> to vector<16x32xbf16>
    %256 = vector.shape_cast %252 : vector<16x32xbf16> to vector<1x16x32xbf16>
    tpu.vector_store %arg7[%253, %c0_105, %c0_106], %256 {strides = array<i32>} : memref<8x16x32xbf16, #tpu.memory_space<vmem>>, vector<1x16x32xbf16>,
    %c5_i32 = arith.constant 5 : i32
    %257 = arith.truncf %251 : vector<16x32xf32> to vector<16x32xbf16>
    %cst_107 = arith.constant dense<0.000000e+00> : vector<16x32xf32>
    %258 = tpu.matmul %257, %30, %cst_107 {dimension_numbers = #tpu.dot_dimension_numbers<[1], [0], [0], [1], [0, 0, 1, 1], [], []>} : vector<16x32xbf16>, vector<32x32xbf16>, vector<16x32xf32> -> vector<16x32xf32>
    %259 = vector.broadcast %36 : vector<1x32xf32> to vector<16x32xf32>
    %260 = arith.addf %258, %259 : vector<16x32xf32>
    %cst_108 = arith.constant dense<0.000000e+00> : vector<16x32xf32>
    %261 = tpu.matmul %257, %32, %cst_108 {dimension_numbers = #tpu.dot_dimension_numbers<[1], [0], [0], [1], [0, 0, 1, 1], [], []>} : vector<16x32xbf16>, vector<32x32xbf16>, vector<16x32xf32> -> vector<16x32xf32>
    %262 = vector.broadcast %38 : vector<1x32xf32> to vector<16x32xf32>
    %263 = arith.addf %261, %262 : vector<16x32xf32>
    %cst_109 = arith.constant dense<0.000000e+00> : vector<16x32xf32>
    %264 = tpu.matmul %257, %34, %cst_109 {dimension_numbers = #tpu.dot_dimension_numbers<[1], [0], [0], [1], [0, 0, 1, 1], [], []>} : vector<16x32xbf16>, vector<32x32xbf16>, vector<16x32xf32> -> vector<16x32xf32>
    %265 = vector.broadcast %40 : vector<1x32xf32> to vector<16x32xf32>
    %266 = arith.addf %264, %265 : vector<16x32xf32>
    %c16_i32_110 = arith.constant 16 : i32
    %267 = arith.muli %c5_i32, %c16_i32_110 : i32
    %268 = tpu.assume_multiple %267, 16 : i32
    %269 = arith.index_cast %268 : i32 to index
    %c0_111 = arith.constant 0 : index
    %270 = vector.load %arg9[%269, %c0_111] : memref<128x32xf32, #tpu.memory_space<vmem>>, vector<16x32xf32>
    %271 = arith.index_cast %268 : i32 to index
    %c0_112 = arith.constant 0 : index
    %272 = vector.load %arg10[%271, %c0_112] : memref<128x32xf32, #tpu.memory_space<vmem>>, vector<16x32xf32>
    %273 = arith.index_cast %268 : i32 to index
    %c0_113 = arith.constant 0 : index
    %274 = vector.load %arg11[%273, %c0_113] : memref<128x32xf32, #tpu.memory_space<vmem>>, vector<16x32xf32>
    %275 = arith.addf %270, %260 : vector<16x32xf32>
    %276 = arith.negf %275 : vector<16x32xf32>
    %277 = math.exp %276 : vector<16x32xf32>
    %cst_114 = arith.constant 1.000000e+00 : f32
    %278 = vector.broadcast %cst_114 : f32 to vector<16x32xf32>
    %279 = arith.addf %278, %277 : vector<16x32xf32>
    %280 = arith.divf %278, %279 : vector<16x32xf32>
    %281 = arith.addf %272, %263 : vector<16x32xf32>
    %282 = arith.negf %281 : vector<16x32xf32>
    %283 = math.exp %282 : vector<16x32xf32>
    %cst_115 = arith.constant 1.000000e+00 : f32
    %284 = vector.broadcast %cst_115 : f32 to vector<16x32xf32>
    %285 = arith.addf %284, %283 : vector<16x32xf32>
    %286 = arith.divf %284, %285 : vector<16x32xf32>
    %287 = arith.mulf %280, %266 : vector<16x32xf32>
    %288 = arith.addf %274, %287 : vector<16x32xf32>
    %289 = math.tanh %288 : vector<16x32xf32>
    %cst_116 = arith.constant 1.000000e+00 : f32
    %290 = vector.broadcast %cst_116 : f32 to vector<16x32xf32>
    %291 = arith.subf %290, %286 : vector<16x32xf32>
    %292 = arith.mulf %291, %289 : vector<16x32xf32>
    %293 = arith.mulf %286, %251 : vector<16x32xf32>
    %294 = arith.addf %292, %293 : vector<16x32xf32>
    %295 = arith.truncf %294 : vector<16x32xf32> to vector<16x32xbf16>
    %296 = arith.index_cast %c5_i32 : i32 to index
    %c0_117 = arith.constant 0 : index
    %c0_118 = arith.constant 0 : index
    %297 = vector.load %arg7[%296, %c0_117, %c0_118] : memref<8x16x32xbf16, #tpu.memory_space<vmem>>, vector<1x16x32xbf16>
    %298 = vector.shape_cast %297 : vector<1x16x32xbf16> to vector<16x32xbf16>
    %299 = vector.shape_cast %295 : vector<16x32xbf16> to vector<1x16x32xbf16>
    tpu.vector_store %arg7[%296, %c0_117, %c0_118], %299 {strides = array<i32>} : memref<8x16x32xbf16, #tpu.memory_space<vmem>>, vector<1x16x32xbf16>,
    %c6_i32 = arith.constant 6 : i32
    %300 = arith.truncf %294 : vector<16x32xf32> to vector<16x32xbf16>
    %cst_119 = arith.constant dense<0.000000e+00> : vector<16x32xf32>
    %301 = tpu.matmul %300, %30, %cst_119 {dimension_numbers = #tpu.dot_dimension_numbers<[1], [0], [0], [1], [0, 0, 1, 1], [], []>} : vector<16x32xbf16>, vector<32x32xbf16>, vector<16x32xf32> -> vector<16x32xf32>
    %302 = vector.broadcast %36 : vector<1x32xf32> to vector<16x32xf32>
    %303 = arith.addf %301, %302 : vector<16x32xf32>
    %cst_120 = arith.constant dense<0.000000e+00> : vector<16x32xf32>
    %304 = tpu.matmul %300, %32, %cst_120 {dimension_numbers = #tpu.dot_dimension_numbers<[1], [0], [0], [1], [0, 0, 1, 1], [], []>} : vector<16x32xbf16>, vector<32x32xbf16>, vector<16x32xf32> -> vector<16x32xf32>
    %305 = vector.broadcast %38 : vector<1x32xf32> to vector<16x32xf32>
    %306 = arith.addf %304, %305 : vector<16x32xf32>
    %cst_121 = arith.constant dense<0.000000e+00> : vector<16x32xf32>
    %307 = tpu.matmul %300, %34, %cst_121 {dimension_numbers = #tpu.dot_dimension_numbers<[1], [0], [0], [1], [0, 0, 1, 1], [], []>} : vector<16x32xbf16>, vector<32x32xbf16>, vector<16x32xf32> -> vector<16x32xf32>
    %308 = vector.broadcast %40 : vector<1x32xf32> to vector<16x32xf32>
    %309 = arith.addf %307, %308 : vector<16x32xf32>
    %c16_i32_122 = arith.constant 16 : i32
    %310 = arith.muli %c6_i32, %c16_i32_122 : i32
    %311 = tpu.assume_multiple %310, 16 : i32
    %312 = arith.index_cast %311 : i32 to index
    %c0_123 = arith.constant 0 : index
    %313 = vector.load %arg9[%312, %c0_123] : memref<128x32xf32, #tpu.memory_space<vmem>>, vector<16x32xf32>
    %314 = arith.index_cast %311 : i32 to index
    %c0_124 = arith.constant 0 : index
    %315 = vector.load %arg10[%314, %c0_124] : memref<128x32xf32, #tpu.memory_space<vmem>>, vector<16x32xf32>
    %316 = arith.index_cast %311 : i32 to index
    %c0_125 = arith.constant 0 : index
    %317 = vector.load %arg11[%316, %c0_125] : memref<128x32xf32, #tpu.memory_space<vmem>>, vector<16x32xf32>
    %318 = arith.addf %313, %303 : vector<16x32xf32>
    %319 = arith.negf %318 : vector<16x32xf32>
    %320 = math.exp %319 : vector<16x32xf32>
    %cst_126 = arith.constant 1.000000e+00 : f32
    %321 = vector.broadcast %cst_126 : f32 to vector<16x32xf32>
    %322 = arith.addf %321, %320 : vector<16x32xf32>
    %323 = arith.divf %321, %322 : vector<16x32xf32>
    %324 = arith.addf %315, %306 : vector<16x32xf32>
    %325 = arith.negf %324 : vector<16x32xf32>
    %326 = math.exp %325 : vector<16x32xf32>
    %cst_127 = arith.constant 1.000000e+00 : f32
    %327 = vector.broadcast %cst_127 : f32 to vector<16x32xf32>
    %328 = arith.addf %327, %326 : vector<16x32xf32>
    %329 = arith.divf %327, %328 : vector<16x32xf32>
    %330 = arith.mulf %323, %309 : vector<16x32xf32>
    %331 = arith.addf %317, %330 : vector<16x32xf32>
    %332 = math.tanh %331 : vector<16x32xf32>
    %cst_128 = arith.constant 1.000000e+00 : f32
    %333 = vector.broadcast %cst_128 : f32 to vector<16x32xf32>
    %334 = arith.subf %333, %329 : vector<16x32xf32>
    %335 = arith.mulf %334, %332 : vector<16x32xf32>
    %336 = arith.mulf %329, %294 : vector<16x32xf32>
    %337 = arith.addf %335, %336 : vector<16x32xf32>
    %338 = arith.truncf %337 : vector<16x32xf32> to vector<16x32xbf16>
    %339 = arith.index_cast %c6_i32 : i32 to index
    %c0_129 = arith.constant 0 : index
    %c0_130 = arith.constant 0 : index
    %340 = vector.load %arg7[%339, %c0_129, %c0_130] : memref<8x16x32xbf16, #tpu.memory_space<vmem>>, vector<1x16x32xbf16>
    %341 = vector.shape_cast %340 : vector<1x16x32xbf16> to vector<16x32xbf16>
    %342 = vector.shape_cast %338 : vector<16x32xbf16> to vector<1x16x32xbf16>
    tpu.vector_store %arg7[%339, %c0_129, %c0_130], %342 {strides = array<i32>} : memref<8x16x32xbf16, #tpu.memory_space<vmem>>, vector<1x16x32xbf16>,
    %c7_i32 = arith.constant 7 : i32
    %343 = arith.truncf %337 : vector<16x32xf32> to vector<16x32xbf16>
    %cst_131 = arith.constant dense<0.000000e+00> : vector<16x32xf32>
    %344 = tpu.matmul %343, %30, %cst_131 {dimension_numbers = #tpu.dot_dimension_numbers<[1], [0], [0], [1], [0, 0, 1, 1], [], []>} : vector<16x32xbf16>, vector<32x32xbf16>, vector<16x32xf32> -> vector<16x32xf32>
    %345 = vector.broadcast %36 : vector<1x32xf32> to vector<16x32xf32>
    %346 = arith.addf %344, %345 : vector<16x32xf32>
    %cst_132 = arith.constant dense<0.000000e+00> : vector<16x32xf32>
    %347 = tpu.matmul %343, %32, %cst_132 {dimension_numbers = #tpu.dot_dimension_numbers<[1], [0], [0], [1], [0, 0, 1, 1], [], []>} : vector<16x32xbf16>, vector<32x32xbf16>, vector<16x32xf32> -> vector<16x32xf32>
    %348 = vector.broadcast %38 : vector<1x32xf32> to vector<16x32xf32>
    %349 = arith.addf %347, %348 : vector<16x32xf32>
    %cst_133 = arith.constant dense<0.000000e+00> : vector<16x32xf32>
    %350 = tpu.matmul %343, %34, %cst_133 {dimension_numbers = #tpu.dot_dimension_numbers<[1], [0], [0], [1], [0, 0, 1, 1], [], []>} : vector<16x32xbf16>, vector<32x32xbf16>, vector<16x32xf32> -> vector<16x32xf32>
    %351 = vector.broadcast %40 : vector<1x32xf32> to vector<16x32xf32>
    %352 = arith.addf %350, %351 : vector<16x32xf32>
    %c16_i32_134 = arith.constant 16 : i32
    %353 = arith.muli %c7_i32, %c16_i32_134 : i32
    %354 = tpu.assume_multiple %353, 16 : i32
    %355 = arith.index_cast %354 : i32 to index
    %c0_135 = arith.constant 0 : index
    %356 = vector.load %arg9[%355, %c0_135] : memref<128x32xf32, #tpu.memory_space<vmem>>, vector<16x32xf32>
    %357 = arith.index_cast %354 : i32 to index
    %c0_136 = arith.constant 0 : index
    %358 = vector.load %arg10[%357, %c0_136] : memref<128x32xf32, #tpu.memory_space<vmem>>, vector<16x32xf32>
    %359 = arith.index_cast %354 : i32 to index
    %c0_137 = arith.constant 0 : index
    %360 = vector.load %arg11[%359, %c0_137] : memref<128x32xf32, #tpu.memory_space<vmem>>, vector<16x32xf32>
    %361 = arith.addf %356, %346 : vector<16x32xf32>
    %362 = arith.negf %361 : vector<16x32xf32>
    %363 = math.exp %362 : vector<16x32xf32>
    %cst_138 = arith.constant 1.000000e+00 : f32
    %364 = vector.broadcast %cst_138 : f32 to vector<16x32xf32>
    %365 = arith.addf %364, %363 : vector<16x32xf32>
    %366 = arith.divf %364, %365 : vector<16x32xf32>
    %367 = arith.addf %358, %349 : vector<16x32xf32>
    %368 = arith.negf %367 : vector<16x32xf32>
    %369 = math.exp %368 : vector<16x32xf32>
    %cst_139 = arith.constant 1.000000e+00 : f32
    %370 = vector.broadcast %cst_139 : f32 to vector<16x32xf32>
    %371 = arith.addf %370, %369 : vector<16x32xf32>
    %372 = arith.divf %370, %371 : vector<16x32xf32>
    %373 = arith.mulf %366, %352 : vector<16x32xf32>
    %374 = arith.addf %360, %373 : vector<16x32xf32>
    %375 = math.tanh %374 : vector<16x32xf32>
    %cst_140 = arith.constant 1.000000e+00 : f32
    %376 = vector.broadcast %cst_140 : f32 to vector<16x32xf32>
    %377 = arith.subf %376, %372 : vector<16x32xf32>
    %378 = arith.mulf %377, %375 : vector<16x32xf32>
    %379 = arith.mulf %372, %337 : vector<16x32xf32>
    %380 = arith.addf %378, %379 : vector<16x32xf32>
    %381 = arith.truncf %380 : vector<16x32xf32> to vector<16x32xbf16>
    %382 = arith.index_cast %c7_i32 : i32 to index
    %c0_141 = arith.constant 0 : index
    %c0_142 = arith.constant 0 : index
    %383 = vector.load %arg7[%382, %c0_141, %c0_142] : memref<8x16x32xbf16, #tpu.memory_space<vmem>>, vector<1x16x32xbf16>
    %384 = vector.shape_cast %383 : vector<1x16x32xbf16> to vector<16x32xbf16>
    %385 = vector.shape_cast %381 : vector<16x32xbf16> to vector<1x16x32xbf16>
    tpu.vector_store %arg7[%382, %c0_141, %c0_142], %385 {strides = array<i32>} : memref<8x16x32xbf16, #tpu.memory_space<vmem>>, vector<1x16x32xbf16>,
    %c8_i32 = arith.constant 8 : i32
    %c0_143 = arith.constant 0 : index
    %c0_144 = arith.constant 0 : index
    %386 = vector.load %arg8[%c0_143, %c0_144] : memref<16x32xf32, #tpu.memory_space<vmem>>, vector<16x32xf32>
    tpu.vector_store %arg8[%c0_143, %c0_144], %380 {strides = array<i32>} : memref<16x32xf32, #tpu.memory_space<vmem>>, vector<16x32xf32>,
    return
  }
  func.func @transform_0(%arg0: i32, %arg1: i32) -> (i32, i32, i32) {
    %c0_i32 = arith.constant 0 : i32
    %c0_i32_0 = arith.constant 0 : i32
    return %arg1, %arg0, %c0_i32 : i32, i32, i32
  }
  func.func @transform_1(%arg0: i32, %arg1: i32) -> (i32, i32, i32) {
    %c0_i32 = arith.constant 0 : i32
    %c0_i32_0 = arith.constant 0 : i32
    %c0_i32_1 = arith.constant 0 : i32
    %c0_i32_2 = arith.constant 0 : i32
    return %c0_i32, %c0_i32_0, %c0_i32_1 : i32, i32, i32
  }
  func.func @transform_2(%arg0: i32, %arg1: i32) -> (i32, i32, i32) {
    %c0_i32 = arith.constant 0 : i32
    %c0_i32_0 = arith.constant 0 : i32
    %c0_i32_1 = arith.constant 0 : i32
    %c0_i32_2 = arith.constant 0 : i32
    return %c0_i32, %c0_i32_0, %c0_i32_1 : i32, i32, i32
  }
  func.func @transform_3(%arg0: i32, %arg1: i32) -> (i32, i32, i32) {
    %c0_i32 = arith.constant 0 : i32
    %c0_i32_0 = arith.constant 0 : i32
    %c0_i32_1 = arith.constant 0 : i32
    %c0_i32_2 = arith.constant 0 : i32
    return %c0_i32, %c0_i32_0, %c0_i32_1 : i32, i32, i32
  }
  func.func @transform_4(%arg0: i32, %arg1: i32) -> (i32, i32, i32) {
    %c0_i32 = arith.constant 0 : i32
    %c0_i32_0 = arith.constant 0 : i32
    %c0_i32_1 = arith.constant 0 : i32
    %c0_i32_2 = arith.constant 0 : i32
    return %c0_i32, %c0_i32_0, %c0_i32_1 : i32, i32, i32
  }
  func.func @transform_5(%arg0: i32, %arg1: i32) -> (i32, i32, i32) {
    %c0_i32 = arith.constant 0 : i32
    %c0_i32_0 = arith.constant 0 : i32
    return %arg1, %arg0, %c0_i32 : i32, i32, i32
  }
}

module attributes {stable_mosaic.version = 11 : i64} {
  func.func @_conv_bn_relu_kernel(%arg0: i32, %arg1: i32, %arg2: memref<32x256xbf16, #tpu.memory_space<vmem>>, %arg3: memref<256x128xbf16, #tpu.memory_space<vmem>>, %arg4: memref<1x128xf32, #tpu.memory_space<vmem>>, %arg5: memref<1x128xf32, #tpu.memory_space<vmem>>, %arg6: memref<1x128xf32, #tpu.memory_space<vmem>>, %arg7: memref<1x128xf32, #tpu.memory_space<vmem>>, %arg8: memref<128x128xf32, #tpu.memory_space<vmem>>, %arg9: memref<128x128xf32, #tpu.memory_space<vmem>>, %arg10: memref<32x128xf32, #tpu.memory_space<vmem>>, %arg11: memref<1x128xf32, #tpu.memory_space<vmem>>, %arg12: memref<1x128xf32, #tpu.memory_space<vmem>>, %arg13: memref<1x128xf32, #tpu.memory_space<vmem>>) attributes {dimension_semantics = [#tpu.dimension_semantics<arbitrary>, #tpu.dimension_semantics<arbitrary>], iteration_bounds = array<i64: 2, 1>, scalar_prefetch = 0 : i64, scratch_operands = 3 : i64, tpu.core_type = #tpu.core_type<tc>, window_params = [{transform_indices = @transform_0, window_bounds = array<i64: 32, 256>}, {pipeline_mode = #tpu.pipeline_mode<synchronous>, transform_indices = @transform_1, window_bounds = array<i64: 256, 128>}, {pipeline_mode = #tpu.pipeline_mode<synchronous>, transform_indices = @transform_2, window_bounds = array<i64: 1, 128>}, {pipeline_mode = #tpu.pipeline_mode<synchronous>, transform_indices = @transform_3, window_bounds = array<i64: 1, 128>}, {pipeline_mode = #tpu.pipeline_mode<synchronous>, transform_indices = @transform_4, window_bounds = array<i64: 1, 128>}, {pipeline_mode = #tpu.pipeline_mode<synchronous>, transform_indices = @transform_5, window_bounds = array<i64: 1, 128>}, {pipeline_mode = #tpu.pipeline_mode<synchronous>, transform_indices = @transform_6, window_bounds = array<i64: 128, 128>}, {pipeline_mode = #tpu.pipeline_mode<synchronous>, transform_indices = @transform_7, window_bounds = array<i64: 128, 128>}, {transform_indices = @transform_8, window_bounds = array<i64: 32, 128>}]} {
    %c0_i32 = arith.constant 0 : i32
    %0 = arith.cmpi eq, %arg0, %c0_i32 : i32
    %c0_i32_0 = arith.constant 0 : i32
    %1 = arith.cmpi eq, %arg1, %c0_i32_0 : i32
    %2 = arith.andi %0, %1 : i1
    %3 = arith.extui %2 : i1 to i32
    %c0_i32_1 = arith.constant 0 : i32
    %4 = arith.cmpi ne, %3, %c0_i32_1 : i32
    scf.if %4 {
      %cst_12 = arith.constant 0.000000e+00 : f32
      %18 = vector.broadcast %cst_12 : f32 to vector<1x128xf32>
      %c0_13 = arith.constant 0 : index
      %c0_14 = arith.constant 0 : index
      %19 = vector.load %arg11[%c0_13, %c0_14] : memref<1x128xf32, #tpu.memory_space<vmem>>, vector<1x128xf32>
      tpu.vector_store %arg11[%c0_13, %c0_14], %18 {strides = array<i32>} : memref<1x128xf32, #tpu.memory_space<vmem>>, vector<1x128xf32>,
      %cst_15 = arith.constant 0.000000e+00 : f32
      %20 = vector.broadcast %cst_15 : f32 to vector<1x128xf32>
      %c0_16 = arith.constant 0 : index
      %c0_17 = arith.constant 0 : index
      %21 = vector.load %arg12[%c0_16, %c0_17] : memref<1x128xf32, #tpu.memory_space<vmem>>, vector<1x128xf32>
      tpu.vector_store %arg12[%c0_16, %c0_17], %20 {strides = array<i32>} : memref<1x128xf32, #tpu.memory_space<vmem>>, vector<1x128xf32>,
      %cst_18 = arith.constant 0.000000e+00 : f32
      %22 = vector.broadcast %cst_18 : f32 to vector<1x128xf32>
      %c0_19 = arith.constant 0 : index
      %c0_20 = arith.constant 0 : index
      %23 = vector.load %arg13[%c0_19, %c0_20] : memref<1x128xf32, #tpu.memory_space<vmem>>, vector<1x128xf32>
      tpu.vector_store %arg13[%c0_19, %c0_20], %22 {strides = array<i32>} : memref<1x128xf32, #tpu.memory_space<vmem>>, vector<1x128xf32>,
    } else {
    }
    %c0 = arith.constant 0 : index
    %c0_2 = arith.constant 0 : index
    %5 = vector.load %arg2[%c0, %c0_2] : memref<32x256xbf16, #tpu.memory_space<vmem>>, vector<32x256xbf16>
    %c0_3 = arith.constant 0 : index
    %c0_4 = arith.constant 0 : index
    %6 = vector.load %arg3[%c0_3, %c0_4] : memref<256x128xbf16, #tpu.memory_space<vmem>>, vector<256x128xbf16>
    %cst = arith.constant dense<0.000000e+00> : vector<32x128xf32>
    %7 = tpu.matmul %5, %6, %cst {dimension_numbers = #tpu.dot_dimension_numbers<[1], [0], [0], [1], [0, 0, 1, 1], [], []>} : vector<32x256xbf16>, vector<256x128xbf16>, vector<32x128xf32> -> vector<32x128xf32>
    %c0_5 = arith.constant 0 : index
    %c0_6 = arith.constant 0 : index
    %8 = vector.load %arg4[%c0_5, %c0_6] : memref<1x128xf32, #tpu.memory_space<vmem>>, vector<1x128xf32>
    %9 = vector.broadcast %8 : vector<1x128xf32> to vector<32x128xf32>
    %10 = arith.addf %7, %9 : vector<32x128xf32>
    %c0_7 = arith.constant 0 : index
    %c0_8 = arith.constant 0 : index
    %11 = vector.load %arg8[%c0_7, %c0_8] : memref<128x128xf32, #tpu.memory_space<vmem>>, vector<128x128xf32>
    %c0_i32_9 = arith.constant 0 : i32
    %12 = arith.cmpi eq, %arg0, %c0_i32_9 : i32
    %13 = arith.extui %12 : i1 to i32
    %c0_i32_10 = arith.constant 0 : i32
    %14 = arith.cmpi ne, %13, %c0_i32_10 : i32
    scf.if %14 {
      %c32_i32 = arith.constant 32 : i32
      %18 = arith.muli %arg1, %c32_i32 : i32
      %19 = tpu.iota {dimensions = array<i32: 0>} : vector<32x1xi32>
      %20 = vector.broadcast %18 : i32 to vector<32x1xi32>
      %21 = arith.addi %20, %19 : vector<32x1xi32>
      %c32_i32_12 = arith.constant 32 : i32
      %22 = vector.broadcast %c32_i32_12 : i32 to vector<32x1xi32>
      %23 = arith.cmpi slt, %21, %22 : vector<32x1xi32>
      %cst_13 = arith.constant 0.000000e+00 : f32
      %24 = vector.shape_cast %23 : vector<32x1xi1> to vector<32x1xi1>
      %25 = vector.broadcast %24 : vector<32x1xi1> to vector<32x128xi1>
      %26 = vector.broadcast %cst_13 : f32 to vector<32x128xf32>
      %27 = arith.select %25, %10, %26 : vector<32x128xi1>, vector<32x128xf32>
      %cst_14 = arith.constant dense<0.000000e+00> : vector<32x128xf32>
      %28 = tpu.matmul %27, %11, %cst_14 {dimension_numbers = #tpu.dot_dimension_numbers<[1], [0], [0], [1], [0, 0, 1, 1], [], []>} : vector<32x128xf32>, vector<128x128xf32>, vector<32x128xf32> -> vector<32x128xf32>
      %c0_15 = arith.constant 0 : index
      %c0_16 = arith.constant 0 : index
      %29 = vector.load %arg11[%c0_15, %c0_16] : memref<1x128xf32, #tpu.memory_space<vmem>>, vector<1x128xf32>
      %cst_17 = arith.constant dense<0.000000e+00> : vector<128xf32>
      %30 = vector.multi_reduction <add>, %27, %cst_17 [0] : vector<32x128xf32> to vector<128xf32>
      %31 = vector.shape_cast %30 : vector<128xf32> to vector<1x128xf32>
      %32 = arith.addf %29, %31 : vector<1x128xf32>
      %c0_18 = arith.constant 0 : index
      %c0_19 = arith.constant 0 : index
      %33 = vector.load %arg11[%c0_18, %c0_19] : memref<1x128xf32, #tpu.memory_space<vmem>>, vector<1x128xf32>
      tpu.vector_store %arg11[%c0_18, %c0_19], %32 {strides = array<i32>} : memref<1x128xf32, #tpu.memory_space<vmem>>, vector<1x128xf32>,
      %c0_20 = arith.constant 0 : index
      %c0_21 = arith.constant 0 : index
      %34 = vector.load %arg12[%c0_20, %c0_21] : memref<1x128xf32, #tpu.memory_space<vmem>>, vector<1x128xf32>
      %35 = arith.mulf %27, %27 : vector<32x128xf32>
      %cst_22 = arith.constant dense<0.000000e+00> : vector<128xf32>
      %36 = vector.multi_reduction <add>, %35, %cst_22 [0] : vector<32x128xf32> to vector<128xf32>
      %37 = vector.shape_cast %36 : vector<128xf32> to vector<1x128xf32>
      %38 = arith.addf %34, %37 : vector<1x128xf32>
      %c0_23 = arith.constant 0 : index
      %c0_24 = arith.constant 0 : index
      %39 = vector.load %arg12[%c0_23, %c0_24] : memref<1x128xf32, #tpu.memory_space<vmem>>, vector<1x128xf32>
      tpu.vector_store %arg12[%c0_23, %c0_24], %38 {strides = array<i32>} : memref<1x128xf32, #tpu.memory_space<vmem>>, vector<1x128xf32>,
      %c0_25 = arith.constant 0 : index
      %c0_26 = arith.constant 0 : index
      %40 = vector.load %arg13[%c0_25, %c0_26] : memref<1x128xf32, #tpu.memory_space<vmem>>, vector<1x128xf32>
      %41 = arith.mulf %27, %28 : vector<32x128xf32>
      %cst_27 = arith.constant dense<0.000000e+00> : vector<128xf32>
      %42 = vector.multi_reduction <add>, %41, %cst_27 [0] : vector<32x128xf32> to vector<128xf32>
      %43 = vector.shape_cast %42 : vector<128xf32> to vector<1x128xf32>
      %44 = arith.addf %40, %43 : vector<1x128xf32>
      %c0_28 = arith.constant 0 : index
      %c0_29 = arith.constant 0 : index
      %45 = vector.load %arg13[%c0_28, %c0_29] : memref<1x128xf32, #tpu.memory_space<vmem>>, vector<1x128xf32>
      tpu.vector_store %arg13[%c0_28, %c0_29], %44 {strides = array<i32>} : memref<1x128xf32, #tpu.memory_space<vmem>>, vector<1x128xf32>,
    } else {
    }
    %c1_i32 = arith.constant 1 : i32
    %15 = arith.cmpi eq, %arg0, %c1_i32 : i32
    %16 = arith.extui %15 : i1 to i32
    %c0_i32_11 = arith.constant 0 : i32
    %17 = arith.cmpi ne, %16, %c0_i32_11 : i32
    scf.if %17 {
      %c0_12 = arith.constant 0 : index
      %c0_13 = arith.constant 0 : index
      %18 = vector.load %arg9[%c0_12, %c0_13] : memref<128x128xf32, #tpu.memory_space<vmem>>, vector<128x128xf32>
      %c0_14 = arith.constant 0 : index
      %c0_15 = arith.constant 0 : index
      %19 = vector.load %arg11[%c0_14, %c0_15] : memref<1x128xf32, #tpu.memory_space<vmem>>, vector<1x128xf32>
      %cst_16 = arith.constant dense<0.000000e+00> : vector<1x128xf32>
      %20 = tpu.matmul %19, %18, %cst_16 {dimension_numbers = #tpu.dot_dimension_numbers<[1], [0], [0], [1], [0, 0, 1, 1], [], []>} : vector<1x128xf32>, vector<128x128xf32>, vector<1x128xf32> -> vector<1x128xf32>
      %c0_17 = arith.constant 0 : index
      %c0_18 = arith.constant 0 : index
      %21 = vector.load %arg12[%c0_17, %c0_18] : memref<1x128xf32, #tpu.memory_space<vmem>>, vector<1x128xf32>
      %cst_19 = arith.constant dense<0.000000e+00> : vector<1x128xf32>
      %22 = tpu.matmul %21, %18, %cst_19 {dimension_numbers = #tpu.dot_dimension_numbers<[1], [0], [0], [1], [0, 0, 1, 1], [], []>} : vector<1x128xf32>, vector<128x128xf32>, vector<1x128xf32> -> vector<1x128xf32>
      %c0_20 = arith.constant 0 : index
      %c0_21 = arith.constant 0 : index
      %23 = vector.load %arg13[%c0_20, %c0_21] : memref<1x128xf32, #tpu.memory_space<vmem>>, vector<1x128xf32>
      %cst_22 = arith.constant dense<0.000000e+00> : vector<1x128xf32>
      %24 = tpu.matmul %23, %18, %cst_22 {dimension_numbers = #tpu.dot_dimension_numbers<[1], [0], [0], [1], [0, 0, 1, 1], [], []>} : vector<1x128xf32>, vector<128x128xf32>, vector<1x128xf32> -> vector<1x128xf32>
      %cst_23 = arith.constant dense<0.000000e+00> : vector<1x128xf32>
      %25 = tpu.matmul %20, %11, %cst_23 {dimension_numbers = #tpu.dot_dimension_numbers<[1], [0], [0], [1], [0, 0, 1, 1], [], []>} : vector<1x128xf32>, vector<128x128xf32>, vector<1x128xf32> -> vector<1x128xf32>
      %cst_24 = arith.constant dense<0.000000e+00> : vector<1x128xf32>
      %26 = tpu.matmul %22, %11, %cst_24 {dimension_numbers = #tpu.dot_dimension_numbers<[1], [0], [0], [1], [0, 0, 1, 1], [], []>} : vector<1x128xf32>, vector<128x128xf32>, vector<1x128xf32> -> vector<1x128xf32>
      %27 = arith.mulf %20, %20 : vector<1x128xf32>
      %28 = arith.subf %22, %27 : vector<1x128xf32>
      %cst_25 = arith.constant 9.99999974E-6 : f32
      %29 = vector.broadcast %cst_25 : f32 to vector<1x128xf32>
      %30 = arith.addf %28, %29 : vector<1x128xf32>
      %31 = arith.mulf %25, %25 : vector<1x128xf32>
      %32 = arith.subf %26, %31 : vector<1x128xf32>
      %cst_26 = arith.constant 9.99999974E-6 : f32
      %33 = vector.broadcast %cst_26 : f32 to vector<1x128xf32>
      %34 = arith.addf %32, %33 : vector<1x128xf32>
      %35 = arith.mulf %20, %25 : vector<1x128xf32>
      %36 = arith.subf %24, %35 : vector<1x128xf32>
      %37 = arith.mulf %30, %34 : vector<1x128xf32>
      %38 = arith.mulf %36, %36 : vector<1x128xf32>
      %39 = arith.subf %37, %38 : vector<1x128xf32>
      %40 = math.sqrt %39 : vector<1x128xf32>
      %41 = arith.addf %30, %34 : vector<1x128xf32>
      %cst_27 = arith.constant 2.000000e+00 : f32
      %42 = vector.broadcast %cst_27 : f32 to vector<1x128xf32>
      %43 = arith.mulf %42, %40 : vector<1x128xf32>
      %44 = arith.addf %41, %43 : vector<1x128xf32>
      %45 = math.sqrt %44 : vector<1x128xf32>
      %46 = arith.mulf %40, %45 : vector<1x128xf32>
      %cst_28 = arith.constant 1.000000e+00 : f32
      %47 = vector.broadcast %cst_28 : f32 to vector<1x128xf32>
      %48 = arith.divf %47, %46 : vector<1x128xf32>
      %49 = arith.addf %34, %40 : vector<1x128xf32>
      %50 = arith.mulf %49, %48 : vector<1x128xf32>
      %51 = arith.addf %30, %40 : vector<1x128xf32>
      %52 = arith.mulf %51, %48 : vector<1x128xf32>
      %cst_29 = arith.constant 0.000000e+00 : f32
      %53 = vector.broadcast %cst_29 : f32 to vector<1x128xf32>
      %54 = arith.subf %53, %36 : vector<1x128xf32>
      %55 = arith.mulf %54, %48 : vector<1x128xf32>
      %c0_30 = arith.constant 0 : index
      %c0_31 = arith.constant 0 : index
      %56 = vector.load %arg5[%c0_30, %c0_31] : memref<1x128xf32, #tpu.memory_space<vmem>>, vector<1x128xf32>
      %57 = arith.mulf %56, %50 : vector<1x128xf32>
      %c0_32 = arith.constant 0 : index
      %c0_33 = arith.constant 0 : index
      %58 = vector.load %arg6[%c0_32, %c0_33] : memref<1x128xf32, #tpu.memory_space<vmem>>, vector<1x128xf32>
      %59 = arith.mulf %58, %55 : vector<1x128xf32>
      %60 = arith.addf %57, %59 : vector<1x128xf32>
      %c0_34 = arith.constant 0 : index
      %c0_35 = arith.constant 0 : index
      %61 = vector.load %arg5[%c0_34, %c0_35] : memref<1x128xf32, #tpu.memory_space<vmem>>, vector<1x128xf32>
      %62 = arith.mulf %61, %55 : vector<1x128xf32>
      %c0_36 = arith.constant 0 : index
      %c0_37 = arith.constant 0 : index
      %63 = vector.load %arg6[%c0_36, %c0_37] : memref<1x128xf32, #tpu.memory_space<vmem>>, vector<1x128xf32>
      %64 = arith.mulf %63, %52 : vector<1x128xf32>
      %65 = arith.addf %62, %64 : vector<1x128xf32>
      %cst_38 = arith.constant dense<0.000000e+00> : vector<32x128xf32>
      %66 = tpu.matmul %10, %11, %cst_38 {dimension_numbers = #tpu.dot_dimension_numbers<[1], [0], [0], [1], [0, 0, 1, 1], [], []>} : vector<32x128xf32>, vector<128x128xf32>, vector<32x128xf32> -> vector<32x128xf32>
      %67 = vector.broadcast %20 : vector<1x128xf32> to vector<32x128xf32>
      %68 = arith.subf %10, %67 : vector<32x128xf32>
      %69 = vector.broadcast %60 : vector<1x128xf32> to vector<32x128xf32>
      %70 = arith.mulf %69, %68 : vector<32x128xf32>
      %71 = vector.broadcast %25 : vector<1x128xf32> to vector<32x128xf32>
      %72 = arith.subf %66, %71 : vector<32x128xf32>
      %73 = vector.broadcast %65 : vector<1x128xf32> to vector<32x128xf32>
      %74 = arith.mulf %73, %72 : vector<32x128xf32>
      %75 = arith.addf %70, %74 : vector<32x128xf32>
      %c0_39 = arith.constant 0 : index
      %c0_40 = arith.constant 0 : index
      %76 = vector.load %arg7[%c0_39, %c0_40] : memref<1x128xf32, #tpu.memory_space<vmem>>, vector<1x128xf32>
      %77 = vector.broadcast %76 : vector<1x128xf32> to vector<32x128xf32>
      %78 = arith.addf %75, %77 : vector<32x128xf32>
      %cst_41 = arith.constant 0.000000e+00 : f32
      %79 = vector.broadcast %cst_41 : f32 to vector<32x128xf32>
      %80 = arith.maximumf %78, %79 : vector<32x128xf32>
      %c0_42 = arith.constant 0 : index
      %c0_43 = arith.constant 0 : index
      %81 = vector.load %arg10[%c0_42, %c0_43] : memref<32x128xf32, #tpu.memory_space<vmem>>, vector<32x128xf32>
      tpu.vector_store %arg10[%c0_42, %c0_43], %80 {strides = array<i32>} : memref<32x128xf32, #tpu.memory_space<vmem>>, vector<32x128xf32>,
    } else {
    }
    return
  }
  func.func @transform_0(%arg0: i32, %arg1: i32) -> (i32, i32) {
    %c0_i32 = arith.constant 0 : i32
    %c0_i32_0 = arith.constant 0 : i32
    return %arg1, %c0_i32 : i32, i32
  }
  func.func @transform_1(%arg0: i32, %arg1: i32) -> (i32, i32) {
    %c0_i32 = arith.constant 0 : i32
    %c0_i32_0 = arith.constant 0 : i32
    %c0_i32_1 = arith.constant 0 : i32
    return %c0_i32, %c0_i32_0 : i32, i32
  }
  func.func @transform_2(%arg0: i32, %arg1: i32) -> (i32, i32) {
    %c0_i32 = arith.constant 0 : i32
    %c0_i32_0 = arith.constant 0 : i32
    %c0_i32_1 = arith.constant 0 : i32
    return %c0_i32, %c0_i32_0 : i32, i32
  }
  func.func @transform_3(%arg0: i32, %arg1: i32) -> (i32, i32) {
    %c0_i32 = arith.constant 0 : i32
    %c0_i32_0 = arith.constant 0 : i32
    %c0_i32_1 = arith.constant 0 : i32
    return %c0_i32, %c0_i32_0 : i32, i32
  }
  func.func @transform_4(%arg0: i32, %arg1: i32) -> (i32, i32) {
    %c0_i32 = arith.constant 0 : i32
    %c0_i32_0 = arith.constant 0 : i32
    %c0_i32_1 = arith.constant 0 : i32
    return %c0_i32, %c0_i32_0 : i32, i32
  }
  func.func @transform_5(%arg0: i32, %arg1: i32) -> (i32, i32) {
    %c0_i32 = arith.constant 0 : i32
    %c0_i32_0 = arith.constant 0 : i32
    %c0_i32_1 = arith.constant 0 : i32
    return %c0_i32, %c0_i32_0 : i32, i32
  }
  func.func @transform_6(%arg0: i32, %arg1: i32) -> (i32, i32) {
    %c0_i32 = arith.constant 0 : i32
    %c0_i32_0 = arith.constant 0 : i32
    %c0_i32_1 = arith.constant 0 : i32
    return %c0_i32, %c0_i32_0 : i32, i32
  }
  func.func @transform_7(%arg0: i32, %arg1: i32) -> (i32, i32) {
    %c0_i32 = arith.constant 0 : i32
    %c0_i32_0 = arith.constant 0 : i32
    %c0_i32_1 = arith.constant 0 : i32
    return %c0_i32, %c0_i32_0 : i32, i32
  }
  func.func @transform_8(%arg0: i32, %arg1: i32) -> (i32, i32) {
    %0 = arith.muli %arg1, %arg0 : i32
    %c0_i32 = arith.constant 0 : i32
    %c0_i32_0 = arith.constant 0 : i32
    return %0, %c0_i32 : i32, i32
  }
}

</mosaic_0001>

<bundles_post_ra>
// kernel: neg.1
= control target key start
LH: loop header
LB: loop body
LE: loop exit
PB: predicated region body
PF: predicated region fallthrough
CT: control target
= control target key end

     0   :  { %s24_s0 = inlined_call_operand.vmem [shape: f32[16,8], index: 0, kind: input, shape index: {}]   ;;  %s25_s1 = inlined_call_operand.vmem [shape: f32[16,8], index: 1, kind: output, shape index: {}]  }
   0x1   :  { %v2_v0 = vld [vmem:[%s24_s0] sm:$0xff] }
   0x2   :  { %v5_v1 = vxor.u32 2147483648, %v2_v0 }
   0x4   :  { %7 = vst [vmem:[%s25_s1] sm:$0xff] %v5_v1 }

// kernel: tgru_block.3
= control target key start
LH: loop header
LB: loop body
LE: loop exit
PB: predicated region body
PF: predicated region fallthrough
CT: control target
= control target key end

     0   :  { %s1969_s27 = smov 0   ;;  %s1971_s28 = smov 0   ;;  %s2554_s0 = inlined_call_operand.vmem [shape: bf16[32,256], index: 0, kind: input, shape index: {}]   ;;  %s2555_s1 = inlined_call_operand.vmem [shape: bf16[256,128], index: 1, kind: input, shape index: {}]   ;;  %s2556_s2 = inlined_call_operand.vmem [shape: f32[1,128], index: 2, kind: input, shape index: {}]   ;;  %s2557_s3 = inlined_call_operand.vmem [shape: f32[1,128], index: 3, kind: input, shape index: {}]   ;;  %s2558_s4 = inlined_call_operand.vmem [shape: f32[1,128], index: 4, kind: input, shape index: {}]   ;;  %s2559_s5 = inlined_call_operand.vmem [shape: f32[1,128], index: 5, kind: input, shape index: {}]   ;;  %s2560_s6 = inlined_call_operand.vmem [shape: f32[128,128], index: 6, kind: input, shape index: {}]   ;;  %s2561_s7 = inlined_call_operand.vmem [shape: f32[128,128], index: 7, kind: input, shape index: {}]   ;;  %s2562_s8 = inlined_call_operand.vmem [shape: f32[32,128], index: 8, kind: output, shape index: {}]  }
   0x1   :  { %s1973_s29 = smov 0  }
   0x2 LB: > { %s30_s30 = sadd.s32 1, %s1915_s28  ;;  %p1359_p0 = scmp.ge.s32.totalorder %s1919_s29, 1  ;;  %s1919_s29 = sphi %s1973_s29, %s18_s29   ;;  %s1915_s28 = sphi %s1971_s28, %s2564_s28   ;;  %s1911_s27 = sphi %s1969_s27, %s2563_s27  }
   0x3   : > { %p32_p1 = scmp.ge.s32.totalorder %s30_s30, 2  ;;  %p278_p2 = scmp.lt.s32.totalorder %s1919_s29, 3 }
   0x5   : > { %s2566_s30 = smov (%p32_p1, %s30_s30), 0  ;;  %p279_p3 = pnand %p1359_p0, %p278_p2 }
   0x6   : > { %p330_p4 = scmp.eq.s32.totalorder (!%p279_p3), %s1911_s27, 0 }
   0x7   : > { %282 = sbr.rel (%p279_p3) target bundleno = 1014 (0x3f6), region = 52 }
   0xc   : > { %335 = sbr.rel (!%p330_p4) target bundleno = 17 (0x11), region = 56  ;;  %v1921_v0 = vmov (%p330_p4), 0.0  }
   0xd   : > { %336 = vst [vmem:[#allocation2] sm:$0x1] (%p330_p4), %v1921_v0  ;;  %337 = vst [vmem:[#allocation3] sm:$0x1] (%p330_p4), %v1921_v0 }
   0xe   : > { %338 = vst [vmem:[#allocation4] sm:$0x1] (%p330_p4), %v1921_v0 }
  0x11 PF: > { %v1869_v1 = vld [vmem:[%s2555_s1 + $0x78] sm:$0xff]   ;;  %v1871_v3 = vld [vmem:[%s2555_s1 + $0x70] sm:$0xff]   ;;  %v1873_v5 = vld [vmem:[%s2555_s1 + $0x68] sm:$0xff]   ;;  %p1382_p5 = scmp.ne.s32.totalorder %s1911_s27, 0 }
  0x12   : > { %v1870_v2 = vld [vmem:[%s2555_s1 + $0x38] sm:$0xff]   ;;  %1390 = vmatprep.subr.bf16.mxu0 %v1869_v1  ;;  %1794 = vmatprep.subr.bf16.mxu1 %v1869_v1  ;;  %v1872_v4 = vld [vmem:[%s2555_s1 + $0x30] sm:$0xff]   ;;  %v1874_v6 = vld [vmem:[%s2555_s1 + $0x28] sm:$0xff]  }
  0x13   : > { %1391 = vmatpush3.bf16.msra.mxu0 %v1870_v2  ;;  %1802 = vmatpush3.bf16.msra.mxu1 %v1870_v2  ;;  %v1875_v7 = vld [vmem:[%s2555_s1 + $0x60] sm:$0xff]   ;;  %v1877_v9 = vld [vmem:[%s2555_s1 + $0x58] sm:$0xff]   ;;  %v1879_v11 = vld [vmem:[%s2555_s1 + $0x50] sm:$0xff]  }
  0x14   : > { %1392 = vmatprep.subr.bf16.mxu0 %v1871_v3  ;;  %1795 = vmatprep.subr.bf16.mxu1 %v1871_v3  ;;  %v1876_v8 = vld [vmem:[%s2555_s1 + $0x20] sm:$0xff]   ;;  %v1878_v10 = vld [vmem:[%s2555_s1 + $0x18] sm:$0xff]   ;;  %v1880_v14 = vld [vmem:[%s2555_s1 + $0x10] sm:$0xff]  }
  0x15   : > { %v1887_v12 = vld [vmem:[%s2554_s0 + $0x4] ss:$8 sps:$4 sm:$0xff]   ;;  %v1890_v13 = vld [vmem:[%s2554_s0 + $0x14] ss:$8 sps:$4 sm:$0xff]   ;;  %v1885_v19 = vld [vmem:[%s2554_s0] ss:$8 sps:$4 sm:$0xff]  }
  0x16   : > { %v1881_v15 = vld [vmem:[%s2555_s1 + $0x48] sm:$0xff]   ;;  %530 = vmatprep.mubr.bf16.mxu0 %v1887_v12  ;;  %538 = vmatprep.mubr.bf16.mxu1 %v1890_v13  ;;  %v1883_v17 = vld [vmem:[%s2555_s1 + $0x40] sm:$0xff]   ;;  %v1888_v20 = vld [vmem:[%s2554_s0 + $0x10] ss:$8 sps:$4 sm:$0xff]  }
  0x17   : > { %1393 = vmatpush3.bf16.msra.mxu0 %v1872_v4  ;;  %1803 = vmatpush3.bf16.msra.mxu1 %v1872_v4  ;;  %v1882_v16 = vld [vmem:[%s2555_s1 + $0x8] sm:$0xff]   ;;  %v1884_v18 = vld [vmem:[%s2555_s1] sm:$0xff]   ;;  %v2063_v23 = vld [vmem:[%s2560_s6 + $0x10] sm:$0xff] }
  0x18   : > { %1394 = vmatprep.subr.bf16.mxu0 %v1873_v5  ;;  %1796 = vmatprep.subr.bf16.mxu1 %v1873_v5  ;;  %v2053_v21 = vld [vmem:[%s2560_s6] sm:$0xff]  ;;  %v2058_v22 = vld [vmem:[%s2560_s6 + $0x8] sm:$0xff]  ;;  %v2068_v24 = vld [vmem:[%s2560_s6 + $0x18] sm:$0xff] }
  0x19   : > { %v2073_v25 = vld [vmem:[%s2560_s6 + $0x20] sm:$0xff]  ;;  %v2078_v26 = vld [vmem:[%s2560_s6 + $0x28] sm:$0xff]  ;;  %v2083_v27 = vld [vmem:[%s2560_s6 + $0x30] sm:$0xff] }
  0x1a   : > { %v2088_v28 = vld [vmem:[%s2560_s6 + $0x38] sm:$0xff]  ;;  %v2093_v29 = vld [vmem:[%s2560_s6 + $0x40] sm:$0xff]  ;;  %v2098_v30 = vld [vmem:[%s2560_s6 + $0x48] sm:$0xff] }
  0x1b   : > { %1395 = vmatpush3.bf16.msra.mxu0 %v1874_v6  ;;  %1804 = vmatpush3.bf16.msra.mxu1 %v1874_v6  ;;  %v2103_v31 = vld [vmem:[%s2560_s6 + $0x50] sm:$0xff]  ;;  %v2108_v32 = vld [vmem:[%s2560_s6 + $0x58] sm:$0xff]  ;;  %v2113_v33 = vld [vmem:[%s2560_s6 + $0x60] sm:$0xff] }
  0x1c   : > { %1396 = vmatprep.subr.bf16.mxu0 %v1875_v7  ;;  %1797 = vmatprep.subr.bf16.mxu1 %v1875_v7  ;;  %v2118_v34 = vld [vmem:[%s2560_s6 + $0x68] sm:$0xff]  ;;  %v2123_v35 = vld [vmem:[%s2560_s6 + $0x70] sm:$0xff]  ;;  %v2128_v36 = vld [vmem:[%s2560_s6 + $0x78] sm:$0xff] }
  0x1d   : > { %v1361_v39 = vld [vmem:[%s2556_s2] ss:$0 sm:$0xff] }
  0x1f   : > { %1397 = vmatpush3.bf16.msra.mxu0 %v1876_v8  ;;  %1805 = vmatpush3.bf16.msra.mxu1 %v1876_v8 }
  0x20   : > { %1398 = vmatprep.subr.bf16.mxu0 %v1877_v9  ;;  %1798 = vmatprep.subr.bf16.mxu1 %v1877_v9 }
  0x23   : > { %1399 = vmatpush3.bf16.msra.mxu0 %v1878_v10  ;;  %1806 = vmatpush3.bf16.msra.mxu1 %v1878_v10 }
  0x24   : > { %1400 = vmatprep.subr.bf16.mxu0 %v1879_v11  ;;  %1799 = vmatprep.subr.bf16.mxu1 %v1879_v11 }
  0x27   : > { %1401 = vmatpush3.bf16.msra.mxu0 %v1880_v14  ;;  %1807 = vmatpush3.bf16.msra.mxu1 %v1880_v14 }
  0x28   : > { %1402 = vmatprep.subr.bf16.mxu0 %v1881_v15  ;;  %1800 = vmatprep.subr.bf16.mxu1 %v1881_v15 }
  0x2b   : > { %1403 = vmatpush3.bf16.msra.mxu0 %v1882_v16  ;;  %1808 = vmatpush3.bf16.msra.mxu1 %v1882_v16 }
  0x2c   : > { %1404 = vmatprep.subr.bf16.mxu0 %v1883_v17  ;;  %1801 = vmatprep.subr.bf16.mxu1 %v1883_v17 }
  0x2f   : > { %1405 = vmatpush3.bf16.msra.mxu0 %v1884_v18  ;;  %1809 = vmatpush3.bf16.msra.mxu1 %v1884_v18 }
  0x32   : > { %531 = vmatmul.mubr.bf16.vlgmr.msra.gmra.mxu0 %v1885_v19  ;;  %539 = vmatmul.mubr.bf16.vlgmr.msra.gmra.mxu1 %v1888_v20 }
  0xf2   : > { %v1406_v37 = vpop.f32.mrf.mxu0  ;;  %v1412_v38 = vpop.f32.mrf.mxu1 }
  0xf4   : > { %v1407_v40 = vpop.f32.mrf.mxu0  ;;  %v1413_v41 = vpop.f32.mrf.mxu1 }
  0xf5   : > { %v1408_v42 = vadd.f32 %v1407_v40, %v1406_v37  ;;  %v1414_v43 = vadd.f32 %v1413_v41, %v1412_v38 }
  0xf6   : > { %v1409_v44 = vpop.f32.mrf.mxu0  ;;  %v1415_v45 = vpop.f32.mrf.mxu1 }
  0xf7   : > { %v2133_v46 = vadd.f32 %v1408_v42, %v1361_v39  ;;  %v2135_v47 = vadd.f32 %v1414_v43, %v1361_v39  ;;  %565 = sbr.rel (%p1382_p5) target bundleno = 503 (0x1f7), region = 60 }
  0xf8   : > { %v1410_v48 = vpop.f32.mrf.mxu0  ;;  %v1416_v49 = vpop.f32.mrf.mxu1 }
  0xf9   : > { %v1411_v50 = vadd.f32 %v1410_v48, %v1409_v44  ;;  %v1417_v51 = vadd.f32 %v1416_v49, %v1415_v45 }
  0xfb   : > { %v2137_v52 = vadd.f32 %v1411_v50, %v1361_v39  ;;  %v2139_v53 = vadd.f32 %v1417_v51, %v1361_v39 }
  0xfc   : > { %1543 = vmatprep.subr.mxu0 %v2128_v36  ;;  %1810 = vmatprep.subr.mxu1 %v2128_v36  ;;  %v691_v54 = vmul.f32 %v2133_v46, %v2133_v46  ;;  %v693_v57 = vmul.f32 %v2135_v47, %v2135_v47  ;;  %v678_v12 = vld [vmem:[#allocation2] sm:$0x1]  ;;  %v690_v13 = vld [vmem:[#allocation3] sm:$0x1]  ;;  %v706_v50 = vld [vmem:[#allocation4] sm:$0x1] }
  0xfd   : > { %1544 = vmatpush3.msra.mxu0 %v2128_v36  ;;  %1826 = vmatpush3.msra.mxu1 %v2128_v36  ;;  %v692_v55 = vmul.f32 %v2137_v52, %v2137_v52  ;;  %v679_v56 = vadd.f32 %v2137_v52, %v2133_v46  ;;  %v694_v60 = vmul.f32 %v2139_v53, %v2139_v53 }
  0xfe   : > { %1545 = vmatprep.subr.mxu0 %v2123_v35  ;;  %1811 = vmatprep.subr.mxu1 %v2123_v35 }
  0xff   : > { %1546 = vmatpush3.msra.mxu0 %v2123_v35  ;;  %1827 = vmatpush3.msra.mxu1 %v2123_v35  ;;  %v695_v58 = vadd.f32 %v692_v55, %v691_v54  ;;  %v680_v59 = vadd.f32 %v679_v56, %v2135_v47 }
 0x100   : > { %1547 = vmatprep.subr.mxu0 %v2118_v34  ;;  %1812 = vmatprep.subr.mxu1 %v2118_v34 }
 0x101   : > { %1548 = vmatpush3.msra.mxu0 %v2118_v34  ;;  %1828 = vmatpush3.msra.mxu1 %v2118_v34  ;;  %v696_v61 = vadd.f32 %v695_v58, %v693_v57  ;;  %v681_v62 = vadd.f32 %v680_v59, %v2139_v53 }
 0x102   : > { %1549 = vmatprep.subr.mxu0 %v2113_v33  ;;  %1813 = vmatprep.subr.mxu1 %v2113_v33 }
 0x103   : > { %1550 = vmatpush3.msra.mxu0 %v2113_v33  ;;  %1829 = vmatpush3.msra.mxu1 %v2113_v33  ;;  %v697_v63 = vadd.f32 %v696_v61, %v694_v60  ;;  %v682_v0 = vrot.slane %v681_v62, 4 }
 0x104   : > { %1551 = vmatprep.subr.mxu0 %v2108_v32  ;;  %1814 = vmatprep.subr.mxu1 %v2108_v32 }
 0x105   : > { %1552 = vmatpush3.msra.mxu0 %v2108_v32  ;;  %1830 = vmatpush3.msra.mxu1 %v2108_v32  ;;  %v698_v1 = vrot.slane %v697_v63, 4  ;;  %v683_v2 = vadd.f32 %v682_v0, %v681_v62 }
 0x106   : > { %1553 = vmatprep.subr.mxu0 %v2103_v31  ;;  %1815 = vmatprep.subr.mxu1 %v2103_v31 }
 0x107   : > { %1554 = vmatpush3.msra.mxu0 %v2103_v31  ;;  %1831 = vmatpush3.msra.mxu1 %v2103_v31  ;;  %v699_v3 = vadd.f32 %v698_v1, %v697_v63  ;;  %v684_v4 = vrot.slane %v683_v2, 2 }
 0x108   : > { %1555 = vmatprep.subr.mxu0 %v2098_v30  ;;  %1816 = vmatprep.subr.mxu1 %v2098_v30 }
 0x109   : > { %1556 = vmatpush3.msra.mxu0 %v2098_v30  ;;  %1832 = vmatpush3.msra.mxu1 %v2098_v30  ;;  %v700_v5 = vrot.slane %v699_v3, 2  ;;  %v685_v6 = vadd.f32 %v684_v4, %v683_v2 }
 0x10a   : > { %1557 = vmatprep.subr.mxu0 %v2093_v29  ;;  %1817 = vmatprep.subr.mxu1 %v2093_v29 }
 0x10b   : > { %1558 = vmatpush3.msra.mxu0 %v2093_v29  ;;  %1833 = vmatpush3.msra.mxu1 %v2093_v29  ;;  %v701_v7 = vadd.f32 %v700_v5, %v699_v3  ;;  %v686_v8 = vrot.slane %v685_v6, 1 }
 0x10c   : > { %1559 = vmatprep.subr.mxu0 %v2088_v28  ;;  %1818 = vmatprep.subr.mxu1 %v2088_v28 }
 0x10d   : > { %1560 = vmatpush3.msra.mxu0 %v2088_v28  ;;  %1834 = vmatpush3.msra.mxu1 %v2088_v28  ;;  %v702_v9 = vrot.slane %v701_v7, 1  ;;  %v687_v10 = vadd.f32 %v686_v8, %v685_v6 }
 0x10e   : > { %1561 = vmatprep.subr.mxu0 %v2083_v27  ;;  %1819 = vmatprep.subr.mxu1 %v2083_v27 }
 0x10f   : > { %1562 = vmatpush3.msra.mxu0 %v2083_v27  ;;  %1835 = vmatpush3.msra.mxu1 %v2083_v27  ;;  %v703_v11 = vadd.f32 %v702_v9, %v701_v7  ;;  %v688_v14 = vadd.f32 %v687_v10, %v678_v12 }
 0x110   : > { %1563 = vmatprep.subr.mxu0 %v2078_v26  ;;  %1820 = vmatprep.subr.mxu1 %v2078_v26 }
 0x111   : > { %1564 = vmatpush3.msra.mxu0 %v2078_v26  ;;  %1836 = vmatpush3.msra.mxu1 %v2078_v26  ;;  %v704_v15 = vadd.f32 %v703_v11, %v690_v13  ;;  %689 = vst [vmem:[#allocation2] sm:$0x1] %v688_v14 }
 0x112   : > { %1565 = vmatprep.subr.mxu0 %v2073_v25  ;;  %1821 = vmatprep.subr.mxu1 %v2073_v25 }
 0x113   : > { %1566 = vmatpush3.msra.mxu0 %v2073_v25  ;;  %1837 = vmatpush3.msra.mxu1 %v2073_v25  ;;  %705 = vst [vmem:[#allocation3] sm:$0x1] %v704_v15 }
 0x114   : > { %1567 = vmatprep.subr.mxu0 %v2068_v24  ;;  %1822 = vmatprep.subr.mxu1 %v2068_v24 }
 0x115   : > { %1568 = vmatpush3.msra.mxu0 %v2068_v24  ;;  %1838 = vmatpush3.msra.mxu1 %v2068_v24 }
 0x116   : > { %1569 = vmatprep.subr.mxu0 %v2063_v23  ;;  %1823 = vmatprep.subr.mxu1 %v2063_v23 }
 0x117   : > { %1570 = vmatpush3.msra.mxu0 %v2063_v23  ;;  %1839 = vmatpush3.msra.mxu1 %v2063_v23 }
 0x118   : > { %1571 = vmatprep.subr.mxu0 %v2058_v22  ;;  %1824 = vmatprep.subr.mxu1 %v2058_v22 }
 0x119   : > { %1572 = vmatpush3.msra.mxu0 %v2058_v22  ;;  %1840 = vmatpush3.msra.mxu1 %v2058_v22 }
 0x11a   : > { %1573 = vmatprep.subr.mxu0 %v2053_v21  ;;  %1825 = vmatprep.subr.mxu1 %v2053_v21 }
 0x11b   : > { %1574 = vmatpush3.msra.mxu0 %v2053_v21  ;;  %1841 = vmatpush3.msra.mxu1 %v2053_v21 }
 0x11c   : > { %1575 = vmatprep.mubr.f32.mxu0 %v2133_v46  ;;  %1578 = vmatprep.mubr.f32.mxu1 %v2135_v47 }
 0x11d   : > { %1576 = vmatmul.mubr.f32.vlgmr.msra.gmra.mxu0 %v2137_v52  ;;  %1579 = vmatmul.mubr.f32.vlgmr.msra.gmra.mxu1 %v2139_v53 }
 0x1dd   : > { %v1577_v16 = vpop.f32.mrf.mxu0  ;;  %v1580_v17 = vpop.f32.mrf.mxu1 }
 0x1de   : > { %v708_v20 = vmul.f32 %v1577_v16, %v2137_v52  ;;  %v710_v40 = vmul.f32 %v1580_v17, %v2139_v53 }
 0x1df   : > { %v659_v18 = vpop.f32.mrf.mxu0  ;;  %v669_v19 = vpop.f32.mrf.mxu1 }
 0x1e0   : > { %v707_v37 = vmul.f32 %v659_v18, %v2133_v46  ;;  %v709_v39 = vmul.f32 %v669_v19, %v2135_v47 }
 0x1e2   : > { %v711_v38 = vadd.f32 %v708_v20, %v707_v37 }
 0x1e4   : > { %v712_v41 = vadd.f32 %v711_v38, %v709_v39 }
 0x1e6   : > { %v713_v42 = vadd.f32 %v712_v41, %v710_v40 }
 0x1e8   : > { %v714_v43 = vrot.slane %v713_v42, 4 }
 0x1ea   : > { %v715_v44 = vadd.f32 %v714_v43, %v713_v42 }
 0x1ec   : > { %v716_v45 = vrot.slane %v715_v44, 2 }
 0x1ee   : > { %v717_v48 = vadd.f32 %v716_v45, %v715_v44 }
 0x1f0   : > { %v718_v49 = vrot.slane %v717_v48, 1 }
 0x1f2   : > { %v719_v51 = vadd.f32 %v718_v49, %v717_v48 }
 0x1f4   : > { %v720_v54 = vadd.f32 %v719_v51, %v706_v50 }
 0x1f6   : > { %721 = vst [vmem:[#allocation4] sm:$0x1] %v720_v54 }
 0x1f7 PF: > { %p1383_p6 = scmp.ne.s32.totalorder %s1911_s27, 1 }
 0x1f9   : > { %725 = sbr.rel (%p1383_p6) target bundleno = 1014 (0x3f6), region = 64 }
 0x1fe   : > { %v2230_v55 = vld [vmem:[%s2561_s7 + $0x78] sm:$0xff]  ;;  %v1922_v56 = vmov 0.0   ;;  %v2237_v57 = vld [vmem:[%s2561_s7 + $0x70] sm:$0xff]  ;;  %v2246_v58 = vld [vmem:[%s2561_s7 + $0x68] sm:$0xff]  ;;  %vm1923_vm0 = vmmov 0   ;;  %v1225_v48 = vlaneseq }
 0x1ff   : > { %1581 = vmatprep.subr.mxu0 %v1922_v56  ;;  %1616 = vmatprep.subr.mxu1 %v1922_v56  ;;  %v2255_v59 = vld [vmem:[%s2561_s7 + $0x60] sm:$0xff]  ;;  %v2264_v60 = vld [vmem:[%s2561_s7 + $0x58] sm:$0xff]  ;;  %v2273_v61 = vld [vmem:[%s2561_s7 + $0x50] sm:$0xff] }
 0x200   : > { %1582 = vmatpush3.msra.mxu0 %v2230_v55  ;;  %1617 = vmatpush3.msra.mxu1 %v2230_v55  ;;  %v2282_v62 = vld [vmem:[%s2561_s7 + $0x48] sm:$0xff]  ;;  %v2291_v63 = vld [vmem:[%s2561_s7 + $0x40] sm:$0xff]  ;;  %v2300_v0 = vld [vmem:[%s2561_s7 + $0x38] sm:$0xff]  ;;  %v1226_v50 = vshrl.u32 %v1225_v48, 7 }
 0x201   : > { %1583 = vmatprep.subr.mxu0 %v1922_v56  ;;  %1618 = vmatprep.subr.mxu1 %v1922_v56  ;;  %v2309_v1 = vld [vmem:[%s2561_s7 + $0x30] sm:$0xff]  ;;  %v2318_v2 = vld [vmem:[%s2561_s7 + $0x28] sm:$0xff]  ;;  %v2327_v3 = vld [vmem:[%s2561_s7 + $0x20] sm:$0xff] }
 0x202   : > { %1584 = vmatpush3.msra.mxu0 %v2237_v57  ;;  %1619 = vmatpush3.msra.mxu1 %v2237_v57  ;;  %v2336_v4 = vld [vmem:[%s2561_s7 + $0x18] sm:$0xff]  ;;  %v2345_v5 = vld [vmem:[%s2561_s7 + $0x10] sm:$0xff]  ;;  %v2354_v6 = vld [vmem:[%s2561_s7 + $0x8] sm:$0xff]  ;;  %v1227_v54 = vsub.s32 0, %v1226_v50 }
 0x203   : > { %1585 = vmatprep.subr.mxu0 %v1922_v56  ;;  %1620 = vmatprep.subr.mxu1 %v1922_v56  ;;  %v2363_v7 = vld [vmem:[%s2561_s7] sm:$0xff] }
 0x204   : > { %1586 = vmatpush3.msra.mxu0 %v2246_v58  ;;  %1621 = vmatpush3.msra.mxu1 %v2246_v58  ;;  %v742_v8 = vld [vmem:[#allocation2] sm:$0x1]  ;;  %v813_v9 = vld [vmem:[#allocation3] sm:$0x1]  ;;  %v884_v10 = vld [vmem:[#allocation4] sm:$0x1] }
 0x205   : > { %1587 = vmatprep.subr.mxu0 %v1922_v56  ;;  %1622 = vmatprep.subr.mxu1 %v1922_v56 }
 0x206   : > { %1588 = vmatpush3.msra.mxu0 %v2255_v59  ;;  %1623 = vmatpush3.msra.mxu1 %v2255_v59 }
 0x207   : > { %1589 = vmatprep.subr.mxu0 %v1922_v56  ;;  %1624 = vmatprep.subr.mxu1 %v1922_v56 }
 0x208   : > { %1590 = vmatpush3.msra.mxu0 %v2264_v60  ;;  %1625 = vmatpush3.msra.mxu1 %v2264_v60 }
 0x209   : > { %1591 = vmatprep.subr.mxu0 %v1922_v56  ;;  %1626 = vmatprep.subr.mxu1 %v1922_v56 }
 0x20a   : > { %1592 = vmatpush3.msra.mxu0 %v2273_v61  ;;  %1627 = vmatpush3.msra.mxu1 %v2273_v61 }
 0x20b   : > { %1593 = vmatprep.subr.mxu0 %v1922_v56  ;;  %1628 = vmatprep.subr.mxu1 %v1922_v56 }
 0x20c   : > { %1594 = vmatpush3.msra.mxu0 %v2282_v62  ;;  %1629 = vmatpush3.msra.mxu1 %v2282_v62 }
 0x20d   : > { %1595 = vmatprep.subr.mxu0 %v1922_v56  ;;  %1630 = vmatprep.subr.mxu1 %v1922_v56 }
 0x20e   : > { %1596 = vmatpush3.msra.mxu0 %v2291_v63  ;;  %1631 = vmatpush3.msra.mxu1 %v2291_v63 }
 0x20f   : > { %1597 = vmatprep.subr.mxu0 %v1922_v56  ;;  %1632 = vmatprep.subr.mxu1 %v1922_v56 }
 0x210   : > { %1598 = vmatpush3.msra.mxu0 %v2300_v0  ;;  %1633 = vmatpush3.msra.mxu1 %v2300_v0 }
 0x211   : > { %1599 = vmatprep.subr.mxu0 %v1922_v56  ;;  %1634 = vmatprep.subr.mxu1 %v1922_v56 }
 0x212   : > { %1600 = vmatpush3.msra.mxu0 %v2309_v1  ;;  %1635 = vmatpush3.msra.mxu1 %v2309_v1 }
 0x213   : > { %1601 = vmatprep.subr.mxu0 %v1922_v56  ;;  %1636 = vmatprep.subr.mxu1 %v1922_v56 }
 0x214   : > { %1602 = vmatpush3.msra.mxu0 %v2318_v2  ;;  %1637 = vmatpush3.msra.mxu1 %v2318_v2 }
 0x215   : > { %1603 = vmatprep.subr.mxu0 %v1922_v56  ;;  %1638 = vmatprep.subr.mxu1 %v1922_v56 }
 0x216   : > { %1604 = vmatpush3.msra.mxu0 %v2327_v3  ;;  %1639 = vmatpush3.msra.mxu1 %v2327_v3 }
 0x217   : > { %1605 = vmatprep.subr.mxu0 %v1922_v56  ;;  %1640 = vmatprep.subr.mxu1 %v1922_v56 }
 0x218   : > { %1606 = vmatpush3.msra.mxu0 %v2336_v4  ;;  %1641 = vmatpush3.msra.mxu1 %v2336_v4 }
 0x219   : > { %1607 = vmatprep.subr.mxu0 %v1922_v56  ;;  %1642 = vmatprep.subr.mxu1 %v1922_v56 }
 0x21a   : > { %1608 = vmatpush3.msra.mxu0 %v2345_v5  ;;  %1643 = vmatpush3.msra.mxu1 %v2345_v5 }
 0x21b   : > { %1609 = vmatprep.subr.mxu0 %v1922_v56  ;;  %1644 = vmatprep.subr.mxu1 %v1922_v56 }
 0x21c   : > { %1610 = vmatpush3.msra.mxu0 %v2354_v6  ;;  %1645 = vmatpush3.msra.mxu1 %v2354_v6 }
 0x21d   : > { %1611 = vmatprep.subr.mxu0 %v1922_v56  ;;  %1646 = vmatprep.subr.mxu1 %v1922_v56 }
 0x21e   : > { %1612 = vmatpush3.msra.mxu0 %v2363_v7  ;;  %1613 = vmatprep.mubr.msk.f32.mxu0 %vm1923_vm0, %v1922_v56 }
 0x21f   : > { %1647 = vmatpush3.msra.mxu1 %v2363_v7  ;;  %1648 = vmatprep.mubr.msk.f32.mxu1 %vm1923_vm0, %v1922_v56 }
 0x220   : > { %1614 = vmatmul.mubr.f32.vlgmr.msra.gmra.mxu0 %v742_v8  ;;  %1649 = vmatmul.mubr.f32.vlgmr.msra.gmra.mxu1 %v813_v9 }
 0x221   : > { %1651 = vmatprep.subr.mxu0 %v1922_v56  ;;  %1686 = vmatprep.subr.mxu1 %v1922_v56 }
 0x222   : > { %1652 = vmatpush3.msra.mxu0 %v2230_v55  ;;  %1683 = vmatprep.mubr.msk.f32.mxu0 %vm1923_vm0, %v1922_v56 }
 0x223   : > { %1653 = vmatprep.subr.mxu0 %v1922_v56  ;;  %1687 = vmatpush3.msra.mxu1 %v2128_v36 }
 0x224   : > { %1654 = vmatpush3.msra.mxu0 %v2237_v57  ;;  %1688 = vmatprep.subr.mxu1 %v1922_v56 }
 0x225   : > { %1655 = vmatprep.subr.mxu0 %v1922_v56  ;;  %1689 = vmatpush3.msra.mxu1 %v2123_v35 }
 0x226   : > { %1656 = vmatpush3.msra.mxu0 %v2246_v58  ;;  %1690 = vmatprep.subr.mxu1 %v1922_v56 }
 0x227   : > { %1657 = vmatprep.subr.mxu0 %v1922_v56  ;;  %1691 = vmatpush3.msra.mxu1 %v2118_v34 }
 0x228   : > { %1658 = vmatpush3.msra.mxu0 %v2255_v59  ;;  %1692 = vmatprep.subr.mxu1 %v1922_v56  ;;  %v1132_v59 = vld [vmem:[%s2557_s3] sm:$0x1] }
 0x229   : > { %1659 = vmatprep.subr.mxu0 %v1922_v56  ;;  %1693 = vmatpush3.msra.mxu1 %v2113_v33 }
 0x22a   : > { %1660 = vmatpush3.msra.mxu0 %v2264_v60  ;;  %1694 = vmatprep.subr.mxu1 %v1922_v56  ;;  %v1134_v60 = vld [vmem:[%s2558_s4] sm:$0x1] }
 0x22b   : > { %1661 = vmatprep.subr.mxu0 %v1922_v56  ;;  %1695 = vmatpush3.msra.mxu1 %v2108_v32 }
 0x22c   : > { %1662 = vmatpush3.msra.mxu0 %v2273_v61  ;;  %1696 = vmatprep.subr.mxu1 %v1922_v56 }
 0x22d   : > { %1663 = vmatprep.subr.mxu0 %v1922_v56  ;;  %1697 = vmatpush3.msra.mxu1 %v2103_v31 }
 0x22e   : > { %1664 = vmatpush3.msra.mxu0 %v2282_v62  ;;  %1698 = vmatprep.subr.mxu1 %v1922_v56 }
 0x22f   : > { %1665 = vmatprep.subr.mxu0 %v1922_v56  ;;  %1699 = vmatpush3.msra.mxu1 %v2098_v30 }
 0x230   : > { %1666 = vmatpush3.msra.mxu0 %v2291_v63  ;;  %1700 = vmatprep.subr.mxu1 %v1922_v56 }
 0x231   : > { %1667 = vmatprep.subr.mxu0 %v1922_v56  ;;  %1701 = vmatpush3.msra.mxu1 %v2093_v29 }
 0x232   : > { %1668 = vmatpush3.msra.mxu0 %v2300_v0  ;;  %1702 = vmatprep.subr.mxu1 %v1922_v56 }
 0x233   : > { %1669 = vmatprep.subr.mxu0 %v1922_v56  ;;  %1703 = vmatpush3.msra.mxu1 %v2088_v28 }
 0x234   : > { %1670 = vmatpush3.msra.mxu0 %v2309_v1  ;;  %1704 = vmatprep.subr.mxu1 %v1922_v56 }
 0x235   : > { %1671 = vmatprep.subr.mxu0 %v1922_v56  ;;  %1705 = vmatpush3.msra.mxu1 %v2083_v27 }
 0x236   : > { %1672 = vmatpush3.msra.mxu0 %v2318_v2  ;;  %1706 = vmatprep.subr.mxu1 %v1922_v56 }
 0x237   : > { %1673 = vmatprep.subr.mxu0 %v1922_v56  ;;  %1707 = vmatpush3.msra.mxu1 %v2078_v26 }
 0x238   : > { %1674 = vmatpush3.msra.mxu0 %v2327_v3  ;;  %1708 = vmatprep.subr.mxu1 %v1922_v56 }
 0x239   : > { %1675 = vmatprep.subr.mxu0 %v1922_v56  ;;  %1709 = vmatpush3.msra.mxu1 %v2073_v25 }
 0x23a   : > { %1676 = vmatpush3.msra.mxu0 %v2336_v4  ;;  %1710 = vmatprep.subr.mxu1 %v1922_v56 }
 0x23b   : > { %1677 = vmatprep.subr.mxu0 %v1922_v56  ;;  %1711 = vmatpush3.msra.mxu1 %v2068_v24 }
 0x23c   : > { %1678 = vmatpush3.msra.mxu0 %v2345_v5  ;;  %1712 = vmatprep.subr.mxu1 %v1922_v56 }
 0x23d   : > { %1679 = vmatprep.subr.mxu0 %v1922_v56  ;;  %1713 = vmatpush3.msra.mxu1 %v2063_v23 }
 0x23e   : > { %1680 = vmatpush3.msra.mxu0 %v2354_v6  ;;  %1714 = vmatprep.subr.mxu1 %v1922_v56 }
 0x23f   : > { %1681 = vmatprep.subr.mxu0 %v1922_v56  ;;  %1715 = vmatpush3.msra.mxu1 %v2058_v22 }
 0x240   : > { %1682 = vmatpush3.msra.mxu0 %v2363_v7  ;;  %1716 = vmatprep.subr.mxu1 %v1922_v56 }
 0x241   : > { %1721 = vmatprep.subr.mxu0 %v1922_v56  ;;  %1684 = vmatmul.mubr.f32.vlgmr.msra.gmra.mxu0 %v884_v10 }
 0x242   : > { %1722 = vmatpush3.msra.mxu0 %v2128_v36  ;;  %1717 = vmatpush3.msra.mxu1 %v2053_v21 }
 0x243   : > { %1723 = vmatprep.subr.mxu0 %v1922_v56  ;;  %1718 = vmatprep.mubr.msk.f32.mxu1 %vm1923_vm0, %v1922_v56 }
 0x244   : > { %1724 = vmatpush3.msra.mxu0 %v2123_v35  ;;  %1753 = vmatprep.mubr.msk.f32.mxu0 %vm1923_vm0, %v1922_v56 }
 0x245   : > { %1725 = vmatprep.subr.mxu0 %v1922_v56  ;;  %1756 = vmatprep.subr.mxu1 %v2128_v36 }
 0x246   : > { %1726 = vmatpush3.msra.mxu0 %v2118_v34 }
 0x247   : > { %1727 = vmatprep.subr.mxu0 %v1922_v56 }
 0x248   : > { %1728 = vmatpush3.msra.mxu0 %v2113_v33 }
 0x249   : > { %1729 = vmatprep.subr.mxu0 %v1922_v56 }
 0x24a   : > { %1730 = vmatpush3.msra.mxu0 %v2108_v32 }
 0x24b   : > { %1731 = vmatprep.subr.mxu0 %v1922_v56 }
 0x24c   : > { %1732 = vmatpush3.msra.mxu0 %v2103_v31 }
 0x24d   : > { %1733 = vmatprep.subr.mxu0 %v1922_v56 }
 0x24e   : > { %1734 = vmatpush3.msra.mxu0 %v2098_v30 }
 0x24f   : > { %1735 = vmatprep.subr.mxu0 %v1922_v56 }
 0x250   : > { %1736 = vmatpush3.msra.mxu0 %v2093_v29 }
 0x251   : > { %1737 = vmatprep.subr.mxu0 %v1922_v56 }
 0x252   : > { %1738 = vmatpush3.msra.mxu0 %v2088_v28 }
 0x253   : > { %1739 = vmatprep.subr.mxu0 %v1922_v56 }
 0x254   : > { %1740 = vmatpush3.msra.mxu0 %v2083_v27 }
 0x255   : > { %1741 = vmatprep.subr.mxu0 %v1922_v56 }
 0x256   : > { %1742 = vmatpush3.msra.mxu0 %v2078_v26 }
 0x257   : > { %1743 = vmatprep.subr.mxu0 %v1922_v56 }
 0x258   : > { %1744 = vmatpush3.msra.mxu0 %v2073_v25 }
 0x259   : > { %1745 = vmatprep.subr.mxu0 %v1922_v56 }
 0x25a   : > { %1746 = vmatpush3.msra.mxu0 %v2068_v24 }
 0x25b   : > { %1747 = vmatprep.subr.mxu0 %v1922_v56 }
 0x25c   : > { %1748 = vmatpush3.msra.mxu0 %v2063_v23 }
 0x25d   : > { %1749 = vmatprep.subr.mxu0 %v1922_v56 }
 0x25e   : > { %1750 = vmatpush3.msra.mxu0 %v2058_v22 }
 0x25f   : > { %1751 = vmatprep.subr.mxu0 %v1922_v56 }
 0x260   : > { %1752 = vmatpush3.msra.mxu0 %v2053_v21 }
 0x2e0   : > { %v2478_v11 = vpop.f32.mrf.mxu0  ;;  %v880_v12 = vpop.f32.mrf.mxu1 }
 0x2e1   : > { %1719 = vmatmul.mubr.f32.vlgmr.msra.gmra.mxu1 %v2478_v11  ;;  %1754 = vmatmul.mubr.f32.vlgmr.msra.gmra.mxu0 %v880_v12  ;;  %v1228_v1 = vrot.slane %v2478_v11, %v1227_v54 }
 0x2e2   : > { %1757 = vmatpush3.msra.mxu1 %v2128_v36  ;;  %v1615_v13 = vpop.f32.mrf.mxu0  ;;  %v1650_v14 = vpop.f32.mrf.mxu1  ;;  %1788 = vmatprep.mubr.f32.mxu1 %v2133_v46 }
 0x2e3   : > { %1758 = vmatprep.subr.mxu1 %v2123_v35  ;;  %v1230_v10 = vsub.f32 %v2137_v52, %v1228_v1 }
 0x2e4   : > { %1759 = vmatpush3.msra.mxu1 %v2123_v35 }
 0x2e5   : > { %1760 = vmatprep.subr.mxu1 %v2118_v34 }
 0x2e6   : > { %1761 = vmatpush3.msra.mxu1 %v2118_v34 }
 0x2e7   : > { %1762 = vmatprep.subr.mxu1 %v2113_v33 }
 0x2e8   : > { %1763 = vmatpush3.msra.mxu1 %v2113_v33 }
 0x2e9   : > { %1764 = vmatprep.subr.mxu1 %v2108_v32 }
 0x2ea   : > { %1765 = vmatpush3.msra.mxu1 %v2108_v32 }
 0x2eb   : > { %1766 = vmatprep.subr.mxu1 %v2103_v31 }
 0x2ec   : > { %1767 = vmatpush3.msra.mxu1 %v2103_v31 }
 0x2ed   : > { %1768 = vmatprep.subr.mxu1 %v2098_v30 }
 0x2ee   : > { %1769 = vmatpush3.msra.mxu1 %v2098_v30 }
 0x2ef   : > { %1770 = vmatprep.subr.mxu1 %v2093_v29 }
 0x2f0   : > { %1771 = vmatpush3.msra.mxu1 %v2093_v29 }
 0x2f1   : > { %1772 = vmatprep.subr.mxu1 %v2088_v28 }
 0x2f2   : > { %1773 = vmatpush3.msra.mxu1 %v2088_v28 }
 0x2f3   : > { %1774 = vmatprep.subr.mxu1 %v2083_v27 }
 0x2f4   : > { %1775 = vmatpush3.msra.mxu1 %v2083_v27 }
 0x2f5   : > { %1776 = vmatprep.subr.mxu1 %v2078_v26 }
 0x2f6   : > { %1777 = vmatpush3.msra.mxu1 %v2078_v26 }
 0x2f7   : > { %1778 = vmatprep.subr.mxu1 %v2073_v25 }
 0x2f8   : > { %1779 = vmatpush3.msra.mxu1 %v2073_v25 }
 0x2f9   : > { %1780 = vmatprep.subr.mxu1 %v2068_v24 }
 0x2fa   : > { %1781 = vmatpush3.msra.mxu1 %v2068_v24  ;;  %v1095_v24 = vmul.f32 %v2478_v11, %v2478_v11 }
 0x2fb   : > { %1782 = vmatprep.subr.mxu1 %v2063_v23 }
 0x2fc   : > { %1783 = vmatpush3.msra.mxu1 %v2063_v23  ;;  %v1096_v28 = vsub.f32 %v880_v12, %v1095_v24  ;;  %v1229_v12 = vsub.f32 %v2133_v46, %v1228_v1  ;;  %v1232_v24 = vsub.f32 %v2139_v53, %v1228_v1 }
 0x2fd   : > { %1784 = vmatprep.subr.mxu1 %v2058_v22 }
 0x2fe   : > { %1785 = vmatpush3.msra.mxu1 %v2058_v22  ;;  %v1097_v33 = vadd.f32 1e-05, %v1096_v28 }
 0x2ff   : > { %1786 = vmatprep.subr.mxu1 %v2053_v21 }
 0x300   : > { %1787 = vmatpush3.msra.mxu1 %v2053_v21 }
 0x301   : > { %1789 = vmatmul.mubr.f32.vlgmr.msra.gmra.mxu1 %v2137_v52  ;;  %v951_v26 = vpop.f32.mrf.mxu0  ;;  %v1384_v52 = vld [vmem:[%s2559_s5] ss:$0 sm:$0xff] }
 0x302   : > { %1791 = vmatprep.mubr.f32.mxu1 %v2135_v47 }
 0x303   : > { %v1685_v25 = vpop.f32.mrf.mxu0 }
 0x305   : > { %1792 = vmatmul.mubr.f32.gmra.mxu1 %v2139_v53 }
 0x3a1   : > { %v1021_v23 = vpop.f32.mrf.mxu1  ;;  %v1091_v27 = vpop.f32.mrf.mxu0 }
 0x3a2   : > { %v1101_v22 = vmul.f32 %v1021_v23, %v2478_v11  ;;  %v1098_v29 = vmul.f32 %v1021_v23, %v1021_v23  ;;  %v1246_v6 = vrot.slane %v1021_v23, %v1227_v54  ;;  %v1231_v11 = vsub.f32 %v2135_v47, %v1228_v1 }
 0x3a3   : > { %v1720_v30 = vpop.f32.mrf.mxu1  ;;  %v1755_v31 = vpop.f32.mrf.mxu0 }
 0x3a4   : > { %v1102_v21 = vsub.f32 %v951_v26, %v1101_v22  ;;  %v1099_v32 = vsub.f32 %v1091_v27, %v1098_v29 }
 0x3a6   : > { %v1100_v34 = vadd.f32 1e-05, %v1099_v32  ;;  %v1104_v35 = vmul.f32 %v1102_v21, %v1102_v21  ;;  %v1130_v55 = vsub.f32 0.0, %v1102_v21 }
 0x3a8   : > { %v1103_v36 = vmul.f32 %v1100_v34, %v1097_v33  ;;  %v1113_v37 = vadd.f32 %v1100_v34, %v1097_v33 }
 0x3aa   : > { %v1105_v15 = vsub.f32 %v1103_v36, %v1104_v35 }
 0x3ac   : > { %1891 = vrsqrt.f32 %v1105_v15  ;;  %vm1108_vm1 = vcmp.eq.f32.partialorder %v1105_v15, inf  ;;  %v1111_v18 = vand.u32 2147483648, %v1105_v15  ;;  %vm1110_vm2 = vcmp.eq.f32.partialorder %v1105_v15, 0.0 }
 0x3b9   : > { %v1892_v16 = vpop.eup %1891 }
 0x3ba   : > { %v1107_v17 = vmul.f32 %v1892_v16, %v1105_v15 }
 0x3bc   : > { %v1109_v19 = vsel %vm1108_vm1, %v1105_v15, %v1107_v17 }
 0x3bd   : > { %v1112_v20 = vsel %vm1110_vm2, %v1111_v18, %v1109_v19 }
 0x3be   : > { %v1114_v38 = vmul.f32 2.0, %v1112_v20  ;;  %v1126_v56 = vadd.f32 %v1112_v20, %v1100_v34  ;;  %v1128_v57 = vadd.f32 %v1112_v20, %v1097_v33 }
 0x3c0   : > { %v1115_v39 = vadd.f32 %v1114_v38, %v1113_v37 }
 0x3c1   : > { %v1790_v49 = vpop.f32.mrf.mxu1 }
 0x3c2   : > { %1893 = vrsqrt.f32 %v1115_v39  ;;  %vm1118_vm3 = vcmp.eq.f32.partialorder %v1115_v39, inf  ;;  %v1121_v42 = vand.u32 2147483648, %v1115_v39  ;;  %vm1120_vm4 = vcmp.eq.f32.partialorder %v1115_v39, 0.0 }
 0x3c3   : > { %v1206_v51 = vpop.f32.mrf.mxu1  ;;  %v1248_v14 = vsub.f32 %v1790_v49, %v1246_v6 }
 0x3c4   : > { %v1247_v25 = vsub.f32 %v1206_v51, %v1246_v6 }
 0x3c5   : > { %v1793_v0 = vpop.f32.mrf.mxu1 }
 0x3c6   : > { %v1250_v27 = vsub.f32 %v1793_v0, %v1246_v6 }
 0x3c7   : > { %v1216_v9 = vpop.f32.mrf.mxu1 }
 0x3c8   : > { %v1249_v28 = vsub.f32 %v1216_v9, %v1246_v6 }
 0x3cf   : > { %v1894_v40 = vpop.eup %1893 }
 0x3d0   : > { %v1117_v41 = vmul.f32 %v1894_v40, %v1115_v39 }
 0x3d2   : > { %v1119_v43 = vsel %vm1118_vm3, %v1115_v39, %v1117_v41 }
 0x3d3   : > { %v1122_v44 = vsel %vm1120_vm4, %v1121_v42, %v1119_v43 }
 0x3d4   : > { %v1123_v45 = vmul.f32 %v1122_v44, %v1112_v20 }
 0x3d6   : > { %1895 = vrcp.f32 %v1123_v45 }
 0x3e3   : > { %v1896_v58 = vpop.eup %1895 }
 0x3e4   : > { %v1127_v61 = vmul.f32 %v1896_v58, %v1126_v56  ;;  %v1129_v62 = vmul.f32 %v1896_v58, %v1128_v57  ;;  %v1131_v63 = vmul.f32 %v1896_v58, %v1130_v55 }
 0x3e6   : > { %v1133_v2 = vmul.f32 %v1132_v59, %v1127_v61  ;;  %v1135_v3 = vmul.f32 %v1134_v60, %v1131_v63  ;;  %v1137_v4 = vmul.f32 %v1132_v59, %v1131_v63  ;;  %v1138_v5 = vmul.f32 %v1134_v60, %v1129_v62 }
 0x3e8   : > { %v1136_v7 = vadd.f32 %v1135_v3, %v1133_v2  ;;  %v1139_v8 = vadd.f32 %v1138_v5, %v1137_v4 }
 0x3ea   : > { %v1237_v13 = vrot.slane %v1136_v7, %v1227_v54  ;;  %v1255_v26 = vrot.slane %v1139_v8, %v1227_v54 }
 0x3ec   : > { %v1240_v22 = vmul.f32 %v1237_v13, %v1230_v10  ;;  %v1258_v29 = vmul.f32 %v1255_v26, %v1248_v14  ;;  %v1239_v23 = vmul.f32 %v1237_v13, %v1229_v12  ;;  %v1257_v30 = vmul.f32 %v1255_v26, %v1247_v25 }
 0x3ed   : > { %v1242_v31 = vmul.f32 %v1237_v13, %v1232_v24  ;;  %v1260_v46 = vmul.f32 %v1255_v26, %v1250_v27  ;;  %v1241_v21 = vmul.f32 %v1237_v13, %v1231_v11  ;;  %v1259_v32 = vmul.f32 %v1255_v26, %v1249_v28 }
 0x3ee   : > { %v1262_v33 = vadd.f32 %v1258_v29, %v1240_v22  ;;  %v1261_v34 = vadd.f32 %v1257_v30, %v1239_v23 }
 0x3ef   : > { %v1264_v35 = vadd.f32 %v1260_v46, %v1242_v31  ;;  %v1263_v53 = vadd.f32 %v1259_v32, %v1241_v21 }
 0x3f0   : > { %v1273_v36 = vadd.f32 %v1384_v52, %v1262_v33  ;;  %v1272_v15 = vadd.f32 %v1384_v52, %v1261_v34 }
 0x3f1   : > { %v1275_v47 = vadd.f32 %v1384_v52, %v1264_v35  ;;  %v1274_v16 = vadd.f32 %v1384_v52, %v1263_v53 }
 0x3f2   : > { %v1277_v17 = vmax.f32 %v1273_v36, 0.0  ;;  %v1276_v18 = vmax.f32 %v1272_v15, 0.0 }
 0x3f3   : > { %v1279_v19 = vmax.f32 %v1275_v47, 0.0  ;;  %v1278_v20 = vmax.f32 %v1274_v16, 0.0 }
 0x3f4   : > { %1281 = vst [vmem:[%s2562_s8 + $0x8] sm:$0xff] %v1277_v17  ;;  %1280 = vst [vmem:[%s2562_s8] sm:$0xff] %v1276_v18 }
 0x3f5   : > { %1283 = vst [vmem:[%s2562_s8 + $0x18] sm:$0xff] %v1279_v19  ;;  %1282 = vst [vmem:[%s2562_s8 + $0x10] sm:$0xff] %v1278_v20 }
 0x3f6 PF: > { %s18_s29 = sadd.s32 1, %s1919_s29   ;;  %s2563_s27 = smov %s1915_s28 }
 0x3f7   : > { %p15_p7 = scmp.ge.s32.totalorder %s18_s29, 4   ;;  %s2564_s28 = smov %s2566_s30 }
 0x3f9   :  { %17 = sbr.rel (!%p15_p7) target bundleno = 2 (0x2), region = 94 }

// kernel: tgru_block.2
= control target key start
LH: loop header
LB: loop body
LE: loop exit
PB: predicated region body
PF: predicated region fallthrough
CT: control target
= control target key end

     0   :  { %s3399_s18 = smov 0   ;;  %s3401_s19 = smov 0   ;;  %s4081_s0 = inlined_call_operand.vmem [shape: bf16[8,32,8], index: 0, kind: input, shape index: {}]   ;;  %s4082_s1 = inlined_call_operand.vmem [shape: bf16[3,8,32], index: 1, kind: input, shape index: {}]   ;;  %s4083_s2 = inlined_call_operand.vmem [shape: bf16[3,32,32], index: 2, kind: input, shape index: {}]   ;;  %s4084_s3 = inlined_call_operand.vmem [shape: f32[3,1,32], index: 3, kind: input, shape index: {}]   ;;  %s4085_s4 = inlined_call_operand.vmem [shape: f32[3,1,32], index: 4, kind: input, shape index: {}]   ;;  %s4086_s5 = inlined_call_operand.vmem [shape: bf16[8,32,32], index: 5, kind: output, shape index: {}]  }
   0x1   :  { %s3403_s20 = smov 0   ;;  %s3405_s21 = smov 0  }
   0x2   :  { %s3407_s22 = smov 0  }
   0x3 LB: > { %s27_s23 = sadd.s32 1, %s3361_s21  ;;  %s2577_s24 = sadd.s32 4294967295, %s3365_s22   ;;  %s3365_s22 = sphi %s3407_s22, %s15_s22   ;;  %s3361_s21 = sphi %s3405_s21, %s4091_s21   ;;  %s3357_s20 = sphi %s3403_s20, %s4090_s20   ;;  %s3353_s19 = sphi %s3401_s19, %s4089_s19   ;;  %s3349_s18 = sphi %s3399_s18, %s4088_s18  }
   0x4   : > { %p29_p0 = scmp.ge.s32.totalorder %s27_s23, 2  ;;  %p43_p1 = scmp.ne.s32.totalorder %s3353_s19, %s3349_s18 }
   0x5   : > { %p44_p2 = scmp.eq.s32.totalorder %s3365_s22, 0  ;;  %p159_p4 = scmp.eq.s32.totalorder %s2577_s24, 1 }
   0x6   : > { %s4093_s23 = smov (%p29_p0, %s27_s23), 0  ;;  %s36_s26 = sadd.s32 1, %s3353_s19 }
   0x7   : > { %p45_p3 = por %p44_p2, %p43_p1  ;;  %s32_s25 = ssub.s32 %s3361_s21, %s4093_s23 }
   0x8   : > { %p34_p5 = scmp.eq.s32.totalorder %s32_s25, 0  ;;  %p3434_p6 = por %p159_p4, %p43_p1 }
   0x9   : > { %p2580_p7 = scmp.ge.s32.totalorder %s3365_s22, 2 }
   0xa   : > { %s3439_s28 = scalar_select %p34_p5, %s3353_s19, %s36_s26  }
   0xb   : > { %193 = sbr.rel (%p2580_p7) target bundleno = 24 (0x18), region = 32 }
  0x10   : > { %196 = sbr.rel (!%p45_p3) target bundleno = 24 (0x18), region = 36  ;;  %s198_s29 = sand.u32 (%p45_p3), 1, %s3353_s19  }
  0x11   : > { %s2736_s30 = sshll.u32 (%p45_p3), %s3361_s21, 3  ;;  %s2581_s6 = sshll.u32 (%p45_p3), %s198_s29, 6 }
  0x12   : > { %s206_s9 = scalar_lea.vmem (%p45_p3), %s4081_s0, %s2736_s30  ;;  %s200_s10 = scalar_lea.vmem (%p45_p3), [#allocation6], %s2581_s6 }
  0x13   : > { %v223_v0 = vld [vmem:[%s206_s9] sm:$0xff] (%p45_p3)   ;;  %v227_v1 = vld [vmem:[%s206_s9 + $0x10] sm:$0xff] (%p45_p3)  }
  0x14   : > { %v231_v2 = vld [vmem:[%s206_s9 + $0x20] sm:$0xff] (%p45_p3)   ;;  %224 = vst [vmem:[%s200_s10] sm:$0xff] (%p45_p3), %v223_v0   ;;  %228 = vst [vmem:[%s200_s10 + $0x8] sm:$0xff] (%p45_p3), %v227_v1   ;;  %v235_v3 = vld [vmem:[%s206_s9 + $0x30] sm:$0xff] (%p45_p3)  }
  0x15   : > { %232 = vst [vmem:[%s200_s10 + $0x10] sm:$0xff] %v231_v2   ;;  %v239_v4 = vld [vmem:[%s206_s9 + $0x40] sm:$0xff]   ;;  %v243_v5 = vld [vmem:[%s206_s9 + $0x50] sm:$0xff]   ;;  %236 = vst [vmem:[%s200_s10 + $0x18] sm:$0xff] %v235_v3  }
  0x16   : > { %240 = vst [vmem:[%s200_s10 + $0x20] sm:$0xff] %v239_v4   ;;  %244 = vst [vmem:[%s200_s10 + $0x28] sm:$0xff] %v243_v5   ;;  %v247_v6 = vld [vmem:[%s206_s9 + $0x60] sm:$0xff]   ;;  %v251_v7 = vld [vmem:[%s206_s9 + $0x70] sm:$0xff]  }
  0x17   : > { %248 = vst [vmem:[%s200_s10 + $0x30] sm:$0xff] %v247_v6   ;;  %252 = vst [vmem:[%s200_s10 + $0x38] sm:$0xff] %v251_v7  }
  0x18 PF: > { %p2584_p8 = scmp.ge.s32.totalorder %s3365_s22, 1  ;;  %p309_p9 = scmp.lt.s32.totalorder %s3365_s22, 3 }
  0x1a   : > { %p310_p10 = pnand %p2584_p8, %p309_p9 }
  0x1b   : > { %s316_s13 = sand.u32 (!%p310_p10), 1, %s3349_s18  }
  0x1c   : > { %313 = sbr.rel (%p310_p10) target bundleno = 2135 (0x857), region = 77  ;;  %s3455_s14 = sshll.u32 (!%p310_p10), %s316_s13, 6 }
  0x1d   : > { %s3466_s25 = scalar_lea.vmem (!%p310_p10), [#allocation6], %s3455_s14  ;;  %s3718_s9 = scalar_lea.vmem (!%p310_p10), [#allocation7], %s3455_s14 }
  0x21   : > { %vm443_vm0 = vcmask 1043456   ;;  %v2604_v8 = vld [vmem:[%s4082_s1 + $0x4] sm:$0xf]  ;;  %vm418_vm1 = vcmask 64512   ;;  %v3460_v10 = vld [vmem:[%s4083_s2 + $0x8] sm:$0xff]   ;;  %v3144_v12 = vld [vmem:[%s3466_s25] sm:$0xff]  }
  0x22   : > { %3100 = vmatprep.subr.msk.bf16.mxu1 %vm443_vm0, %v2604_v8  ;;  %v572_v9 = vsel %vm443_vm0, %v2604_v8, 0  ;;  %v370_v11 = vld [vmem:[%s4082_s1] sm:$0xf]  ;;  %v3367_v13 = vmov 0.0   ;;  %v3145_v15 = vld [vmem:[%s3466_s25 + $0x8] sm:$0xff]   ;;  %2873 = vmatprep.mubr.msk.bf16.mxu1 %vm418_vm1, %v3144_v12  ;;  %vm351_vm2 = vcmask 261120  }
  0x23   : > { %2872 = vmatpush3.bf16.msra.mxu1 %v572_v9  ;;  %3099 = vmatprep.subr.msk.bf16.mxu0 %vm443_vm0, %v370_v11  ;;  %v445_v14 = vsel %vm443_vm0, %v370_v11, 0  ;;  %v3147_v16 = vld [vmem:[%s3466_s25 + $0x10] sm:$0xff]   ;;  %352 = vst.msk [vmem:[#allocation2] sm:$0xff] %vm351_vm2, %v3367_v13  ;;  %353 = vst.msk [vmem:[#allocation2 + $0x8] sm:$0xff] %vm351_vm2, %v3367_v13  ;;  %v3148_v18 = vld [vmem:[%s3466_s25 + $0x18] sm:$0xff]   ;;  %vm3368_vm3 = vmmov 0  }
  0x24   : > { %2907 = vmatprep.subr.bf16.mxu1 %v3367_v13  ;;  %2854 = vmatpush3.bf16.msra.mxu0 %v445_v14  ;;  %v3486_v17 = vld [vmem:[%s4083_s2] sm:$0xff]   ;;  %v3149_v19 = vld [vmem:[%s3466_s25 + $0x20] sm:$0xff]   ;;  %v2615_v20 = vld [vmem:[%s4082_s1 + $0x8] sm:$0xf]  ;;  %vm1071_vm4 = vcmask 257024   ;;  %s2753_s10 = sshll.u32 (%p3434_p6), %s3357_s20, 3 }
  0x25   : > { %2855 = vmatprep.mubr.msk.bf16.mxu0 %vm418_vm1, %v3144_v12  ;;  %3101 = vmatprep.subr.msk.bf16.mxu0 %vm443_vm0, %v2615_v20  ;;  %v698_v21 = vsel %vm443_vm0, %v2615_v20, 0  ;;  %v3150_v22 = vld [vmem:[%s3466_s25 + $0x28] sm:$0xff]   ;;  %v3152_v23 = vld [vmem:[%s3466_s25 + $0x30] sm:$0xff]   ;;  %v3153_v24 = vld [vmem:[%s3466_s25 + $0x38] sm:$0xff]   ;;  %s2404_s13 = scalar_lea.vmem (%p3434_p6), %s4086_s5, %s2753_s10 }
  0x26   : > { %2874 = vmatmul.mubr.msk.bf16.vlgmr.msra.gmra.mxu1 %vm418_vm1, %v3145_v15  ;;  %v3526_v28 = vld [vmem:[%s4083_s2 + $0x18] sm:$0xff]   ;;  %v3533_v29 = vld [vmem:[%s4083_s2 + $0x10] sm:$0xff]   ;;  %v3546_v30 = vld [vmem:[%s4083_s2 + $0x28] sm:$0xff]  }
  0x27   : > { %2908 = vmatpush3.bf16.msra.mxu1 %v3460_v10  ;;  %2877 = vmatprep.mubr.msk.bf16.mxu1 %vm418_vm1, %v3147_v16  ;;  %v3556_v31 = vld [vmem:[%s4083_s2 + $0x20] sm:$0xff]  }
  0x28   : > { %2909 = vmatprep.subr.bf16.mxu1 %v3367_v13  ;;  %2856 = vmatmul.mubr.msk.bf16.vlgmr.msra.gmra.mxu0 %vm418_vm1, %v3145_v15  ;;  %v3580_v32 = vld [vmem:[%s4084_s3 + $0x1] ss:$0 sm:$0xff]  ;;  %v3585_v34 = vld [vmem:[%s4084_s3] ss:$0 sm:$0xff] }
  0x29   : > { %2859 = vmatprep.mubr.msk.bf16.mxu0 %vm418_vm1, %v3147_v16  ;;  %2890 = vmatpush3.bf16.msra.mxu0 %v698_v21 }
  0x2a   : > { %2939 = vmatprep.subr.bf16.mxu0 %v3367_v13  ;;  %v3515_v25 = vld [vmem:[#allocation2] sm:$0xff]  ;;  %v3517_v26 = vld [vmem:[#allocation2 + $0x8] sm:$0xff] }
  0x2b   : > { %2910 = vmatpush3.bf16.msra.mxu1 %v3486_v17  ;;  %v834_v27 = vpack.c.bf16 %v3517_v26, %v3515_v25 }
  0x2c   : > { %2915 = vmatprep.subr.bf16.mxu1 %v3367_v13 }
  0x2e   : > { %2878 = vmatmul.mubr.msk.bf16.gmra.mxu1 %vm418_vm1, %v3148_v18 }
  0x2f   : > { %2881 = vmatprep.mubr.msk.bf16.mxu1 %vm418_vm1, %v3149_v19 }
  0x30   : > { %2860 = vmatmul.mubr.msk.bf16.gmra.mxu0 %vm418_vm1, %v3148_v18 }
  0x31   : > { %2863 = vmatprep.mubr.msk.bf16.mxu0 %vm418_vm1, %v3149_v19 }
  0x36   : > { %2882 = vmatmul.mubr.msk.bf16.gmra.mxu1 %vm418_vm1, %v3150_v22 }
  0x37   : > { %2885 = vmatprep.mubr.msk.bf16.mxu1 %vm418_vm1, %v3152_v23 }
  0x38   : > { %2864 = vmatmul.mubr.msk.bf16.gmra.mxu0 %vm418_vm1, %v3150_v22 }
  0x39   : > { %2867 = vmatprep.mubr.msk.bf16.mxu0 %vm418_vm1, %v3152_v23 }
  0x3e   : > { %2886 = vmatmul.mubr.msk.bf16.gmra.mxu1 %vm418_vm1, %v3153_v24 }
  0x3f   : > { %2911 = vmatprep.mubr.msk.bf16.mxu1 %vm3368_vm3, %v3367_v13 }
  0x40   : > { %2868 = vmatmul.mubr.msk.bf16.gmra.mxu0 %vm418_vm1, %v3153_v24 }
  0x41   : > { %2891 = vmatprep.mubr.msk.bf16.mxu0 %vm418_vm1, %v3144_v12 }
  0x46   : > { %2912 = vmatmul.mubr.msk.bf16.vlgmr.msra.gmra.mxu1 %vm351_vm2, %v834_v27 }
  0x47   : > { %2916 = vmatpush3.bf16.msra.mxu1 %v3526_v28  ;;  %2919 = vmatprep.mubr.msk.bf16.mxu1 %vm3368_vm3, %v3367_v13 }
  0x48   : > { %2917 = vmatprep.subr.bf16.mxu1 %v3367_v13  ;;  %2892 = vmatmul.mubr.msk.bf16.vlgmr.msra.gmra.mxu0 %vm418_vm1, %v3145_v15 }
  0x49   : > { %2895 = vmatprep.mubr.msk.bf16.mxu0 %vm418_vm1, %v3147_v16  ;;  %2940 = vmatpush3.bf16.msra.mxu0 %v3526_v28 }
  0x4a   : > { %2941 = vmatprep.subr.bf16.mxu0 %v3367_v13 }
  0x4b   : > { %2918 = vmatpush3.bf16.msra.mxu1 %v3533_v29 }
  0x4c   : > { %2923 = vmatprep.subr.bf16.mxu1 %v3367_v13 }
  0x4d   : > { %2942 = vmatpush3.bf16.msra.mxu0 %v3533_v29 }
  0x4e   : > { %2920 = vmatmul.mubr.msk.bf16.vlgmr.msra.gmra.mxu1 %vm351_vm2, %v834_v27  ;;  %2955 = vmatprep.subr.bf16.mxu0 %v3367_v13 }
  0x4f   : > { %2924 = vmatpush3.bf16.msra.mxu1 %v3546_v30  ;;  %2927 = vmatprep.mubr.msk.bf16.mxu1 %vm3368_vm3, %v3367_v13 }
  0x50   : > { %2925 = vmatprep.subr.bf16.mxu1 %v3367_v13  ;;  %2896 = vmatmul.mubr.msk.bf16.gmra.mxu0 %vm418_vm1, %v3148_v18 }
  0x51   : > { %2899 = vmatprep.mubr.msk.bf16.mxu0 %vm418_vm1, %v3149_v19 }
  0x53   : > { %2926 = vmatpush3.bf16.msra.mxu1 %v3556_v31 }
  0x54   : > { %2931 = vmatprep.subr.bf16.mxu1 %v3367_v13 }
  0x56   : > { %2928 = vmatmul.mubr.msk.bf16.vlgmr.msra.gmra.mxu1 %vm351_vm2, %v834_v27 }
  0x57   : > { %2932 = vmatpush3.bf16.msra.mxu1 %v3460_v10  ;;  %2935 = vmatprep.mubr.msk.bf16.mxu1 %vm3368_vm3, %v3367_v13 }
  0x58   : > { %2900 = vmatmul.mubr.msk.bf16.gmra.mxu0 %vm418_vm1, %v3150_v22  ;;  %2933 = vmatprep.subr.bf16.mxu1 %v3367_v13 }
  0x59   : > { %2903 = vmatprep.mubr.msk.bf16.mxu0 %vm418_vm1, %v3152_v23 }
  0x5b   : > { %2934 = vmatpush3.bf16.msra.mxu1 %v3486_v17 }
  0x5c   : > { %2947 = vmatprep.subr.bf16.mxu1 %v3367_v13 }
  0x60   : > { %2904 = vmatmul.mubr.msk.bf16.gmra.mxu0 %vm418_vm1, %v3153_v24 }
  0x61   : > { %2943 = vmatprep.mubr.msk.bf16.mxu0 %vm3368_vm3, %v3367_v13 }
  0xe6   : > { %v2875_v33 = vpop.f32.mrf.mxu1 }
  0xe7   : > { %v617_v35 = vadd.f32 %v2875_v33, %v3580_v32 }
  0xe8   : > { %v608_v36 = vpop.f32.mrf.mxu1  ;;  %v2857_v37 = vpop.f32.mrf.mxu0 }
  0xe9   : > { %673 = vst.msk [vmem:[#allocation4 + $0x10] sm:$0xff] %vm351_vm2, %v617_v35  ;;  %v609_v38 = vadd.f32 %v3580_v32, %v608_v36  ;;  %v490_v39 = vadd.f32 %v2857_v37, %v3585_v34 }
  0xea   : > { %v2876_v40 = vpop.f32.mrf.mxu1  ;;  %v481_v41 = vpop.f32.mrf.mxu0 }
  0xeb   : > { %671 = vst.msk [vmem:[#allocation4] sm:$0xff] %vm351_vm2, %v609_v38  ;;  %v620_v42 = vadd.f32 %v2876_v40, %v3580_v32  ;;  %547 = vst.msk [vmem:[#allocation3 + $0x10] sm:$0xff] %vm351_vm2, %v490_v39  ;;  %v482_v43 = vadd.f32 %v3585_v34, %v481_v41  ;;  %v3646_v40 = vld [vmem:[%s4085_s4] ss:$0 sm:$0xff] }
  0xec   : > { %v611_v44 = vpop.f32.mrf.mxu1  ;;  %v2858_v45 = vpop.f32.mrf.mxu0 }
  0xed   : > { %674 = vst.msk [vmem:[#allocation4 + $0x18] sm:$0xff] %vm351_vm2, %v620_v42  ;;  %v612_v46 = vadd.f32 %v3580_v32, %v611_v44  ;;  %545 = vst.msk [vmem:[#allocation3] sm:$0xff] %vm351_vm2, %v482_v43  ;;  %v493_v47 = vadd.f32 %v2858_v45, %v3585_v34 }
  0xee   : > { %v2879_v48 = vpop.f32.mrf.mxu1  ;;  %v484_v49 = vpop.f32.mrf.mxu0 }
  0xef   : > { %672 = vst.msk [vmem:[#allocation4 + $0x8] sm:$0xff] %vm351_vm2, %v612_v46  ;;  %v633_v50 = vadd.f32 %v2879_v48, %v3580_v32  ;;  %548 = vst.msk [vmem:[#allocation3 + $0x18] sm:$0xff] %vm351_vm2, %v493_v47  ;;  %v485_v51 = vadd.f32 %v3585_v34, %v484_v49  ;;  %v3655_v46 = vld [vmem:[%s4084_s3 + $0x2] ss:$0 sm:$0xff] }
  0xf0   : > { %v624_v52 = vpop.f32.mrf.mxu1  ;;  %v2861_v53 = vpop.f32.mrf.mxu0 }
  0xf1   : > { %677 = vst.msk [vmem:[#allocation4 + $0x30] sm:$0xff] %vm351_vm2, %v633_v50  ;;  %v625_v54 = vadd.f32 %v3580_v32, %v624_v52  ;;  %546 = vst.msk [vmem:[#allocation3 + $0x8] sm:$0xff] %vm351_vm2, %v485_v51  ;;  %v506_v55 = vadd.f32 %v2861_v53, %v3585_v34 }
  0xf2   : > { %v2880_v56 = vpop.f32.mrf.mxu1  ;;  %v497_v57 = vpop.f32.mrf.mxu0 }
  0xf3   : > { %675 = vst.msk [vmem:[#allocation4 + $0x20] sm:$0xff] %vm351_vm2, %v625_v54  ;;  %v636_v58 = vadd.f32 %v2880_v56, %v3580_v32  ;;  %551 = vst.msk [vmem:[#allocation3 + $0x30] sm:$0xff] %vm351_vm2, %v506_v55  ;;  %v498_v59 = vadd.f32 %v3585_v34, %v497_v57 }
  0xf4   : > { %v627_v60 = vpop.f32.mrf.mxu1  ;;  %v2862_v61 = vpop.f32.mrf.mxu0 }
  0xf5   : > { %678 = vst.msk [vmem:[#allocation4 + $0x38] sm:$0xff] %vm351_vm2, %v636_v58  ;;  %v628_v62 = vadd.f32 %v3580_v32, %v627_v60  ;;  %549 = vst.msk [vmem:[#allocation3 + $0x20] sm:$0xff] %vm351_vm2, %v498_v59  ;;  %v509_v63 = vadd.f32 %v2862_v61, %v3585_v34 }
  0xf6   : > { %v2883_v0 = vpop.f32.mrf.mxu1  ;;  %v500_v1 = vpop.f32.mrf.mxu0 }
  0xf7   : > { %676 = vst.msk [vmem:[#allocation4 + $0x28] sm:$0xff] %vm351_vm2, %v628_v62  ;;  %v649_v2 = vadd.f32 %v2883_v0, %v3580_v32  ;;  %552 = vst.msk [vmem:[#allocation3 + $0x38] sm:$0xff] %vm351_vm2, %v509_v63  ;;  %v501_v3 = vadd.f32 %v3585_v34, %v500_v1 }
  0xf8   : > { %v640_v4 = vpop.f32.mrf.mxu1  ;;  %v2865_v5 = vpop.f32.mrf.mxu0  ;;  %v1016_v58 = vld [vmem:[#allocation3 + $0x8] sm:$0xff] }
  0xf9   : > { %681 = vst.msk [vmem:[#allocation4 + $0x50] sm:$0xff] %vm351_vm2, %v649_v2  ;;  %v641_v6 = vadd.f32 %v3580_v32, %v640_v4  ;;  %550 = vst.msk [vmem:[#allocation3 + $0x28] sm:$0xff] %vm351_vm2, %v501_v3  ;;  %v522_v7 = vadd.f32 %v2865_v5, %v3585_v34  ;;  %v1017_v4 = vld [vmem:[#allocation4] sm:$0xff] }
  0xfa   : > { %v2884_v8 = vpop.f32.mrf.mxu1  ;;  %v513_v9 = vpop.f32.mrf.mxu0 }
  0xfb   : > { %679 = vst.msk [vmem:[#allocation4 + $0x40] sm:$0xff] %vm351_vm2, %v641_v6  ;;  %v652_v11 = vadd.f32 %v2884_v8, %v3580_v32  ;;  %555 = vst.msk [vmem:[#allocation3 + $0x50] sm:$0xff] %vm351_vm2, %v522_v7  ;;  %v514_v12 = vadd.f32 %v3585_v34, %v513_v9 }
  0xfc   : > { %v643_v14 = vpop.f32.mrf.mxu1  ;;  %v2866_v15 = vpop.f32.mrf.mxu0 }
  0xfd   : > { %682 = vst.msk [vmem:[#allocation4 + $0x58] sm:$0xff] %vm351_vm2, %v652_v11  ;;  %v644_v16 = vadd.f32 %v3580_v32, %v643_v14  ;;  %553 = vst.msk [vmem:[#allocation3 + $0x40] sm:$0xff] %vm351_vm2, %v514_v12  ;;  %v525_v18 = vadd.f32 %v2866_v15, %v3585_v34 }
  0xfe   : > { %v2887_v19 = vpop.f32.mrf.mxu1  ;;  %v516_v20 = vpop.f32.mrf.mxu0 }
  0xff   : > { %680 = vst.msk [vmem:[#allocation4 + $0x48] sm:$0xff] %vm351_vm2, %v644_v16  ;;  %v665_v21 = vadd.f32 %v2887_v19, %v3580_v32  ;;  %556 = vst.msk [vmem:[#allocation3 + $0x58] sm:$0xff] %vm351_vm2, %v525_v18  ;;  %v517_v22 = vadd.f32 %v3585_v34, %v516_v20  ;;  %v1018_v16 = vld [vmem:[#allocation4 + $0x8] sm:$0xff] }
 0x100   : > { %v656_v23 = vpop.f32.mrf.mxu1  ;;  %v2869_v24 = vpop.f32.mrf.mxu0 }
 0x101   : > { %685 = vst.msk [vmem:[#allocation4 + $0x70] sm:$0xff] %vm351_vm2, %v665_v21  ;;  %v657_v27 = vadd.f32 %v3580_v32, %v656_v23  ;;  %554 = vst.msk [vmem:[#allocation3 + $0x48] sm:$0xff] %vm351_vm2, %v517_v22  ;;  %v538_v33 = vadd.f32 %v2869_v24, %v3585_v34 }
 0x102   : > { %v2888_v35 = vpop.f32.mrf.mxu1  ;;  %v529_v36 = vpop.f32.mrf.mxu0 }
 0x103   : > { %683 = vst.msk [vmem:[#allocation4 + $0x60] sm:$0xff] %vm351_vm2, %v657_v27  ;;  %v668_v37 = vadd.f32 %v2888_v35, %v3580_v32  ;;  %559 = vst.msk [vmem:[#allocation3 + $0x70] sm:$0xff] %vm351_vm2, %v538_v33  ;;  %v530_v38 = vadd.f32 %v3585_v34, %v529_v36 }
 0x104   : > { %v659_v39 = vpop.f32.mrf.mxu1  ;;  %v2870_v41 = vpop.f32.mrf.mxu0 }
 0x105   : > { %686 = vst.msk [vmem:[#allocation4 + $0x78] sm:$0xff] %vm351_vm2, %v668_v37  ;;  %v660_v42 = vadd.f32 %v3580_v32, %v659_v39  ;;  %557 = vst.msk [vmem:[#allocation3 + $0x60] sm:$0xff] %vm351_vm2, %v530_v38  ;;  %v541_v43 = vadd.f32 %v2870_v41, %v3585_v34  ;;  %v1015_v32 = vld [vmem:[#allocation3] sm:$0xff] }
 0x106   : > { %v890_v44 = vpop.f32.mrf.mxu1  ;;  %v532_v45 = vpop.f32.mrf.mxu0 }
 0x107   : > { %684 = vst.msk [vmem:[#allocation4 + $0x68] sm:$0xff] %vm351_vm2, %v660_v42  ;;  %v891_v47 = vadd.f32 %v3646_v40, %v890_v44  ;;  %560 = vst.msk [vmem:[#allocation3 + $0x78] sm:$0xff] %vm351_vm2, %v541_v43  ;;  %v533_v48 = vadd.f32 %v3585_v34, %v532_v45  ;;  %v3669_v34 = vld [vmem:[%s4085_s4 + $0x1] ss:$0 sm:$0xff] }
 0x108   : > { %v2913_v49 = vpop.f32.mrf.mxu1  ;;  %v2893_v50 = vpop.f32.mrf.mxu0 }
 0x109   : > { %v1021_v51 = vadd.f32 %v1015_v32, %v891_v47  ;;  %558 = vst.msk [vmem:[#allocation3 + $0x68] sm:$0xff] %vm351_vm2, %v533_v48  ;;  %v743_v52 = vadd.f32 %v2893_v50, %v3655_v46 }
 0x10a   : > { %v893_v53 = vpop.f32.mrf.mxu1  ;;  %v734_v54 = vpop.f32.mrf.mxu0 }
 0x10b   : > { %v2648_v55 = vmul.f32 -1.442695, %v1021_v51  ;;  %v894_v56 = vadd.f32 %v3646_v40, %v893_v53  ;;  %799 = vst.msk [vmem:[#allocation5 + $0x10] sm:$0xff] %vm351_vm2, %v743_v52  ;;  %v735_v57 = vadd.f32 %v3655_v46, %v734_v54 }
 0x10c   : > { %v2914_v59 = vpop.f32.mrf.mxu1  ;;  %v2894_v60 = vpop.f32.mrf.mxu0 }
 0x10d   : > { %3158 = vpow2.f32 %v2648_v55  ;;  %v1022_v61 = vadd.f32 %v1016_v58, %v894_v56  ;;  %797 = vst.msk [vmem:[#allocation5] sm:$0xff] %vm351_vm2, %v735_v57  ;;  %v746_v62 = vadd.f32 %v2894_v60, %v3655_v46  ;;  %v3700_v55 = vld [vmem:[%s4085_s4 + $0x2] ss:$0 sm:$0xff] }
 0x10e   : > { %v949_v63 = vpop.f32.mrf.mxu1  ;;  %v737_v0 = vpop.f32.mrf.mxu0 }
 0x10f   : > { %v2649_v1 = vmul.f32 -1.442695, %v1022_v61  ;;  %v950_v2 = vadd.f32 %v3669_v34, %v949_v63  ;;  %800 = vst.msk [vmem:[#allocation5 + $0x18] sm:$0xff] %vm351_vm2, %v746_v62  ;;  %v738_v3 = vadd.f32 %v3655_v46, %v737_v0 }
 0x110   : > { %v2921_v5 = vpop.f32.mrf.mxu1  ;;  %v2897_v6 = vpop.f32.mrf.mxu0 }
 0x111   : > { %3160 = vpow2.f32 %v2649_v1  ;;  %v1035_v7 = vadd.f32 %v1017_v4, %v950_v2  ;;  %798 = vst.msk [vmem:[#allocation5 + $0x8] sm:$0xff] %vm351_vm2, %v738_v3  ;;  %v759_v8 = vadd.f32 %v2897_v6, %v3655_v46 }
 0x112   : > { %v952_v9 = vpop.f32.mrf.mxu1  ;;  %v750_v11 = vpop.f32.mrf.mxu0 }
 0x113   : > { %v2650_v12 = vmul.f32 -1.442695, %v1035_v7  ;;  %v953_v14 = vadd.f32 %v3669_v34, %v952_v9  ;;  %803 = vst.msk [vmem:[#allocation5 + $0x30] sm:$0xff] %vm351_vm2, %v759_v8  ;;  %v751_v15 = vadd.f32 %v3655_v46, %v750_v11 }
 0x114   : > { %v2922_v18 = vpop.f32.mrf.mxu1  ;;  %v2898_v19 = vpop.f32.mrf.mxu0  ;;  %v1019_v2 = vld [vmem:[#allocation5] sm:$0xff] }
 0x115   : > { %v1036_v20 = vadd.f32 %v1018_v16, %v953_v14  ;;  %801 = vst.msk [vmem:[#allocation5 + $0x20] sm:$0xff] %vm351_vm2, %v751_v15  ;;  %v762_v21 = vadd.f32 %v2898_v19, %v3655_v46  ;;  %3162 = vpow2.f32 %v2650_v12 }
 0x116   : > { %v1008_v22 = vpop.f32.mrf.mxu1  ;;  %v753_v23 = vpop.f32.mrf.mxu0 }
 0x117   : > { %v2651_v24 = vmul.f32 -1.442695, %v1036_v20  ;;  %804 = vst.msk [vmem:[#allocation5 + $0x38] sm:$0xff] %vm351_vm2, %v762_v21  ;;  %v754_v27 = vadd.f32 %v3655_v46, %v753_v23  ;;  %v1009_v61 = vadd.f32 %v3700_v55, %v1008_v22 }
 0x118   : > { %v2929_v33 = vpop.f32.mrf.mxu1  ;;  %v2901_v35 = vpop.f32.mrf.mxu0  ;;  %v1020_v7 = vld [vmem:[#allocation5 + $0x8] sm:$0xff] }
 0x119   : > { %802 = vst.msk [vmem:[#allocation5 + $0x28] sm:$0xff] %vm351_vm2, %v754_v27  ;;  %v775_v36 = vadd.f32 %v2901_v35, %v3655_v46  ;;  %3164 = vpow2.f32 %v2651_v24  ;;  %v1201_v35 = vld [vmem:[#allocation3 + $0x10] sm:$0xff] }
 0x11a   : > { %v3159_v37 = vpop.eup %3158  ;;  %v1011_v38 = vpop.f32.mrf.mxu1 }
 0x11b   : > { %v766_v39 = vpop.f32.mrf.mxu0  ;;  %v1029_v41 = vadd.f32 1.0, %v3159_v37  ;;  %807 = vst.msk [vmem:[#allocation5 + $0x50] sm:$0xff] %vm351_vm2, %v775_v36  ;;  %v1012_v4 = vadd.f32 %v3700_v55, %v1011_v38 }
 0x11c   : > { %v767_v42 = vadd.f32 %v3655_v46, %v766_v39  ;;  %v2930_v43 = vpop.f32.mrf.mxu1 }
 0x11d   : > { %v2902_v44 = vpop.f32.mrf.mxu0  ;;  %3166 = vrcp.f32 %v1029_v41 }
 0x11e   : > { %805 = vst.msk [vmem:[#allocation5 + $0x40] sm:$0xff] %vm351_vm2, %v767_v42  ;;  %v778_v45 = vadd.f32 %v2902_v44, %v3655_v46  ;;  %v3161_v47 = vpop.eup %3160 }
 0x11f   : > { %v769_v48 = vpop.f32.mrf.mxu0  ;;  %v1030_v32 = vadd.f32 1.0, %v3161_v47 }
 0x120   : > { %808 = vst.msk [vmem:[#allocation5 + $0x58] sm:$0xff] %vm351_vm2, %v778_v45  ;;  %v770_v49 = vadd.f32 %v3655_v46, %v769_v48  ;;  %v1202_v45 = vld [vmem:[#allocation3 + $0x18] sm:$0xff] }
 0x121   : > { %v2905_v50 = vpop.f32.mrf.mxu0  ;;  %3168 = vrcp.f32 %v1030_v32 }
 0x122   : > { %806 = vst.msk [vmem:[#allocation5 + $0x48] sm:$0xff] %vm351_vm2, %v770_v49  ;;  %v791_v51 = vadd.f32 %v2905_v50, %v3655_v46  ;;  %v3163_v54 = vpop.eup %3162  ;;  %v1204_v49 = vld [vmem:[#allocation4 + $0x10] sm:$0xff] }
 0x123   : > { %v782_v52 = vpop.f32.mrf.mxu0  ;;  %v1043_v60 = vadd.f32 1.0, %v3163_v54 }
 0x124   : > { %811 = vst.msk [vmem:[#allocation5 + $0x70] sm:$0xff] %vm351_vm2, %v791_v51  ;;  %v783_v53 = vadd.f32 %v3655_v46, %v782_v52 }
 0x125   : > { %v2906_v56 = vpop.f32.mrf.mxu0  ;;  %3170 = vrcp.f32 %v1043_v60 }
 0x126   : > { %809 = vst.msk [vmem:[#allocation5 + $0x60] sm:$0xff] %vm351_vm2, %v783_v53  ;;  %v794_v57 = vadd.f32 %v2906_v56, %v3655_v46  ;;  %v3165_v59 = vpop.eup %3164  ;;  %v1205_v56 = vld [vmem:[#allocation4 + $0x18] sm:$0xff] }
 0x127   : > { %v785_v58 = vpop.f32.mrf.mxu0  ;;  %v1044_v0 = vadd.f32 1.0, %v3165_v59 }
 0x128   : > { %812 = vst.msk [vmem:[#allocation5 + $0x78] sm:$0xff] %vm351_vm2, %v794_v57  ;;  %v786_v62 = vadd.f32 %v3655_v46, %v785_v58 }
 0x129   : > { %3172 = vrcp.f32 %v1044_v0 }
 0x12a   : > { %810 = vst.msk [vmem:[#allocation5 + $0x68] sm:$0xff] %vm351_vm2, %v786_v62  ;;  %v3167_v63 = vpop.eup %3166 }
 0x12b   : > { %v1049_v1 = vmul.f32 %v3167_v63, %v1009_v61 }
 0x12d   : > { %v1051_v3 = vadd.f32 %v1049_v1, %v1019_v2 }
 0x12e   : > { %v3169_v5 = vpop.eup %3168 }
 0x12f   : > { %3174 = vtanh.f32 %v1051_v3  ;;  %v1050_v6 = vmul.f32 %v3169_v5, %v1012_v4 }
 0x131   : > { %v1052_v8 = vadd.f32 %v1050_v6, %v1020_v7 }
 0x132   : > { %v3171_v9 = vpop.eup %3170 }
 0x133   : > { %3176 = vtanh.f32 %v1052_v8  ;;  %v1055_v11 = vsub.f32 1.0, %v3171_v9  ;;  %v1059_v15 = vmul.f32 %v3171_v9, %v3515_v25  ;;  %v1207_v9 = vld [vmem:[#allocation5 + $0x10] sm:$0xff] }
 0x136   : > { %v3173_v46 = vpop.eup %3172 }
 0x137   : > { %v1056_v16 = vsub.f32 1.0, %v3173_v46  ;;  %v1060_v21 = vmul.f32 %v3173_v46, %v3517_v26 }
 0x13c   : > { %v3175_v12 = vpop.eup %3174 }
 0x13d   : > { %v1057_v14 = vmul.f32 %v3175_v12, %v1055_v11 }
 0x13f   : > { %v3710_v18 = vadd.f32 %v1059_v15, %v1057_v14  ;;  %v1208_v15 = vld [vmem:[#allocation5 + $0x18] sm:$0xff] }
 0x140   : > { %v3177_v19 = vpop.eup %3176 }
 0x141   : > { %v1058_v20 = vmul.f32 %v3177_v19, %v1056_v16  ;;  %v2737_v22 = vpack.c.bf16 %v3710_v18, %v3710_v18 }
 0x143   : > { %v3715_v23 = vadd.f32 %v1060_v21, %v1058_v20  ;;  %1072 = vst.msk [vmem:[%s3718_s9] sm:$0xf] %vm1071_vm4, %v2737_v22 }
 0x145   : > { %v1063_v25 = vpack.c.bf16 %v3715_v23, %v3710_v18  ;;  %v2738_v24 = vpack.c.bf16 %v3715_v23, %v3715_v23 }
 0x147   : > { %1073 = vst.msk [vmem:[%s3718_s9 + $0x4] sm:$0xf] %vm1071_vm4, %v2738_v24  ;;  %2936 = vmatmul.mubr.msk.bf16.vlgmr.msra.gmra.mxu1 %vm351_vm2, %v1063_v25  ;;  %2944 = vmatmul.mubr.msk.bf16.vlgmr.msra.gmra.mxu0 %vm351_vm2, %v1063_v25 }
 0x148   : > { %2948 = vmatpush3.bf16.msra.mxu1 %v3546_v30  ;;  %2951 = vmatprep.mubr.msk.bf16.mxu1 %vm3368_vm3, %v3367_v13 }
 0x149   : > { %2949 = vmatprep.subr.bf16.mxu1 %v3367_v13  ;;  %2956 = vmatpush3.bf16.msra.mxu0 %v3460_v10 }
 0x14a   : > { %2957 = vmatprep.subr.bf16.mxu0 %v3367_v13  ;;  %2959 = vmatprep.mubr.msk.bf16.mxu0 %vm3368_vm3, %v3367_v13 }
 0x14c   : > { %2950 = vmatpush3.bf16.msra.mxu1 %v3556_v31 }
 0x14d   : > { %2963 = vmatprep.subr.bf16.mxu1 %v3367_v13  ;;  %2958 = vmatpush3.bf16.msra.mxu0 %v3486_v17 }
 0x14e   : > { %2971 = vmatprep.subr.bf16.mxu0 %v3367_v13 }
 0x14f   : > { %2952 = vmatmul.mubr.msk.bf16.vlgmr.msra.gmra.mxu1 %vm351_vm2, %v1063_v25 }
 0x150   : > { %2964 = vmatpush3.bf16.msra.mxu1 %v3526_v28  ;;  %2967 = vmatprep.mubr.msk.bf16.mxu1 %vm3368_vm3, %v3367_v13 }
 0x151   : > { %2965 = vmatprep.subr.bf16.mxu1 %v3367_v13 }
 0x154   : > { %2966 = vmatpush3.bf16.msra.mxu1 %v3533_v29 }
 0x155   : > { %2979 = vmatprep.subr.bf16.mxu1 %v3367_v13 }
 0x207   : > { %v1111_v26 = vpop.f32.mrf.mxu1  ;;  %v1152_v27 = vpop.f32.mrf.mxu0 }
 0x208   : > { %v1112_v33 = vadd.f32 %v3646_v40, %v1111_v26  ;;  %v1153_v43 = vadd.f32 %v3669_v34, %v1152_v27 }
 0x209   : > { %v2937_v36 = vpop.f32.mrf.mxu1  ;;  %v2945_v37 = vpop.f32.mrf.mxu0 }
 0x20a   : > { %v1209_v38 = vadd.f32 %v1201_v35, %v1112_v33  ;;  %v1223_v52 = vadd.f32 %v1204_v49, %v1153_v43 }
 0x20b   : > { %v1114_v39 = vpop.f32.mrf.mxu1  ;;  %v1155_v41 = vpop.f32.mrf.mxu0 }
 0x20c   : > { %v2657_v42 = vmul.f32 -1.442695, %v1209_v38  ;;  %v1115_v44 = vadd.f32 %v3646_v40, %v1114_v39  ;;  %v1156_v50 = vadd.f32 %v3669_v34, %v1155_v41  ;;  %v2659_v59 = vmul.f32 -1.442695, %v1223_v52 }
 0x20d   : > { %v2938_v47 = vpop.f32.mrf.mxu1  ;;  %v2946_v48 = vpop.f32.mrf.mxu0 }
 0x20e   : > { %3178 = vpow2.f32 %v2657_v42  ;;  %v1210_v32 = vadd.f32 %v1202_v45, %v1115_v44  ;;  %v1224_v57 = vadd.f32 %v1205_v56, %v1156_v50  ;;  %v1389_v42 = vld [vmem:[#allocation3 + $0x20] sm:$0xff] }
 0x20f   : > { %v1193_v51 = vpop.f32.mrf.mxu1  ;;  %v1392_v56 = vld [vmem:[#allocation4 + $0x20] sm:$0xff] }
 0x210   : > { %v2658_v53 = vmul.f32 -1.442695, %v1210_v32  ;;  %v2660_v61 = vmul.f32 -1.442695, %v1224_v57  ;;  %v1194_v5 = vadd.f32 %v3700_v55, %v1193_v51  ;;  %v1390_v51 = vld [vmem:[#allocation3 + $0x28] sm:$0xff] }
 0x211   : > { %v2953_v54 = vpop.f32.mrf.mxu1 }
 0x212   : > { %3180 = vpow2.f32 %v2658_v53 }
 0x213   : > { %v1196_v58 = vpop.f32.mrf.mxu1  ;;  %3182 = vpow2.f32 %v2659_v59 }
 0x214   : > { %3184 = vpow2.f32 %v2660_v61  ;;  %v1197_v11 = vadd.f32 %v3700_v55, %v1196_v58 }
 0x215   : > { %v2954_v60 = vpop.f32.mrf.mxu1 }
 0x21b   : > { %v3179_v62 = vpop.eup %3178 }
 0x21c   : > { %v1217_v63 = vadd.f32 1.0, %v3179_v62  ;;  %v1393_v62 = vld [vmem:[#allocation4 + $0x28] sm:$0xff] }
 0x21e   : > { %3186 = vrcp.f32 %v1217_v63 }
 0x21f   : > { %v3181_v0 = vpop.eup %3180 }
 0x220   : > { %v1218_v1 = vadd.f32 1.0, %v3181_v0  ;;  %v3183_v2 = vpop.eup %3182 }
 0x221   : > { %v3185_v3 = vpop.eup %3184  ;;  %v1231_v4 = vadd.f32 1.0, %v3183_v2 }
 0x222   : > { %3188 = vrcp.f32 %v1218_v1  ;;  %v1232_v7 = vadd.f32 1.0, %v3185_v3 }
 0x223   : > { %3190 = vrcp.f32 %v1231_v4 }
 0x224   : > { %3192 = vrcp.f32 %v1232_v7 }
 0x22b   : > { %v3187_v6 = vpop.eup %3186 }
 0x22c   : > { %v1237_v8 = vmul.f32 %v3187_v6, %v1194_v5 }
 0x22e   : > { %v1239_v46 = vadd.f32 %v1237_v8, %v1207_v9 }
 0x22f   : > { %v3189_v12 = vpop.eup %3188 }
 0x230   : > { %3194 = vtanh.f32 %v1239_v46  ;;  %v1238_v14 = vmul.f32 %v3189_v12, %v1197_v11  ;;  %v3191_v19 = vpop.eup %3190 }
 0x231   : > { %v3193_v20 = vpop.eup %3192  ;;  %v1243_v21 = vsub.f32 1.0, %v3191_v19  ;;  %v1247_v24 = vmul.f32 %v3191_v19, %v3710_v18 }
 0x232   : > { %v1240_v16 = vadd.f32 %v1238_v14, %v1208_v15  ;;  %v1244_v26 = vsub.f32 1.0, %v3193_v20  ;;  %v1248_v36 = vmul.f32 %v3193_v20, %v3715_v23 }
 0x234   : > { %3196 = vtanh.f32 %v1240_v16  ;;  %v1395_v16 = vld [vmem:[#allocation5 + $0x20] sm:$0xff] }
 0x23d   : > { %v3195_v22 = vpop.eup %3194 }
 0x23e   : > { %v1245_v25 = vmul.f32 %v3195_v22, %v1243_v21 }
 0x240   : > { %v3756_v27 = vadd.f32 %v1247_v24, %v1245_v25  ;;  %v1396_v25 = vld [vmem:[#allocation5 + $0x28] sm:$0xff] }
 0x241   : > { %v3197_v33 = vpop.eup %3196 }
 0x242   : > { %v1246_v35 = vmul.f32 %v3197_v33, %v1244_v26  ;;  %v2739_v37 = vpack.c.bf16 %v3756_v27, %v3756_v27 }
 0x244   : > { %v3761_v38 = vadd.f32 %v1248_v36, %v1246_v35  ;;  %2663 = vst.msk [vmem:[%s3718_s9 + $0x8] sm:$0xf] %vm1071_vm4, %v2739_v37 }
 0x246   : > { %v1251_v39 = vpack.c.bf16 %v3761_v38, %v3756_v27  ;;  %v2740_v18 = vpack.c.bf16 %v3761_v38, %v3761_v38 }
 0x248   : > { %2664 = vst.msk [vmem:[%s3718_s9 + $0xc] sm:$0xf] %vm1071_vm4, %v2740_v18  ;;  %2960 = vmatmul.mubr.msk.bf16.vlgmr.msra.gmra.mxu0 %vm351_vm2, %v1251_v39  ;;  %2968 = vmatmul.mubr.msk.bf16.vlgmr.msra.gmra.mxu1 %vm351_vm2, %v1251_v39 }
 0x249   : > { %2972 = vmatpush3.bf16.msra.mxu0 %v3546_v30  ;;  %2975 = vmatprep.mubr.msk.bf16.mxu0 %vm3368_vm3, %v3367_v13 }
 0x24a   : > { %2973 = vmatprep.subr.bf16.mxu0 %v3367_v13  ;;  %2980 = vmatpush3.bf16.msra.mxu1 %v3460_v10 }
 0x24b   : > { %2981 = vmatprep.subr.bf16.mxu1 %v3367_v13  ;;  %2983 = vmatprep.mubr.msk.bf16.mxu1 %vm3368_vm3, %v3367_v13 }
 0x24d   : > { %2974 = vmatpush3.bf16.msra.mxu0 %v3556_v31 }
 0x24e   : > { %2987 = vmatprep.subr.bf16.mxu0 %v3367_v13  ;;  %2982 = vmatpush3.bf16.msra.mxu1 %v3486_v17 }
 0x24f   : > { %2995 = vmatprep.subr.bf16.mxu1 %v3367_v13 }
 0x250   : > { %2976 = vmatmul.mubr.msk.bf16.vlgmr.msra.gmra.mxu0 %vm351_vm2, %v1251_v39 }
 0x251   : > { %2988 = vmatpush3.bf16.msra.mxu0 %v3526_v28  ;;  %2991 = vmatprep.mubr.msk.bf16.mxu0 %vm3368_vm3, %v3367_v13 }
 0x252   : > { %2989 = vmatprep.subr.bf16.mxu0 %v3367_v13 }
 0x255   : > { %2990 = vmatpush3.bf16.msra.mxu0 %v3533_v29 }
 0x256   : > { %3003 = vmatprep.subr.bf16.mxu0 %v3367_v13 }
 0x308   : > { %v1299_v10 = vpop.f32.mrf.mxu0  ;;  %v1340_v23 = vpop.f32.mrf.mxu1 }
 0x309   : > { %v1300_v41 = vadd.f32 %v3646_v40, %v1299_v10  ;;  %v1341_v49 = vadd.f32 %v3669_v34, %v1340_v23 }
 0x30a   : > { %v2961_v43 = vpop.f32.mrf.mxu0  ;;  %v2969_v44 = vpop.f32.mrf.mxu1 }
 0x30b   : > { %v1397_v45 = vadd.f32 %v1389_v42, %v1300_v41  ;;  %v1411_v59 = vadd.f32 %v1392_v56, %v1341_v49 }
 0x30c   : > { %v1302_v47 = vpop.f32.mrf.mxu0  ;;  %v1343_v48 = vpop.f32.mrf.mxu1 }
 0x30d   : > { %v2668_v32 = vmul.f32 -1.442695, %v1397_v45  ;;  %v1303_v50 = vadd.f32 %v3646_v40, %v1302_v47  ;;  %v1344_v57 = vadd.f32 %v3669_v34, %v1343_v48  ;;  %v2670_v1 = vmul.f32 -1.442695, %v1411_v59 }
 0x30e   : > { %v2962_v52 = vpop.f32.mrf.mxu0  ;;  %v2970_v53 = vpop.f32.mrf.mxu1 }
 0x30f   : > { %3198 = vpow2.f32 %v2668_v32  ;;  %v1398_v54 = vadd.f32 %v1390_v51, %v1303_v50  ;;  %v1412_v63 = vadd.f32 %v1393_v62, %v1344_v57 }
 0x310   : > { %v1381_v58 = vpop.f32.mrf.mxu0 }
 0x311   : > { %v2669_v60 = vmul.f32 -1.442695, %v1398_v54  ;;  %v2671_v3 = vmul.f32 -1.442695, %v1412_v63  ;;  %v1382_v11 = vadd.f32 %v3700_v55, %v1381_v58  ;;  %v1578_v54 = vld [vmem:[#allocation3 + $0x38] sm:$0xff]  ;;  %v1580_v58 = vld [vmem:[#allocation4 + $0x30] sm:$0xff] }
 0x312   : > { %v2977_v61 = vpop.f32.mrf.mxu0 }
 0x313   : > { %3200 = vpow2.f32 %v2669_v60 }
 0x314   : > { %v1384_v0 = vpop.f32.mrf.mxu0  ;;  %3202 = vpow2.f32 %v2670_v1 }
 0x315   : > { %3204 = vpow2.f32 %v2671_v3  ;;  %v1385_v20 = vadd.f32 %v3700_v55, %v1384_v0  ;;  %v1581_v0 = vld [vmem:[#allocation4 + $0x38] sm:$0xff] }
 0x316   : > { %v2978_v2 = vpop.f32.mrf.mxu0 }
 0x31c   : > { %v3199_v4 = vpop.eup %3198 }
 0x31d   : > { %v1405_v5 = vadd.f32 1.0, %v3199_v4 }
 0x31f   : > { %3206 = vrcp.f32 %v1405_v5 }
 0x320   : > { %v3201_v6 = vpop.eup %3200 }
 0x321   : > { %v1406_v7 = vadd.f32 1.0, %v3201_v6  ;;  %v3203_v8 = vpop.eup %3202 }
 0x322   : > { %v3205_v9 = vpop.eup %3204  ;;  %v1419_v46 = vadd.f32 1.0, %v3203_v8 }
 0x323   : > { %3208 = vrcp.f32 %v1406_v7  ;;  %v1420_v14 = vadd.f32 1.0, %v3205_v9 }
 0x324   : > { %3210 = vrcp.f32 %v1419_v46 }
 0x325   : > { %3212 = vrcp.f32 %v1420_v14 }
 0x32c   : > { %v3207_v12 = vpop.eup %3206 }
 0x32d   : > { %v1425_v15 = vmul.f32 %v3207_v12, %v1382_v11 }
 0x32f   : > { %v1427_v19 = vadd.f32 %v1425_v15, %v1395_v16 }
 0x330   : > { %v3209_v21 = vpop.eup %3208 }
 0x331   : > { %3214 = vtanh.f32 %v1427_v19  ;;  %v1426_v22 = vmul.f32 %v3209_v21, %v1385_v20  ;;  %v3211_v26 = vpop.eup %3210  ;;  %v1583_v20 = vld [vmem:[#allocation5 + $0x30] sm:$0xff] }
 0x332   : > { %v3213_v33 = vpop.eup %3212  ;;  %v1431_v35 = vsub.f32 1.0, %v3211_v26  ;;  %v1435_v39 = vmul.f32 %v3211_v26, %v3756_v27  ;;  %v1584_v26 = vld [vmem:[#allocation5 + $0x38] sm:$0xff] }
 0x333   : > { %v1428_v24 = vadd.f32 %v1426_v22, %v1396_v25  ;;  %v1432_v18 = vsub.f32 1.0, %v3213_v33  ;;  %v1436_v42 = vmul.f32 %v3213_v33, %v3761_v38  ;;  %v3823_v38 = vld [vmem:[%s4083_s2 + $0x8] sm:$0xff]  }
 0x335   : > { %3216 = vtanh.f32 %v1428_v24 }
 0x33e   : > { %v3215_v36 = vpop.eup %3214 }
 0x33f   : > { %v1433_v37 = vmul.f32 %v3215_v36, %v1431_v35 }
 0x341   : > { %v3799_v10 = vadd.f32 %v1435_v39, %v1433_v37 }
 0x342   : > { %v3217_v23 = vpop.eup %3216 }
 0x343   : > { %v1434_v41 = vmul.f32 %v3217_v23, %v1432_v18  ;;  %v2741_v43 = vpack.c.bf16 %v3799_v10, %v3799_v10 }
 0x345   : > { %v3804_v44 = vadd.f32 %v1436_v42, %v1434_v41  ;;  %2674 = vst.msk [vmem:[%s3718_s9 + $0x10] sm:$0xf] %vm1071_vm4, %v2741_v43 }
 0x347   : > { %v1439_v45 = vpack.c.bf16 %v3804_v44, %v3799_v10  ;;  %v2742_v27 = vpack.c.bf16 %v3804_v44, %v3804_v44 }
 0x349   : > { %2675 = vst.msk [vmem:[%s3718_s9 + $0x14] sm:$0xf] %vm1071_vm4, %v2742_v27  ;;  %2984 = vmatmul.mubr.msk.bf16.vlgmr.msra.gmra.mxu1 %vm351_vm2, %v1439_v45  ;;  %2992 = vmatmul.mubr.msk.bf16.vlgmr.msra.gmra.mxu0 %vm351_vm2, %v1439_v45 }
 0x34a   : > { %2996 = vmatpush3.bf16.msra.mxu1 %v3546_v30  ;;  %2999 = vmatprep.mubr.msk.bf16.mxu1 %vm3368_vm3, %v3367_v13 }
 0x34b   : > { %2997 = vmatprep.subr.bf16.mxu1 %v3367_v13  ;;  %3004 = vmatpush3.bf16.msra.mxu0 %v3823_v38 }
 0x34c   : > { %3005 = vmatprep.subr.bf16.mxu0 %v3367_v13  ;;  %3007 = vmatprep.mubr.msk.bf16.mxu0 %vm3368_vm3, %v3367_v13 }
 0x34e   : > { %2998 = vmatpush3.bf16.msra.mxu1 %v3556_v31 }
 0x34f   : > { %3011 = vmatprep.subr.bf16.mxu1 %v3367_v13  ;;  %3006 = vmatpush3.bf16.msra.mxu0 %v3486_v17  ;;  %v1577_v17 = vld [vmem:[#allocation3 + $0x30] sm:$0xff] }
 0x350   : > { %3019 = vmatprep.subr.bf16.mxu0 %v3367_v13 }
 0x351   : > { %3000 = vmatmul.mubr.msk.bf16.vlgmr.msra.gmra.mxu1 %vm351_vm2, %v1439_v45 }
 0x352   : > { %3012 = vmatpush3.bf16.msra.mxu1 %v3526_v28  ;;  %3015 = vmatprep.mubr.msk.bf16.mxu1 %vm3368_vm3, %v3367_v13 }
 0x353   : > { %3013 = vmatprep.subr.bf16.mxu1 %v3367_v13 }
 0x356   : > { %3014 = vmatpush3.bf16.msra.mxu1 %v3533_v29 }
 0x357   : > { %3027 = vmatprep.subr.bf16.mxu1 %v3367_v13 }
 0x409   : > { %v1487_v30 = vpop.f32.mrf.mxu1  ;;  %v1528_v31 = vpop.f32.mrf.mxu0 }
 0x40a   : > { %v1488_v47 = vadd.f32 %v3646_v40, %v1487_v30  ;;  %v1529_v52 = vadd.f32 %v3669_v34, %v1528_v31 }
 0x40b   : > { %v2985_v48 = vpop.f32.mrf.mxu1  ;;  %v2993_v32 = vpop.f32.mrf.mxu0 }
 0x40c   : > { %v1585_v49 = vadd.f32 %v1577_v17, %v1488_v47  ;;  %v1599_v61 = vadd.f32 %v1580_v58, %v1529_v52  ;;  %v3880_v17 = vld [vmem:[%s4083_s2 + $0x20] sm:$0xff]   ;;  %v3895_v32 = vld [vmem:[%s4083_s2 + $0x18] sm:$0xff]   ;;  %v1765_v52 = vld [vmem:[#allocation3 + $0x40] sm:$0xff] }
 0x40d   : > { %v1490_v50 = vpop.f32.mrf.mxu1  ;;  %v1531_v51 = vpop.f32.mrf.mxu0  ;;  %v3887_v48 = vld [vmem:[%s4083_s2] sm:$0xff]  }
 0x40e   : > { %v2679_v28 = vmul.f32 -1.442695, %v1585_v49  ;;  %v1491_v53 = vadd.f32 %v3646_v40, %v1490_v50  ;;  %v1532_v59 = vadd.f32 %v3669_v34, %v1531_v51  ;;  %v2681_v3 = vmul.f32 -1.442695, %v1599_v61  ;;  %v3904_v49 = vld [vmem:[%s4083_s2 + $0x10] sm:$0xff]   ;;  %v1766_v61 = vld [vmem:[#allocation3 + $0x48] sm:$0xff] }
 0x40f   : > { %v2986_v56 = vpop.f32.mrf.mxu1  ;;  %v2994_v29 = vpop.f32.mrf.mxu0 }
 0x410   : > { %3218 = vpow2.f32 %v2679_v28  ;;  %v1586_v57 = vadd.f32 %v1578_v54, %v1491_v53  ;;  %v1600_v1 = vadd.f32 %v1581_v0, %v1532_v59 }
 0x411   : > { %v1569_v60 = vpop.f32.mrf.mxu1 }
 0x412   : > { %v2680_v62 = vmul.f32 -1.442695, %v1586_v57  ;;  %v2682_v5 = vmul.f32 -1.442695, %v1600_v1  ;;  %v1570_v14 = vadd.f32 %v3700_v55, %v1569_v60  ;;  %v1768_v1 = vld [vmem:[#allocation4 + $0x40] sm:$0xff] }
 0x413   : > { %v3001_v63 = vpop.f32.mrf.mxu1 }
 0x414   : > { %3220 = vpow2.f32 %v2680_v62 }
 0x415   : > { %v1572_v2 = vpop.f32.mrf.mxu1  ;;  %3222 = vpow2.f32 %v2681_v3 }
 0x416   : > { %3224 = vpow2.f32 %v2682_v5  ;;  %v1573_v22 = vadd.f32 %v3700_v55, %v1572_v2 }
 0x417   : > { %v3002_v4 = vpop.f32.mrf.mxu1 }
 0x41d   : > { %v3219_v6 = vpop.eup %3218 }
 0x41e   : > { %v1593_v7 = vadd.f32 1.0, %v3219_v6 }
 0x420   : > { %3226 = vrcp.f32 %v1593_v7  ;;  %v1769_v7 = vld [vmem:[#allocation4 + $0x48] sm:$0xff] }
 0x421   : > { %v3221_v8 = vpop.eup %3220 }
 0x422   : > { %v1594_v9 = vadd.f32 1.0, %v3221_v8  ;;  %v3223_v46 = vpop.eup %3222 }
 0x423   : > { %v3225_v11 = vpop.eup %3224  ;;  %v1607_v12 = vadd.f32 1.0, %v3223_v46 }
 0x424   : > { %3228 = vrcp.f32 %v1594_v9  ;;  %v1608_v16 = vadd.f32 1.0, %v3225_v11 }
 0x425   : > { %3230 = vrcp.f32 %v1607_v12 }
 0x426   : > { %3232 = vrcp.f32 %v1608_v16 }
 0x42d   : > { %v3227_v15 = vpop.eup %3226 }
 0x42e   : > { %v1613_v19 = vmul.f32 %v3227_v15, %v1570_v14 }
 0x430   : > { %v1615_v21 = vadd.f32 %v1613_v19, %v1583_v20 }
 0x431   : > { %v3229_v25 = vpop.eup %3228 }
 0x432   : > { %3234 = vtanh.f32 %v1615_v21  ;;  %v1614_v24 = vmul.f32 %v3229_v25, %v1573_v22  ;;  %v3231_v35 = vpop.eup %3230 }
 0x433   : > { %v3233_v36 = vpop.eup %3232  ;;  %v1619_v37 = vsub.f32 1.0, %v3231_v35  ;;  %v1623_v23 = vmul.f32 %v3231_v35, %v3799_v10 }
 0x434   : > { %v1616_v33 = vadd.f32 %v1614_v24, %v1584_v26  ;;  %v1620_v41 = vsub.f32 1.0, %v3233_v36  ;;  %v1624_v27 = vmul.f32 %v3233_v36, %v3804_v44  ;;  %v3867_v44 = vld [vmem:[%s4083_s2 + $0x28] sm:$0xff]  }
 0x436   : > { %3236 = vtanh.f32 %v1616_v33  ;;  %v1771_v33 = vld [vmem:[#allocation5 + $0x40] sm:$0xff] }
 0x43f   : > { %v3235_v39 = vpop.eup %3234 }
 0x440   : > { %v1621_v18 = vmul.f32 %v3235_v39, %v1619_v37 }
 0x442   : > { %v3847_v42 = vadd.f32 %v1623_v23, %v1621_v18  ;;  %v1772_v18 = vld [vmem:[#allocation5 + $0x48] sm:$0xff] }
 0x443   : > { %v3237_v43 = vpop.eup %3236 }
 0x444   : > { %v1622_v45 = vmul.f32 %v3237_v43, %v1620_v41  ;;  %v2743_v30 = vpack.c.bf16 %v3847_v42, %v3847_v42 }
 0x446   : > { %v3852_v31 = vadd.f32 %v1624_v27, %v1622_v45  ;;  %2685 = vst.msk [vmem:[%s3718_s9 + $0x18] sm:$0xf] %vm1071_vm4, %v2743_v30 }
 0x448   : > { %v1627_v47 = vpack.c.bf16 %v3852_v31, %v3847_v42  ;;  %v2744_v10 = vpack.c.bf16 %v3852_v31, %v3852_v31 }
 0x44a   : > { %2686 = vst.msk [vmem:[%s3718_s9 + $0x1c] sm:$0xf] %vm1071_vm4, %v2744_v10  ;;  %3008 = vmatmul.mubr.msk.bf16.vlgmr.msra.gmra.mxu0 %vm351_vm2, %v1627_v47  ;;  %3016 = vmatmul.mubr.msk.bf16.vlgmr.msra.gmra.mxu1 %vm351_vm2, %v1627_v47 }
 0x44b   : > { %3020 = vmatpush3.bf16.msra.mxu0 %v3867_v44  ;;  %3023 = vmatprep.mubr.msk.bf16.mxu0 %vm3368_vm3, %v3367_v13 }
 0x44c   : > { %3021 = vmatprep.subr.bf16.mxu0 %v3367_v13  ;;  %3028 = vmatpush3.bf16.msra.mxu1 %v3823_v38 }
 0x44d   : > { %3029 = vmatprep.subr.bf16.mxu1 %v3367_v13  ;;  %3031 = vmatprep.mubr.msk.bf16.mxu1 %vm3368_vm3, %v3367_v13 }
 0x44f   : > { %3022 = vmatpush3.bf16.msra.mxu0 %v3880_v17 }
 0x450   : > { %3035 = vmatprep.subr.bf16.mxu0 %v3367_v13  ;;  %3030 = vmatpush3.bf16.msra.mxu1 %v3887_v48 }
 0x451   : > { %3043 = vmatprep.subr.bf16.mxu1 %v3367_v13 }
 0x452   : > { %3024 = vmatmul.mubr.msk.bf16.vlgmr.msra.gmra.mxu0 %vm351_vm2, %v1627_v47 }
 0x453   : > { %3036 = vmatpush3.bf16.msra.mxu0 %v3895_v32  ;;  %3039 = vmatprep.mubr.msk.bf16.mxu0 %vm3368_vm3, %v3367_v13 }
 0x454   : > { %3037 = vmatprep.subr.bf16.mxu0 %v3367_v13 }
 0x457   : > { %3038 = vmatpush3.bf16.msra.mxu0 %v3904_v49 }
 0x458   : > { %3051 = vmatprep.subr.bf16.mxu0 %v3367_v13 }
 0x50a   : > { %v1675_v50 = vpop.f32.mrf.mxu0  ;;  %v1716_v51 = vpop.f32.mrf.mxu1 }
 0x50b   : > { %v1676_v28 = vadd.f32 %v3646_v40, %v1675_v50  ;;  %v1717_v59 = vadd.f32 %v3669_v34, %v1716_v51 }
 0x50c   : > { %v3009_v53 = vpop.f32.mrf.mxu0  ;;  %v3017_v54 = vpop.f32.mrf.mxu1 }
 0x50d   : > { %v1773_v56 = vadd.f32 %v1765_v52, %v1676_v28  ;;  %v1787_v4 = vadd.f32 %v1768_v1, %v1717_v59  ;;  %v1953_v59 = vld [vmem:[#allocation3 + $0x50] sm:$0xff] }
 0x50e   : > { %v1678_v29 = vpop.f32.mrf.mxu0  ;;  %v1719_v57 = vpop.f32.mrf.mxu1 }
 0x50f   : > { %v2690_v58 = vmul.f32 -1.442695, %v1773_v56  ;;  %v1679_v60 = vadd.f32 %v3646_v40, %v1678_v29  ;;  %v1720_v2 = vadd.f32 %v3669_v34, %v1719_v57  ;;  %v2692_v46 = vmul.f32 -1.442695, %v1787_v4  ;;  %v3954_v57 = vld [vmem:[%s4085_s4] ss:$0 sm:$0xff] }
 0x510   : > { %v3010_v62 = vpop.f32.mrf.mxu0  ;;  %v3018_v63 = vpop.f32.mrf.mxu1  ;;  %v1954_v4 = vld [vmem:[#allocation3 + $0x58] sm:$0xff] }
 0x511   : > { %3238 = vpow2.f32 %v2690_v58  ;;  %v1774_v0 = vadd.f32 %v1766_v61, %v1679_v60  ;;  %v1788_v8 = vadd.f32 %v1769_v7, %v1720_v2 }
 0x512   : > { %v1757_v3 = vpop.f32.mrf.mxu0 }
 0x513   : > { %v2691_v5 = vmul.f32 -1.442695, %v1774_v0  ;;  %v2693_v12 = vmul.f32 -1.442695, %v1788_v8  ;;  %v1758_v22 = vadd.f32 %v3700_v55, %v1757_v3  ;;  %v1956_v8 = vld [vmem:[#allocation4 + $0x50] sm:$0xff] }
 0x514   : > { %v3025_v6 = vpop.f32.mrf.mxu0 }
 0x515   : > { %3240 = vpow2.f32 %v2691_v5 }
 0x516   : > { %v1760_v9 = vpop.f32.mrf.mxu0  ;;  %3242 = vpow2.f32 %v2692_v46 }
 0x517   : > { %3244 = vpow2.f32 %v2693_v12  ;;  %v1761_v36 = vadd.f32 %v3700_v55, %v1760_v9 }
 0x518   : > { %v3026_v11 = vpop.f32.mrf.mxu0 }
 0x51e   : > { %v3239_v40 = vpop.eup %3238 }
 0x51f   : > { %v1781_v14 = vadd.f32 1.0, %v3239_v40 }
 0x521   : > { %3246 = vrcp.f32 %v1781_v14  ;;  %v1957_v14 = vld [vmem:[#allocation4 + $0x58] sm:$0xff] }
 0x522   : > { %v3241_v15 = vpop.eup %3240 }
 0x523   : > { %v1782_v16 = vadd.f32 1.0, %v3241_v15  ;;  %v3243_v19 = vpop.eup %3242 }
 0x524   : > { %v3245_v20 = vpop.eup %3244  ;;  %v1795_v21 = vadd.f32 1.0, %v3243_v19 }
 0x525   : > { %3248 = vrcp.f32 %v1782_v16  ;;  %v1796_v24 = vadd.f32 1.0, %v3245_v20 }
 0x526   : > { %3250 = vrcp.f32 %v1795_v21 }
 0x527   : > { %3252 = vrcp.f32 %v1796_v24 }
 0x52e   : > { %v3247_v25 = vpop.eup %3246 }
 0x52f   : > { %v1801_v26 = vmul.f32 %v3247_v25, %v1758_v22 }
 0x531   : > { %v1803_v35 = vadd.f32 %v1801_v26, %v1771_v33 }
 0x532   : > { %v3249_v37 = vpop.eup %3248 }
 0x533   : > { %3254 = vtanh.f32 %v1803_v35  ;;  %v1802_v39 = vmul.f32 %v3249_v37, %v1761_v36  ;;  %v3251_v41 = vpop.eup %3250 }
 0x534   : > { %v3253_v43 = vpop.eup %3252  ;;  %v1807_v45 = vsub.f32 1.0, %v3251_v41  ;;  %v1811_v47 = vmul.f32 %v3251_v41, %v3847_v42 }
 0x535   : > { %v1804_v23 = vadd.f32 %v1802_v39, %v1772_v18  ;;  %v1808_v10 = vsub.f32 1.0, %v3253_v43  ;;  %v1812_v52 = vmul.f32 %v3253_v43, %v3852_v31 }
 0x537   : > { %3256 = vtanh.f32 %v1804_v23  ;;  %v1959_v23 = vld [vmem:[#allocation5 + $0x50] sm:$0xff] }
 0x540   : > { %v3255_v27 = vpop.eup %3254 }
 0x541   : > { %v1809_v30 = vmul.f32 %v3255_v27, %v1807_v45 }
 0x543   : > { %v3915_v50 = vadd.f32 %v1811_v47, %v1809_v30  ;;  %v1960_v30 = vld [vmem:[#allocation5 + $0x58] sm:$0xff] }
 0x544   : > { %v3257_v51 = vpop.eup %3256 }
 0x545   : > { %v1810_v28 = vmul.f32 %v3257_v51, %v1808_v10  ;;  %v2745_v53 = vpack.c.bf16 %v3915_v50, %v3915_v50 }
 0x547   : > { %v3920_v54 = vadd.f32 %v1812_v52, %v1810_v28  ;;  %2696 = vst.msk [vmem:[%s3718_s9 + $0x20] sm:$0xf] %vm1071_vm4, %v2745_v53 }
 0x549   : > { %v1815_v56 = vpack.c.bf16 %v3920_v54, %v3915_v50  ;;  %v2746_v42 = vpack.c.bf16 %v3920_v54, %v3920_v54 }
 0x54b   : > { %2697 = vst.msk [vmem:[%s3718_s9 + $0x24] sm:$0xf] %vm1071_vm4, %v2746_v42  ;;  %3032 = vmatmul.mubr.msk.bf16.vlgmr.msra.gmra.mxu1 %vm351_vm2, %v1815_v56  ;;  %3040 = vmatmul.mubr.msk.bf16.vlgmr.msra.gmra.mxu0 %vm351_vm2, %v1815_v56 }
 0x54c   : > { %3044 = vmatpush3.bf16.msra.mxu1 %v3867_v44  ;;  %3047 = vmatprep.mubr.msk.bf16.mxu1 %vm3368_vm3, %v3367_v13 }
 0x54d   : > { %3045 = vmatprep.subr.bf16.mxu1 %v3367_v13  ;;  %3052 = vmatpush3.bf16.msra.mxu0 %v3823_v38 }
 0x54e   : > { %3053 = vmatprep.subr.bf16.mxu0 %v3367_v13  ;;  %3055 = vmatprep.mubr.msk.bf16.mxu0 %vm3368_vm3, %v3367_v13 }
 0x550   : > { %3046 = vmatpush3.bf16.msra.mxu1 %v3880_v17 }
 0x551   : > { %3059 = vmatprep.subr.bf16.mxu1 %v3367_v13  ;;  %3054 = vmatpush3.bf16.msra.mxu0 %v3887_v48 }
 0x552   : > { %3067 = vmatprep.subr.bf16.mxu0 %v3367_v13 }
 0x553   : > { %3048 = vmatmul.mubr.msk.bf16.vlgmr.msra.gmra.mxu1 %vm351_vm2, %v1815_v56 }
 0x554   : > { %3060 = vmatpush3.bf16.msra.mxu1 %v3895_v32  ;;  %3063 = vmatprep.mubr.msk.bf16.mxu1 %vm3368_vm3, %v3367_v13 }
 0x555   : > { %3061 = vmatprep.subr.bf16.mxu1 %v3367_v13 }
 0x558   : > { %3062 = vmatpush3.bf16.msra.mxu1 %v3904_v49 }
 0x559   : > { %3075 = vmatprep.subr.bf16.mxu1 %v3367_v13 }
 0x60b   : > { %v1863_v31 = vpop.f32.mrf.mxu1  ;;  %v1904_v29 = vpop.f32.mrf.mxu0 }
 0x60c   : > { %v1864_v58 = vadd.f32 %v3954_v57, %v1863_v31  ;;  %v1905_v2 = vadd.f32 %v3669_v34, %v1904_v29 }
 0x60d   : > { %v3033_v60 = vpop.f32.mrf.mxu1  ;;  %v3041_v61 = vpop.f32.mrf.mxu0 }
 0x60e   : > { %v1961_v62 = vadd.f32 %v1953_v59, %v1864_v58  ;;  %v1975_v11 = vadd.f32 %v1956_v8, %v1905_v2 }
 0x60f   : > { %v1866_v63 = vpop.f32.mrf.mxu1  ;;  %v1907_v0 = vpop.f32.mrf.mxu0 }
 0x610   : > { %v2701_v1 = vmul.f32 -1.442695, %v1961_v62  ;;  %v1867_v3 = vadd.f32 %v3954_v57, %v1866_v63  ;;  %v1908_v9 = vadd.f32 %v3669_v34, %v1907_v0  ;;  %v2703_v19 = vmul.f32 -1.442695, %v1975_v11  ;;  %v2141_v63 = vld [vmem:[#allocation3 + $0x60] sm:$0xff] }
 0x611   : > { %v3034_v5 = vpop.f32.mrf.mxu1  ;;  %v3042_v6 = vpop.f32.mrf.mxu0 }
 0x612   : > { %3258 = vpow2.f32 %v2701_v1  ;;  %v1962_v7 = vadd.f32 %v1954_v4, %v1867_v3  ;;  %v1976_v15 = vadd.f32 %v1957_v14, %v1908_v9  ;;  %v2142_v6 = vld [vmem:[#allocation3 + $0x68] sm:$0xff] }
 0x613   : > { %v1945_v46 = vpop.f32.mrf.mxu1 }
 0x614   : > { %v2702_v12 = vmul.f32 -1.442695, %v1962_v7  ;;  %v2704_v21 = vmul.f32 -1.442695, %v1976_v15  ;;  %v1946_v36 = vadd.f32 %v3700_v55, %v1945_v46  ;;  %v2144_v46 = vld [vmem:[#allocation4 + $0x60] sm:$0xff] }
 0x615   : > { %v3049_v40 = vpop.f32.mrf.mxu1 }
 0x616   : > { %3260 = vpow2.f32 %v2702_v12 }
 0x617   : > { %v1948_v16 = vpop.f32.mrf.mxu1  ;;  %3262 = vpow2.f32 %v2703_v19 }
 0x618   : > { %3264 = vpow2.f32 %v2704_v21  ;;  %v1949_v43 = vadd.f32 %v3700_v55, %v1948_v16  ;;  %v2145_v16 = vld [vmem:[#allocation4 + $0x68] sm:$0xff] }
 0x619   : > { %v3050_v20 = vpop.f32.mrf.mxu1 }
 0x61f   : > { %v3259_v22 = vpop.eup %3258 }
 0x620   : > { %v1969_v25 = vadd.f32 1.0, %v3259_v22 }
 0x622   : > { %3266 = vrcp.f32 %v1969_v25 }
 0x623   : > { %v3261_v24 = vpop.eup %3260 }
 0x624   : > { %v1970_v26 = vadd.f32 1.0, %v3261_v24  ;;  %v3263_v34 = vpop.eup %3262 }
 0x625   : > { %v3265_v33 = vpop.eup %3264  ;;  %v1983_v35 = vadd.f32 1.0, %v3263_v34 }
 0x626   : > { %3268 = vrcp.f32 %v1970_v26  ;;  %v1984_v39 = vadd.f32 1.0, %v3265_v33 }
 0x627   : > { %3270 = vrcp.f32 %v1983_v35 }
 0x628   : > { %3272 = vrcp.f32 %v1984_v39  ;;  %v4010_v39 = vld [vmem:[%s4085_s4 + $0x2] ss:$0 sm:$0xff] }
 0x62f   : > { %v3267_v37 = vpop.eup %3266 }
 0x630   : > { %v1989_v18 = vmul.f32 %v3267_v37, %v1946_v36 }
 0x632   : > { %v1991_v41 = vadd.f32 %v1989_v18, %v1959_v23 }
 0x633   : > { %v3269_v45 = vpop.eup %3268 }
 0x634   : > { %3274 = vtanh.f32 %v1991_v41  ;;  %v1990_v27 = vmul.f32 %v3269_v45, %v1949_v43  ;;  %v3271_v10 = vpop.eup %3270  ;;  %v2147_v45 = vld [vmem:[#allocation5 + $0x60] sm:$0xff] }
 0x635   : > { %v3273_v51 = vpop.eup %3272  ;;  %v1995_v28 = vsub.f32 1.0, %v3271_v10  ;;  %v1999_v56 = vmul.f32 %v3271_v10, %v3915_v50 }
 0x636   : > { %v1992_v47 = vadd.f32 %v1990_v27, %v1960_v30  ;;  %v1996_v42 = vsub.f32 1.0, %v3273_v51  ;;  %v2000_v58 = vmul.f32 %v3273_v51, %v3920_v54  ;;  %v2148_v51 = vld [vmem:[#allocation5 + $0x68] sm:$0xff] }
 0x638   : > { %3276 = vtanh.f32 %v1992_v47 }
 0x641   : > { %v3275_v52 = vpop.eup %3274 }
 0x642   : > { %v1997_v53 = vmul.f32 %v3275_v52, %v1995_v28 }
 0x644   : > { %v3963_v31 = vadd.f32 %v1999_v56, %v1997_v53 }
 0x645   : > { %v3277_v55 = vpop.eup %3276 }
 0x646   : > { %v1998_v29 = vmul.f32 %v3277_v55, %v1996_v42  ;;  %v2747_v59 = vpack.c.bf16 %v3963_v31, %v3963_v31 }
 0x648   : > { %v3968_v60 = vadd.f32 %v2000_v58, %v1998_v29  ;;  %2707 = vst.msk [vmem:[%s3718_s9 + $0x28] sm:$0xf] %vm1071_vm4, %v2747_v59 }
 0x64a   : > { %v2003_v61 = vpack.c.bf16 %v3968_v60, %v3963_v31  ;;  %v2748_v50 = vpack.c.bf16 %v3968_v60, %v3968_v60 }
 0x64c   : > { %2708 = vst.msk [vmem:[%s3718_s9 + $0x2c] sm:$0xf] %vm1071_vm4, %v2748_v50  ;;  %3056 = vmatmul.mubr.msk.bf16.vlgmr.msra.gmra.mxu0 %vm351_vm2, %v2003_v61  ;;  %3064 = vmatmul.mubr.msk.bf16.vlgmr.msra.gmra.mxu1 %vm351_vm2, %v2003_v61 }
 0x64d   : > { %3068 = vmatpush3.bf16.msra.mxu0 %v3867_v44  ;;  %3071 = vmatprep.mubr.msk.bf16.mxu0 %vm3368_vm3, %v3367_v13 }
 0x64e   : > { %3069 = vmatprep.subr.bf16.mxu0 %v3367_v13  ;;  %3076 = vmatpush3.bf16.msra.mxu1 %v3823_v38 }
 0x64f   : > { %3077 = vmatprep.subr.bf16.mxu1 %v3367_v13  ;;  %3079 = vmatprep.mubr.msk.bf16.mxu1 %vm3368_vm3, %v3367_v13 }
 0x651   : > { %3070 = vmatpush3.bf16.msra.mxu0 %v3880_v17 }
 0x652   : > { %3083 = vmatprep.subr.bf16.mxu0 %v3367_v13  ;;  %3078 = vmatpush3.bf16.msra.mxu1 %v3887_v48 }
 0x653   : > { %3091 = vmatprep.subr.bf16.mxu1 %v3367_v13 }
 0x654   : > { %3072 = vmatmul.mubr.msk.bf16.vlgmr.msra.gmra.mxu0 %vm351_vm2, %v2003_v61 }
 0x655   : > { %3084 = vmatpush3.bf16.msra.mxu0 %v3895_v32  ;;  %3087 = vmatprep.mubr.msk.bf16.mxu0 %vm3368_vm3, %v3367_v13  ;;  %v4002_v32 = vld [vmem:[%s4085_s4 + $0x1] ss:$0 sm:$0xff] }
 0x656   : > { %3085 = vmatprep.subr.bf16.mxu0 %v3367_v13 }
 0x659   : > { %3086 = vmatpush3.bf16.msra.mxu0 %v3904_v49 }
 0x70c   : > { %v2051_v38 = vpop.f32.mrf.mxu0  ;;  %v2092_v54 = vpop.f32.mrf.mxu1 }
 0x70d   : > { %v2052_v62 = vadd.f32 %v3954_v57, %v2051_v38  ;;  %v2093_v5 = vadd.f32 %v4002_v32, %v2092_v54 }
 0x70e   : > { %v3057_v0 = vpop.f32.mrf.mxu0  ;;  %v3065_v48 = vpop.f32.mrf.mxu1 }
 0x70f   : > { %v2149_v1 = vadd.f32 %v2141_v63, %v2052_v62  ;;  %v2163_v40 = vadd.f32 %v2144_v46, %v2093_v5  ;;  %v2332_v46 = vld [vmem:[#allocation4 + $0x70] sm:$0xff] }
 0x710   : > { %v2054_v2 = vpop.f32.mrf.mxu0  ;;  %v2095_v3 = vpop.f32.mrf.mxu1 }
 0x711   : > { %v2712_v4 = vmul.f32 -1.442695, %v2149_v1  ;;  %v2055_v49 = vadd.f32 %v3954_v57, %v2054_v2  ;;  %v2096_v11 = vadd.f32 %v4002_v32, %v2095_v3  ;;  %v2714_v21 = vmul.f32 -1.442695, %v2163_v40  ;;  %v2329_v1 = vld [vmem:[#allocation3 + $0x70] sm:$0xff] }
 0x712   : > { %v3058_v7 = vpop.f32.mrf.mxu0  ;;  %v3066_v8 = vpop.f32.mrf.mxu1 }
 0x713   : > { %3278 = vpow2.f32 %v2712_v4  ;;  %v2150_v9 = vadd.f32 %v2142_v6, %v2055_v49  ;;  %v2164_v19 = vadd.f32 %v2145_v16, %v2096_v11  ;;  %v2333_v16 = vld [vmem:[#allocation4 + $0x78] sm:$0xff] }
 0x714   : > { %v2133_v12 = vpop.f32.mrf.mxu0 }
 0x715   : > { %v2713_v14 = vmul.f32 -1.442695, %v2150_v9  ;;  %v2715_v25 = vmul.f32 -1.442695, %v2164_v19  ;;  %v2134_v18 = vadd.f32 %v4010_v39, %v2133_v12 }
 0x716   : > { %v3073_v15 = vpop.f32.mrf.mxu0 }
 0x717   : > { %3280 = vpow2.f32 %v2713_v14 }
 0x718   : > { %v2136_v20 = vpop.f32.mrf.mxu0  ;;  %3282 = vpow2.f32 %v2714_v21 }
 0x719   : > { %3284 = vpow2.f32 %v2715_v25  ;;  %v2137_v30 = vadd.f32 %v4010_v39, %v2136_v20 }
 0x71a   : > { %v3074_v22 = vpop.f32.mrf.mxu0 }
 0x720   : > { %v3279_v24 = vpop.eup %3278 }
 0x721   : > { %v2157_v26 = vadd.f32 1.0, %v3279_v24 }
 0x723   : > { %3286 = vrcp.f32 %v2157_v26 }
 0x724   : > { %v3281_v34 = vpop.eup %3280 }
 0x725   : > { %v2158_v33 = vadd.f32 1.0, %v3281_v34  ;;  %v3283_v35 = vpop.eup %3282 }
 0x726   : > { %v3285_v36 = vpop.eup %3284  ;;  %v2171_v37 = vadd.f32 1.0, %v3283_v35 }
 0x727   : > { %3288 = vrcp.f32 %v2158_v33  ;;  %v2172_v41 = vadd.f32 1.0, %v3285_v36 }
 0x728   : > { %3290 = vrcp.f32 %v2171_v37 }
 0x729   : > { %3292 = vrcp.f32 %v2172_v41  ;;  %v2335_v41 = vld [vmem:[#allocation5 + $0x70] sm:$0xff] }
 0x730   : > { %v3287_v23 = vpop.eup %3286 }
 0x731   : > { %v2177_v43 = vmul.f32 %v3287_v23, %v2134_v18 }
 0x733   : > { %v2179_v27 = vadd.f32 %v2177_v43, %v2147_v45 }
 0x734   : > { %v3289_v47 = vpop.eup %3288 }
 0x735   : > { %3294 = vtanh.f32 %v2179_v27  ;;  %v2178_v10 = vmul.f32 %v3289_v47, %v2137_v30  ;;  %v3291_v52 = vpop.eup %3290  ;;  %v2336_v47 = vld [vmem:[#allocation5 + $0x78] sm:$0xff] }
 0x736   : > { %v3293_v53 = vpop.eup %3292  ;;  %v2183_v56 = vsub.f32 1.0, %v3291_v52  ;;  %v2187_v29 = vmul.f32 %v3291_v52, %v3963_v31 }
 0x737   : > { %v2180_v28 = vadd.f32 %v2178_v10, %v2148_v51  ;;  %v2184_v58 = vsub.f32 1.0, %v3293_v53  ;;  %v2188_v38 = vmul.f32 %v3293_v53, %v3968_v60 }
 0x739   : > { %3296 = vtanh.f32 %v2180_v28 }
 0x742   : > { %v3295_v42 = vpop.eup %3294 }
 0x743   : > { %v2185_v55 = vmul.f32 %v3295_v42, %v2183_v56 }
 0x745   : > { %v4015_v59 = vadd.f32 %v2187_v29, %v2185_v55 }
 0x746   : > { %v3297_v61 = vpop.eup %3296 }
 0x747   : > { %v2186_v50 = vmul.f32 %v3297_v61, %v2184_v58  ;;  %v2749_v54 = vpack.c.bf16 %v4015_v59, %v4015_v59 }
 0x749   : > { %v4020_v62 = vadd.f32 %v2188_v38, %v2186_v50  ;;  %2718 = vst.msk [vmem:[%s3718_s9 + $0x30] sm:$0xf] %vm1071_vm4, %v2749_v54 }
 0x74b   : > { %v2191_v63 = vpack.c.bf16 %v4020_v62, %v4015_v59  ;;  %v2750_v31 = vpack.c.bf16 %v4020_v62, %v4020_v62 }
 0x74d   : > { %2719 = vst.msk [vmem:[%s3718_s9 + $0x34] sm:$0xf] %vm1071_vm4, %v2750_v31  ;;  %3080 = vmatmul.mubr.msk.bf16.vlgmr.msra.gmra.mxu1 %vm351_vm2, %v2191_v63  ;;  %3088 = vmatmul.mubr.msk.bf16.vlgmr.msra.gmra.mxu0 %vm351_vm2, %v2191_v63  ;;  %v2433_v31 = vld [vmem:[%s3718_s9 + $0x18] sm:$0xff] (%p3434_p6)  }
 0x74e   : > { %3092 = vmatpush3.bf16.msra.mxu1 %v3867_v44  ;;  %3095 = vmatprep.mubr.msk.bf16.mxu1 %vm3368_vm3, %v3367_v13  ;;  %2434 = vst [vmem:[%s2404_s13 + $0x30] sm:$0xff] (%p3434_p6), %v2433_v31  }
 0x74f   : > { %3093 = vmatprep.subr.bf16.mxu1 %v3367_v13  ;;  %v2330_v13 = vld [vmem:[#allocation3 + $0x78] sm:$0xff] }
 0x752   : > { %3094 = vmatpush3.bf16.msra.mxu1 %v3880_v17 }
 0x755   : > { %3096 = vmatmul.mubr.msk.bf16.vlgmr.msra.gmra.mxu1 %vm351_vm2, %v2191_v63  ;;  %v2429_v63 = vld [vmem:[%s3718_s9 + $0x10] sm:$0xff] (%p3434_p6)  }
 0x756   : > { %2430 = vst [vmem:[%s2404_s13 + $0x20] sm:$0xff] (%p3434_p6), %v2429_v63  }
 0x80d   : > { %v2239_v60 = vpop.f32.mrf.mxu1  ;;  %v2280_v0 = vpop.f32.mrf.mxu0 }
 0x80e   : > { %v2240_v48 = vadd.f32 %v3954_v57, %v2239_v60  ;;  %v2281_v6 = vadd.f32 %v4002_v32, %v2280_v0  ;;  %v2437_v60 = vld [vmem:[%s3718_s9 + $0x20] sm:$0xff] (%p3434_p6)   ;;  %v2441_v0 = vld [vmem:[%s3718_s9 + $0x28] sm:$0xff] (%p3434_p6)  }
 0x80f   : > { %v3081_v2 = vpop.f32.mrf.mxu1  ;;  %v3089_v3 = vpop.f32.mrf.mxu0  ;;  %2438 = vst [vmem:[%s2404_s13 + $0x40] sm:$0xff] (%p3434_p6), %v2437_v60   ;;  %2442 = vst [vmem:[%s2404_s13 + $0x50] sm:$0xff] (%p3434_p6), %v2441_v0  }
 0x810   : > { %v2337_v4 = vadd.f32 %v2329_v1, %v2240_v48  ;;  %v2351_v40 = vadd.f32 %v2332_v46, %v2281_v6  ;;  %v2445_v48 = vld [vmem:[%s3718_s9 + $0x30] sm:$0xff] (%p3434_p6)  }
 0x811   : > { %v2242_v5 = vpop.f32.mrf.mxu1  ;;  %v2283_v49 = vpop.f32.mrf.mxu0  ;;  %2446 = vst [vmem:[%s2404_s13 + $0x60] sm:$0xff] (%p3434_p6), %v2445_v48  }
 0x812   : > { %v2723_v44 = vmul.f32 -1.442695, %v2337_v4  ;;  %v2243_v7 = vadd.f32 %v3954_v57, %v2242_v5  ;;  %v2284_v11 = vadd.f32 %v4002_v32, %v2283_v49  ;;  %v2725_v21 = vmul.f32 -1.442695, %v2351_v40 }
 0x813   : > { %v3082_v8 = vpop.f32.mrf.mxu1  ;;  %v3090_v17 = vpop.f32.mrf.mxu0 }
 0x814   : > { %3298 = vpow2.f32 %v2723_v44  ;;  %v2338_v9 = vadd.f32 %v2330_v13, %v2243_v7  ;;  %v2352_v19 = vadd.f32 %v2333_v16, %v2284_v11 }
 0x815   : > { %v2321_v12 = vpop.f32.mrf.mxu1 }
 0x816   : > { %v2724_v14 = vmul.f32 -1.442695, %v2338_v9  ;;  %v2726_v25 = vmul.f32 -1.442695, %v2352_v19  ;;  %v2322_v36 = vadd.f32 %v4010_v39, %v2321_v12 }
 0x817   : > { %v3097_v15 = vpop.f32.mrf.mxu1 }
 0x818   : > { %3300 = vpow2.f32 %v2724_v14 }
 0x819   : > { %v2324_v20 = vpop.f32.mrf.mxu1  ;;  %3302 = vpow2.f32 %v2725_v21 }
 0x81a   : > { %3304 = vpow2.f32 %v2726_v25  ;;  %v2325_v45 = vadd.f32 %v4010_v39, %v2324_v20 }
 0x81b   : > { %v3098_v22 = vpop.f32.mrf.mxu1 }
 0x821   : > { %v3299_v57 = vpop.eup %3298 }
 0x822   : > { %v2345_v24 = vadd.f32 1.0, %v3299_v57 }
 0x824   : > { %3306 = vrcp.f32 %v2345_v24 }
 0x825   : > { %v3301_v26 = vpop.eup %3300 }
 0x826   : > { %v2346_v34 = vadd.f32 1.0, %v3301_v26  ;;  %v3303_v32 = vpop.eup %3302 }
 0x827   : > { %v3305_v33 = vpop.eup %3304  ;;  %v2359_v35 = vadd.f32 1.0, %v3303_v32 }
 0x828   : > { %3308 = vrcp.f32 %v2346_v34  ;;  %v2360_v18 = vadd.f32 1.0, %v3305_v33 }
 0x829   : > { %3310 = vrcp.f32 %v2359_v35 }
 0x82a   : > { %3312 = vrcp.f32 %v2360_v18 }
 0x831   : > { %v3307_v37 = vpop.eup %3306 }
 0x832   : > { %v2365_v23 = vmul.f32 %v3307_v37, %v2322_v36 }
 0x834   : > { %v2367_v43 = vadd.f32 %v2365_v23, %v2335_v41 }
 0x835   : > { %v3309_v27 = vpop.eup %3308 }
 0x836   : > { %3314 = vtanh.f32 %v2367_v43  ;;  %v2366_v30 = vmul.f32 %v3309_v27, %v2325_v45  ;;  %v3311_v51 = vpop.eup %3310 }
 0x837   : > { %v3313_v28 = vpop.eup %3312  ;;  %v2371_v52 = vsub.f32 1.0, %v3311_v51  ;;  %v2375_v56 = vmul.f32 %v3311_v51, %v4015_v59  ;;  %v2421_v59 = vld [vmem:[%s3718_s9] sm:$0xff] (%p3434_p6)  }
 0x838   : > { %v2368_v10 = vadd.f32 %v2366_v30, %v2336_v47  ;;  %v2372_v29 = vsub.f32 1.0, %v3313_v28  ;;  %v2376_v39 = vmul.f32 %v3313_v28, %v4020_v62  ;;  %v2425_v62 = vld [vmem:[%s3718_s9 + $0x8] sm:$0xff] (%p3434_p6)   ;;  %2422 = vst [vmem:[%s2404_s13] sm:$0xff] (%p3434_p6), %v2421_v59  }
 0x839   : > { %2426 = vst [vmem:[%s2404_s13 + $0x10] sm:$0xff] (%p3434_p6), %v2425_v62  }
 0x83a   : > { %3316 = vtanh.f32 %v2368_v10 }
 0x843   : > { %v3315_v53 = vpop.eup %3314 }
 0x844   : > { %v2373_v42 = vmul.f32 %v3315_v53, %v2371_v52 }
 0x846   : > { %v2377_v55 = vadd.f32 %v2375_v56, %v2373_v42 }
 0x847   : > { %v3317_v58 = vpop.eup %3316 }
 0x848   : > { %v2751_v61 = vpack.c.bf16 %v2377_v55, %v2377_v55  ;;  %2390 = vst.msk [vmem:[#allocation2] sm:$0xff] %vm351_vm2, %v2377_v55  ;;  %v2374_v50 = vmul.f32 %v3317_v58, %v2372_v29 }
 0x84a   : > { %2729 = vst.msk [vmem:[%s3718_s9 + $0x38] sm:$0xf] %vm1071_vm4, %v2751_v61  ;;  %v2378_v38 = vadd.f32 %v2376_v39, %v2374_v50  ;;  %2398 = sbr.rel (!%p3434_p6) target bundleno = 2135 (0x857), region = 89 }
 0x84c   : > { %v2752_v54 = vpack.c.bf16 %v2378_v38, %v2378_v38  ;;  %2391 = vst.msk [vmem:[#allocation2 + $0x8] sm:$0xff] %vm351_vm2, %v2378_v38 }
 0x84e   : > { %2730 = vst.msk [vmem:[%s3718_s9 + $0x3c] sm:$0xf] %vm1071_vm4, %v2752_v54 }
 0x855   : > { %v2449_v1 = vld [vmem:[%s3718_s9 + $0x38] sm:$0xff]  }
 0x856   : > { %2450 = vst [vmem:[%s2404_s13 + $0x70] sm:$0xff] %v2449_v1  }
 0x857 PF: > { %s15_s22 = sadd.s32 1, %s3365_s22   ;;  %s4088_s18 = smov %s3353_s19 }
 0x858   : > { %p12_p11 = scmp.ge.s32.totalorder %s15_s22, 4   ;;  %s4089_s19 = smov %s3439_s28 }
 0x859   : > { %s4090_s20 = smov %s3361_s21  ;;  %s4091_s21 = smov %s4093_s23 }
 0x85a   :  { %14 = sbr.rel (!%p12_p11) target bundleno = 3 (0x3), region = 197 }

</bundles_post_ra>
